<compile_context>
chip_gen: v5e
topology: v5e:2x2
jax: 0.10.0
libtpu: 0.0.40
codegen_flags: <defaults>
</compile_context>

<pallas_src>
import functools

import jax
import jax.numpy as jnp
from jax.experimental import pallas as pl
from jax.experimental.pallas import tpu as pltpu

EPS = 1e-5


def _vmem():
    # Whole-array blocks resident in VMEM (shapes here are small).
    return pl.BlockSpec(memory_space=pltpu.MemorySpace.VMEM)


def _bn_rows(h, gamma, beta):
    """Training-mode BatchNorm on (rows, channels): stats over rows, biased var."""
    mean = jnp.mean(h, axis=0, keepdims=True)
    var = jnp.mean((h - mean) ** 2, axis=0, keepdims=True)
    return (h - mean) * jax.lax.rsqrt(var + EPS) * gamma + beta


# ---------------------------------------------------------------------------
# Kernel A: conv1 (1x1) + bn1 + relu  ->  bf16 h1
# ---------------------------------------------------------------------------
def _conv1_kernel(x_ref, w_ref, g_ref, b_ref, o_ref):
    h = jnp.dot(x_ref[...], w_ref[...], preferred_element_type=jnp.float32)
    y = jnp.maximum(_bn_rows(h, g_ref[...], b_ref[...]), 0.0)
    o_ref[...] = y.astype(o_ref.dtype)


def conv1_bn_relu(x2d_bf16, w1_bf16, g1, b1):
    M, Cin = x2d_bf16.shape
    Cmid = w1_bf16.shape[1]
    cost = pl.CostEstimate(
        flops=2 * M * Cin * Cmid + 8 * M * Cmid,
        transcendentals=0,
        bytes_accessed=2 * (M * Cin + Cin * Cmid + M * Cmid) + 8 * Cmid,
    )
    return pl.pallas_call(
        _conv1_kernel,
        out_shape=jax.ShapeDtypeStruct((M, Cmid), jnp.bfloat16),
        in_specs=[_vmem()] * 4,
        out_specs=_vmem(),
        compiler_params=pltpu.CompilerParams(vmem_limit_bytes=32 * 1024 * 1024),
        cost_estimate=cost,
    )(x2d_bf16, w1_bf16, g1.reshape(1, Cmid), b1.reshape(1, Cmid))


# ---------------------------------------------------------------------------
# Kernel B: grouped 3x3 conv2 + bn2 + relu + conv3 + bn3 + identity + add + relu
# ---------------------------------------------------------------------------
def _tail_kernel(P_ref, id_ref, w2_ref, g2_ref, b2_ref, w3_ref, g3_ref, b3_ref,
                 *rest, stride, Ho, Wo, downsample):
    if downsample:
        wd_ref, gd_ref, bd_ref, o_ref = rest
    else:
        (o_ref,) = rest

    s = stride
    N = P_ref.shape[2]
    Cmid = P_ref.shape[5]
    M2 = N * Ho * Wo

    # Grouped 3x3 conv as 9 per-tap matmuls against a block-diagonal dense
    # weight (built host-side).  P is laid out as
    # (s, s, N, Hp//s, Wp//s, Cmid): picking a tap is two leading integer
    # indices (stride parity) plus contiguous slices -- no strided loads and
    # no im2col materialization in HBM.
    h2 = None
    for ky in range(3):
        ah, bh = divmod(ky, s)
        for kx in range(3):
            aw, bw = divmod(kx, s)
            tap = P_ref[bh, bw, :, pl.ds(ah, Ho), pl.ds(aw, Wo), :]
            tap = tap.reshape(M2, Cmid)                       # bf16 (M2, Cmid)
            part = jnp.dot(tap, w2_ref[ky * 3 + kx],
                           preferred_element_type=jnp.float32)
            h2 = part if h2 is None else h2 + part

    h2 = jnp.maximum(_bn_rows(h2, g2_ref[...], b2_ref[...]), 0.0)

    # conv3 (1x1) + bn3
    y = jnp.dot(h2.astype(jnp.bfloat16), w3_ref[...],
                preferred_element_type=jnp.float32)
    y = _bn_rows(y, g3_ref[...], b3_ref[...])

    if downsample:
        idv = jnp.dot(id_ref[...], wd_ref[...],
                      preferred_element_type=jnp.float32)
        idv = _bn_rows(idv, gd_ref[...], bd_ref[...])
    else:
        idv = id_ref[...].astype(jnp.float32)

    o_ref[...] = jnp.maximum(y + idv, 0.0).astype(o_ref.dtype)


# ---------------------------------------------------------------------------
# Forward pass wrapper
# ---------------------------------------------------------------------------
def resnext_block_forward(x, params, *, stride, cardinality):
    """x: NCHW float32.  Returns NCHW float32."""
    N, Cin, H, W = x.shape
    Cmid = params["w1"].shape[0]
    Cout = params["w3"].shape[0]
    G = cardinality
    cpg = Cmid // G          # input channels per group
    opg = Cmid // G          # output channels per group
    s = stride
    Ho = (H + 2 - 3) // s + 1
    Wo = (W + 2 - 3) // s + 1
    M2 = N * Ho * Wo

    xh = jnp.transpose(x, (0, 2, 3, 1))          # NCHW -> NHWC (glue)
    x2d = xh.reshape(N * H * W, Cin)

    # --- conv1 + bn1 + relu (fused kernel, bf16 matmul operands) ----------
    w1 = params["w1"].reshape(Cmid, Cin).T.astype(jnp.bfloat16)
    h1 = conv1_bn_relu(x2d.astype(jnp.bfloat16), w1, params["g1"], params["b1"])

    # --- pad + stride-parity split of h1 (cheap XLA glue, no 9x blowup) ----
    Hp = s * (-(-(H + 2) // s))
    Wp = s * (-(-(W + 2) // s))
    h1 = h1.reshape(N, H, W, Cmid)
    h1p = jnp.pad(h1, ((0, 0), (1, Hp - H - 1), (1, Wp - W - 1), (0, 0)))
    P = h1p.reshape(N, Hp // s, s, Wp // s, s, Cmid)
    P = jnp.transpose(P, (2, 4, 0, 1, 3, 5))     # (s, s, N, Hp//s, Wp//s, Cmid)

    # --- grouped conv2 weight -> block-diagonal (9, Cmid, Cmid), bf16 ------
    # W2d[t, g*cpg+c, g*opg+o] = w2[g*opg+o, c, ky, kx],  t = ky*3+kx
    w2 = params["w2"].reshape(G, opg, cpg, 3, 3)          # [g, o, c, ky, kx]
    w2 = jnp.transpose(w2, (3, 4, 0, 2, 1)).reshape(9, G, cpg, opg)
    eye_g = jnp.eye(G, dtype=w2.dtype)
    w2d = jnp.einsum("tgco,gh->tgcho", w2, eye_g).reshape(9, Cmid, Cmid)
    w2d = w2d.astype(jnp.bfloat16)

    w3 = params["w3"].reshape(Cout, Cmid).T.astype(jnp.bfloat16)

    downsample = (s != 1) or (Cin != Cout)
    if downsample:
        idsrc = xh[:, ::s, ::s, :].reshape(M2, Cin).astype(jnp.bfloat16)
        extra = (params["wd"].reshape(Cout, Cin).T.astype(jnp.bfloat16),
                 params["gd"].reshape(1, Cout),
                 params["bd"].reshape(1, Cout))
    else:
        idsrc = x2d                                   # identity (f32, Cin==Cout)
        extra = ()

    flops = 2 * M2 * 9 * Cmid * Cmid + 2 * M2 * Cmid * Cout + 16 * M2 * Cout
    if downsample:
        flops += 2 * M2 * Cin * Cout
    bytes_acc = (2 * int(P.size) + idsrc.dtype.itemsize * int(idsrc.size)
                 + 2 * (9 * Cmid * Cmid + Cmid * Cout) + 4 * M2 * Cout)

    kernel = functools.partial(_tail_kernel, stride=s, Ho=Ho, Wo=Wo,
                               downsample=downsample)
    out2d = pl.pallas_call(
        kernel,
        out_shape=jax.ShapeDtypeStruct((M2, Cout), jnp.float32),
        in_specs=[_vmem()] * (8 + len(extra)),
        out_specs=_vmem(),
        compiler_params=pltpu.CompilerParams(vmem_limit_bytes=32 * 1024 * 1024),
        cost_estimate=pl.CostEstimate(flops=flops, transcendentals=0,
                                      bytes_accessed=bytes_acc),
    )(P, idsrc, w2d,
      params["g2"].reshape(1, Cmid), params["b2"].reshape(1, Cmid),
      w3, params["g3"].reshape(1, Cout), params["b3"].reshape(1, Cout),
      *extra)

    out = out2d.reshape(N, Ho, Wo, Cout)
    return jnp.transpose(out, (0, 3, 1, 2))      # NHWC -> NCHW (glue)


# ---------------------------------------------------------------------------
# Pure-JAX reference (default precision, for correctness check)
# ---------------------------------------------------------------------------
def reference_forward(x, params, *, stride, cardinality):
    def bn(h, g, b):
        mean = jnp.mean(h, axis=(0, 2, 3), keepdims=True)
        var = jnp.mean((h - mean) ** 2, axis=(0, 2, 3), keepdims=True)
        return ((h - mean) * jax.lax.rsqrt(var + EPS) * g.reshape(1, -1, 1, 1)
                + b.reshape(1, -1, 1, 1))

    dn = ("NCHW", "OIHW", "NCHW")

    def conv(inp, w, s, pad, fg=1):
        return jax.lax.conv_general_dilated(
            inp, w, (s, s), pad, dimension_numbers=dn, feature_group_count=fg)

    Cin, Cout = x.shape[1], params["w3"].shape[0]
    out = jax.nn.relu(bn(conv(x, params["w1"], 1, "VALID"),
                         params["g1"], params["b1"]))
    out = jax.nn.relu(bn(conv(out, params["w2"], stride, [(1, 1), (1, 1)],
                              cardinality),
                         params["g2"], params["b2"]))
    out = bn(conv(out, params["w3"], 1, "VALID"), params["g3"], params["b3"])
    identity = x
    if stride != 1 or Cin != Cout:
        identity = bn(conv(x, params["wd"], stride, "VALID"),
                      params["gd"], params["bd"])
    return jax.nn.relu(out + identity)


# ---------------------------------------------------------------------------
if __name__ == "__main__":
    # Module config (small, consistent with ResNeXtBlock.__init__):
    N, Cin, H, W = 2, 16, 16, 16
    Cout, cardinality, stride = 64, 4, 2
    Cmid = cardinality * Cout // 32          # = 8
    cpg = Cmid // cardinality                # = 2 input channels per group

    key = jax.random.PRNGKey(0)
    ks = jax.random.split(key, 13)
    params = {
        "w1": 0.1 * jax.random.normal(ks[0], (Cmid, Cin, 1, 1), jnp.float32),
        "g1": 1.0 + 0.1 * jax.random.normal(ks[1], (Cmid,), jnp.float32),
        "b1": 0.1 * jax.random.normal(ks[2], (Cmid,), jnp.float32),
        "w2": 0.1 * jax.random.normal(ks[3], (Cmid, cpg, 3, 3), jnp.float32),
        "g2": 1.0 + 0.1 * jax.random.normal(ks[4], (Cmid,), jnp.float32),
        "b2": 0.1 * jax.random.normal(ks[5], (Cmid,), jnp.float32),
        "w3": 0.1 * jax.random.normal(ks[6], (Cout, Cmid, 1, 1), jnp.float32),
        "g3": 1.0 + 0.1 * jax.random.normal(ks[7], (Cout,), jnp.float32),
        "b3": 0.1 * jax.random.normal(ks[8], (Cout,), jnp.float32),
        "wd": 0.1 * jax.random.normal(ks[9], (Cout, Cin, 1, 1), jnp.float32),
        "gd": 1.0 + 0.1 * jax.random.normal(ks[10], (Cout,), jnp.float32),
        "bd": 0.1 * jax.random.normal(ks[11], (Cout,), jnp.float32),
    }
    x = jax.random.normal(ks[12], (N, Cin, H, W), jnp.float32)

    fwd = jax.jit(functools.partial(resnext_block_forward,
                                    stride=stride, cardinality=cardinality))
    out = jax.block_until_ready(fwd(x, params))

    ref = jax.block_until_ready(
        reference_forward(x, params, stride=stride, cardinality=cardinality))

    assert out.shape == (N, Cout, H // stride, W // stride), out.shape
    # Tolerance reflects single-pass bf16 MXU matmuls with f32 accumulation.
    max_err = float(jnp.max(jnp.abs(out - ref)))
    assert jnp.allclose(out, ref, atol=3e-2, rtol=3e-2), max_err

    print("KERNEL_OK")
</pallas_src>

<mosaic_0001>
module attributes {stable_mosaic.version = 11 : i64} {
  func.func @_conv1_kernel(%arg0: memref<512x16xbf16, #tpu.memory_space<vmem>>, %arg1: memref<16x8xbf16, #tpu.memory_space<vmem>>, %arg2: memref<1x8xf32, #tpu.memory_space<vmem>>, %arg3: memref<1x8xf32, #tpu.memory_space<vmem>>, %arg4: memref<512x8xbf16, #tpu.memory_space<vmem>>) attributes {dimension_semantics = [], scalar_prefetch = 0 : i64, scratch_operands = 0 : i64, tpu.core_type = #tpu.core_type<tc>} {
    %c0 = arith.constant 0 : index
    %c0_0 = arith.constant 0 : index
    %0 = vector.load %arg0[%c0, %c0_0] : memref<512x16xbf16, #tpu.memory_space<vmem>>, vector<512x16xbf16>
    %c0_1 = arith.constant 0 : index
    %c0_2 = arith.constant 0 : index
    %1 = vector.load %arg1[%c0_1, %c0_2] : memref<16x8xbf16, #tpu.memory_space<vmem>>, vector<16x8xbf16>
    %cst = arith.constant dense<0.000000e+00> : vector<512x8xf32>
    %2 = tpu.matmul %0, %1, %cst {dimension_numbers = #tpu.dot_dimension_numbers<[1], [0], [0], [1], [0, 0, 1, 1], [], []>} : vector<512x16xbf16>, vector<16x8xbf16>, vector<512x8xf32> -> vector<512x8xf32>
    %c0_3 = arith.constant 0 : index
    %c0_4 = arith.constant 0 : index
    %3 = vector.load %arg2[%c0_3, %c0_4] : memref<1x8xf32, #tpu.memory_space<vmem>>, vector<1x8xf32>
    %c0_5 = arith.constant 0 : index
    %c0_6 = arith.constant 0 : index
    %4 = vector.load %arg3[%c0_5, %c0_6] : memref<1x8xf32, #tpu.memory_space<vmem>>, vector<1x8xf32>
    %cst_7 = arith.constant dense<0.000000e+00> : vector<8xf32>
    %5 = vector.multi_reduction <add>, %2, %cst_7 [0] : vector<512x8xf32> to vector<8xf32>
    %6 = vector.shape_cast %5 : vector<8xf32> to vector<1x8xf32>
    %cst_8 = arith.constant 5.120000e+02 : f32
    %7 = vector.broadcast %cst_8 : f32 to vector<1x8xf32>
    %8 = arith.divf %6, %7 : vector<1x8xf32>
    %9 = vector.broadcast %8 : vector<1x8xf32> to vector<512x8xf32>
    %10 = arith.subf %2, %9 : vector<512x8xf32>
    %11 = arith.mulf %10, %10 : vector<512x8xf32>
    %cst_9 = arith.constant dense<0.000000e+00> : vector<8xf32>
    %12 = vector.multi_reduction <add>, %11, %cst_9 [0] : vector<512x8xf32> to vector<8xf32>
    %13 = vector.shape_cast %12 : vector<8xf32> to vector<1x8xf32>
    %cst_10 = arith.constant 5.120000e+02 : f32
    %14 = vector.broadcast %cst_10 : f32 to vector<1x8xf32>
    %15 = arith.divf %13, %14 : vector<1x8xf32>
    %16 = vector.broadcast %8 : vector<1x8xf32> to vector<512x8xf32>
    %17 = arith.subf %2, %16 : vector<512x8xf32>
    %cst_11 = arith.constant 9.99999974E-6 : f32
    %18 = vector.broadcast %cst_11 : f32 to vector<1x8xf32>
    %19 = arith.addf %15, %18 : vector<1x8xf32>
    %20 = math.rsqrt %19 : vector<1x8xf32>
    %21 = vector.broadcast %20 : vector<1x8xf32> to vector<512x8xf32>
    %22 = arith.mulf %17, %21 : vector<512x8xf32>
    %23 = vector.broadcast %3 : vector<1x8xf32> to vector<512x8xf32>
    %24 = arith.mulf %22, %23 : vector<512x8xf32>
    %25 = vector.broadcast %4 : vector<1x8xf32> to vector<512x8xf32>
    %26 = arith.addf %24, %25 : vector<512x8xf32>
    %cst_12 = arith.constant 0.000000e+00 : f32
    %27 = vector.broadcast %cst_12 : f32 to vector<512x8xf32>
    %28 = arith.maximumf %26, %27 : vector<512x8xf32>
    %29 = arith.truncf %28 : vector<512x8xf32> to vector<512x8xbf16>
    %c0_13 = arith.constant 0 : index
    %c0_14 = arith.constant 0 : index
    %30 = vector.load %arg4[%c0_13, %c0_14] : memref<512x8xbf16, #tpu.memory_space<vmem>>, vector<512x8xbf16>
    tpu.vector_store %arg4[%c0_13, %c0_14], %29 {strides = array<i32>} : memref<512x8xbf16, #tpu.memory_space<vmem>>, vector<512x8xbf16>,
    return
  }
}

module attributes {stable_mosaic.version = 11 : i64} {
  func.func @_tail_kernel(%arg0: memref<2x2x2x9x9x8xbf16, #tpu.memory_space<vmem>>, %arg1: memref<128x16xbf16, #tpu.memory_space<vmem>>, %arg2: memref<9x8x8xbf16, #tpu.memory_space<vmem>>, %arg3: memref<1x8xf32, #tpu.memory_space<vmem>>, %arg4: memref<1x8xf32, #tpu.memory_space<vmem>>, %arg5: memref<8x64xbf16, #tpu.memory_space<vmem>>, %arg6: memref<1x64xf32, #tpu.memory_space<vmem>>, %arg7: memref<1x64xf32, #tpu.memory_space<vmem>>, %arg8: memref<16x64xbf16, #tpu.memory_space<vmem>>, %arg9: memref<1x64xf32, #tpu.memory_space<vmem>>, %arg10: memref<1x64xf32, #tpu.memory_space<vmem>>, %arg11: memref<128x64xf32, #tpu.memory_space<vmem>>) attributes {dimension_semantics = [], scalar_prefetch = 0 : i64, scratch_operands = 0 : i64, tpu.core_type = #tpu.core_type<tc>} {
    %c0 = arith.constant 0 : index
    %c0_0 = arith.constant 0 : index
    %c0_1 = arith.constant 0 : index
    %c0_2 = arith.constant 0 : index
    %c0_3 = arith.constant 0 : index
    %c0_4 = arith.constant 0 : index
    %0 = vector.load %arg0[%c0, %c0_0, %c0_1, %c0_2, %c0_3, %c0_4] : memref<2x2x2x9x9x8xbf16, #tpu.memory_space<vmem>>, vector<1x1x2x8x8x8xbf16>
    %1 = vector.shape_cast %0 : vector<1x1x2x8x8x8xbf16> to vector<2x8x8x8xbf16>
    %2 = vector.shape_cast %1 : vector<2x8x8x8xbf16> to vector<128x8xbf16>
    %c0_5 = arith.constant 0 : index
    %c0_6 = arith.constant 0 : index
    %c0_7 = arith.constant 0 : index
    %3 = vector.load %arg2[%c0_5, %c0_6, %c0_7] : memref<9x8x8xbf16, #tpu.memory_space<vmem>>, vector<1x8x8xbf16>
    %4 = vector.shape_cast %3 : vector<1x8x8xbf16> to vector<8x8xbf16>
    %cst = arith.constant dense<0.000000e+00> : vector<128x8xf32>
    %5 = tpu.matmul %2, %4, %cst {dimension_numbers = #tpu.dot_dimension_numbers<[1], [0], [0], [1], [0, 0, 1, 1], [], []>} : vector<128x8xbf16>, vector<8x8xbf16>, vector<128x8xf32> -> vector<128x8xf32>
    %c0_8 = arith.constant 0 : index
    %c1 = arith.constant 1 : index
    %c0_9 = arith.constant 0 : index
    %c0_10 = arith.constant 0 : index
    %c0_11 = arith.constant 0 : index
    %c0_12 = arith.constant 0 : index
    %6 = vector.load %arg0[%c0_8, %c1, %c0_9, %c0_10, %c0_11, %c0_12] : memref<2x2x2x9x9x8xbf16, #tpu.memory_space<vmem>>, vector<1x1x2x8x8x8xbf16>
    %7 = vector.shape_cast %6 : vector<1x1x2x8x8x8xbf16> to vector<2x8x8x8xbf16>
    %8 = vector.shape_cast %7 : vector<2x8x8x8xbf16> to vector<128x8xbf16>
    %c1_13 = arith.constant 1 : index
    %c0_14 = arith.constant 0 : index
    %c0_15 = arith.constant 0 : index
    %9 = vector.load %arg2[%c1_13, %c0_14, %c0_15] : memref<9x8x8xbf16, #tpu.memory_space<vmem>>, vector<1x8x8xbf16>
    %10 = vector.shape_cast %9 : vector<1x8x8xbf16> to vector<8x8xbf16>
    %cst_16 = arith.constant dense<0.000000e+00> : vector<128x8xf32>
    %11 = tpu.matmul %8, %10, %cst_16 {dimension_numbers = #tpu.dot_dimension_numbers<[1], [0], [0], [1], [0, 0, 1, 1], [], []>} : vector<128x8xbf16>, vector<8x8xbf16>, vector<128x8xf32> -> vector<128x8xf32>
    %12 = arith.addf %5, %11 : vector<128x8xf32>
    %c0_17 = arith.constant 0 : index
    %c0_18 = arith.constant 0 : index
    %c0_19 = arith.constant 0 : index
    %c0_20 = arith.constant 0 : index
    %c1_21 = arith.constant 1 : index
    %c0_22 = arith.constant 0 : index
    %13 = vector.load %arg0[%c0_17, %c0_18, %c0_19, %c0_20, %c1_21, %c0_22] : memref<2x2x2x9x9x8xbf16, #tpu.memory_space<vmem>>, vector<1x1x2x8x8x8xbf16>
    %14 = vector.shape_cast %13 : vector<1x1x2x8x8x8xbf16> to vector<2x8x8x8xbf16>
    %15 = vector.shape_cast %14 : vector<2x8x8x8xbf16> to vector<128x8xbf16>
    %c2 = arith.constant 2 : index
    %c0_23 = arith.constant 0 : index
    %c0_24 = arith.constant 0 : index
    %16 = vector.load %arg2[%c2, %c0_23, %c0_24] : memref<9x8x8xbf16, #tpu.memory_space<vmem>>, vector<1x8x8xbf16>
    %17 = vector.shape_cast %16 : vector<1x8x8xbf16> to vector<8x8xbf16>
    %cst_25 = arith.constant dense<0.000000e+00> : vector<128x8xf32>
    %18 = tpu.matmul %15, %17, %cst_25 {dimension_numbers = #tpu.dot_dimension_numbers<[1], [0], [0], [1], [0, 0, 1, 1], [], []>} : vector<128x8xbf16>, vector<8x8xbf16>, vector<128x8xf32> -> vector<128x8xf32>
    %19 = arith.addf %12, %18 : vector<128x8xf32>
    %c1_26 = arith.constant 1 : index
    %c0_27 = arith.constant 0 : index
    %c0_28 = arith.constant 0 : index
    %c0_29 = arith.constant 0 : index
    %c0_30 = arith.constant 0 : index
    %c0_31 = arith.constant 0 : index
    %20 = vector.load %arg0[%c1_26, %c0_27, %c0_28, %c0_29, %c0_30, %c0_31] : memref<2x2x2x9x9x8xbf16, #tpu.memory_space<vmem>>, vector<1x1x2x8x8x8xbf16>
    %21 = vector.shape_cast %20 : vector<1x1x2x8x8x8xbf16> to vector<2x8x8x8xbf16>
    %22 = vector.shape_cast %21 : vector<2x8x8x8xbf16> to vector<128x8xbf16>
    %c3 = arith.constant 3 : index
    %c0_32 = arith.constant 0 : index
    %c0_33 = arith.constant 0 : index
    %23 = vector.load %arg2[%c3, %c0_32, %c0_33] : memref<9x8x8xbf16, #tpu.memory_space<vmem>>, vector<1x8x8xbf16>
    %24 = vector.shape_cast %23 : vector<1x8x8xbf16> to vector<8x8xbf16>
    %cst_34 = arith.constant dense<0.000000e+00> : vector<128x8xf32>
    %25 = tpu.matmul %22, %24, %cst_34 {dimension_numbers = #tpu.dot_dimension_numbers<[1], [0], [0], [1], [0, 0, 1, 1], [], []>} : vector<128x8xbf16>, vector<8x8xbf16>, vector<128x8xf32> -> vector<128x8xf32>
    %26 = arith.addf %19, %25 : vector<128x8xf32>
    %c1_35 = arith.constant 1 : index
    %c1_36 = arith.constant 1 : index
    %c0_37 = arith.constant 0 : index
    %c0_38 = arith.constant 0 : index
    %c0_39 = arith.constant 0 : index
    %c0_40 = arith.constant 0 : index
    %27 = vector.load %arg0[%c1_35, %c1_36, %c0_37, %c0_38, %c0_39, %c0_40] : memref<2x2x2x9x9x8xbf16, #tpu.memory_space<vmem>>, vector<1x1x2x8x8x8xbf16>
    %28 = vector.shape_cast %27 : vector<1x1x2x8x8x8xbf16> to vector<2x8x8x8xbf16>
    %29 = vector.shape_cast %28 : vector<2x8x8x8xbf16> to vector<128x8xbf16>
    %c4 = arith.constant 4 : index
    %c0_41 = arith.constant 0 : index
    %c0_42 = arith.constant 0 : index
    %30 = vector.load %arg2[%c4, %c0_41, %c0_42] : memref<9x8x8xbf16, #tpu.memory_space<vmem>>, vector<1x8x8xbf16>
    %31 = vector.shape_cast %30 : vector<1x8x8xbf16> to vector<8x8xbf16>
    %cst_43 = arith.constant dense<0.000000e+00> : vector<128x8xf32>
    %32 = tpu.matmul %29, %31, %cst_43 {dimension_numbers = #tpu.dot_dimension_numbers<[1], [0], [0], [1], [0, 0, 1, 1], [], []>} : vector<128x8xbf16>, vector<8x8xbf16>, vector<128x8xf32> -> vector<128x8xf32>
    %33 = arith.addf %26, %32 : vector<128x8xf32>
    %c1_44 = arith.constant 1 : index
    %c0_45 = arith.constant 0 : index
    %c0_46 = arith.constant 0 : index
    %c0_47 = arith.constant 0 : index
    %c1_48 = arith.constant 1 : index
    %c0_49 = arith.constant 0 : index
    %34 = vector.load %arg0[%c1_44, %c0_45, %c0_46, %c0_47, %c1_48, %c0_49] : memref<2x2x2x9x9x8xbf16, #tpu.memory_space<vmem>>, vector<1x1x2x8x8x8xbf16>
    %35 = vector.shape_cast %34 : vector<1x1x2x8x8x8xbf16> to vector<2x8x8x8xbf16>
    %36 = vector.shape_cast %35 : vector<2x8x8x8xbf16> to vector<128x8xbf16>
    %c5 = arith.constant 5 : index
    %c0_50 = arith.constant 0 : index
    %c0_51 = arith.constant 0 : index
    %37 = vector.load %arg2[%c5, %c0_50, %c0_51] : memref<9x8x8xbf16, #tpu.memory_space<vmem>>, vector<1x8x8xbf16>
    %38 = vector.shape_cast %37 : vector<1x8x8xbf16> to vector<8x8xbf16>
    %cst_52 = arith.constant dense<0.000000e+00> : vector<128x8xf32>
    %39 = tpu.matmul %36, %38, %cst_52 {dimension_numbers = #tpu.dot_dimension_numbers<[1], [0], [0], [1], [0, 0, 1, 1], [], []>} : vector<128x8xbf16>, vector<8x8xbf16>, vector<128x8xf32> -> vector<128x8xf32>
    %40 = arith.addf %33, %39 : vector<128x8xf32>
    %c0_53 = arith.constant 0 : index
    %c0_54 = arith.constant 0 : index
    %c0_55 = arith.constant 0 : index
    %c1_56 = arith.constant 1 : index
    %c0_57 = arith.constant 0 : index
    %c0_58 = arith.constant 0 : index
    %41 = vector.load %arg0[%c0_53, %c0_54, %c0_55, %c1_56, %c0_57, %c0_58] : memref<2x2x2x9x9x8xbf16, #tpu.memory_space<vmem>>, vector<1x1x2x8x8x8xbf16>
    %42 = vector.shape_cast %41 : vector<1x1x2x8x8x8xbf16> to vector<2x8x8x8xbf16>
    %43 = vector.shape_cast %42 : vector<2x8x8x8xbf16> to vector<128x8xbf16>
    %c6 = arith.constant 6 : index
    %c0_59 = arith.constant 0 : index
    %c0_60 = arith.constant 0 : index
    %44 = vector.load %arg2[%c6, %c0_59, %c0_60] : memref<9x8x8xbf16, #tpu.memory_space<vmem>>, vector<1x8x8xbf16>
    %45 = vector.shape_cast %44 : vector<1x8x8xbf16> to vector<8x8xbf16>
    %cst_61 = arith.constant dense<0.000000e+00> : vector<128x8xf32>
    %46 = tpu.matmul %43, %45, %cst_61 {dimension_numbers = #tpu.dot_dimension_numbers<[1], [0], [0], [1], [0, 0, 1, 1], [], []>} : vector<128x8xbf16>, vector<8x8xbf16>, vector<128x8xf32> -> vector<128x8xf32>
    %47 = arith.addf %40, %46 : vector<128x8xf32>
    %c0_62 = arith.constant 0 : index
    %c1_63 = arith.constant 1 : index
    %c0_64 = arith.constant 0 : index
    %c1_65 = arith.constant 1 : index
    %c0_66 = arith.constant 0 : index
    %c0_67 = arith.constant 0 : index
    %48 = vector.load %arg0[%c0_62, %c1_63, %c0_64, %c1_65, %c0_66, %c0_67] : memref<2x2x2x9x9x8xbf16, #tpu.memory_space<vmem>>, vector<1x1x2x8x8x8xbf16>
    %49 = vector.shape_cast %48 : vector<1x1x2x8x8x8xbf16> to vector<2x8x8x8xbf16>
    %50 = vector.shape_cast %49 : vector<2x8x8x8xbf16> to vector<128x8xbf16>
    %c7 = arith.constant 7 : index
    %c0_68 = arith.constant 0 : index
    %c0_69 = arith.constant 0 : index
    %51 = vector.load %arg2[%c7, %c0_68, %c0_69] : memref<9x8x8xbf16, #tpu.memory_space<vmem>>, vector<1x8x8xbf16>
    %52 = vector.shape_cast %51 : vector<1x8x8xbf16> to vector<8x8xbf16>
    %cst_70 = arith.constant dense<0.000000e+00> : vector<128x8xf32>
    %53 = tpu.matmul %50, %52, %cst_70 {dimension_numbers = #tpu.dot_dimension_numbers<[1], [0], [0], [1], [0, 0, 1, 1], [], []>} : vector<128x8xbf16>, vector<8x8xbf16>, vector<128x8xf32> -> vector<128x8xf32>
    %54 = arith.addf %47, %53 : vector<128x8xf32>
    %c0_71 = arith.constant 0 : index
    %c0_72 = arith.constant 0 : index
    %c0_73 = arith.constant 0 : index
    %c1_74 = arith.constant 1 : index
    %c1_75 = arith.constant 1 : index
    %c0_76 = arith.constant 0 : index
    %55 = vector.load %arg0[%c0_71, %c0_72, %c0_73, %c1_74, %c1_75, %c0_76] : memref<2x2x2x9x9x8xbf16, #tpu.memory_space<vmem>>, vector<1x1x2x8x8x8xbf16>
    %56 = vector.shape_cast %55 : vector<1x1x2x8x8x8xbf16> to vector<2x8x8x8xbf16>
    %57 = vector.shape_cast %56 : vector<2x8x8x8xbf16> to vector<128x8xbf16>
    %c8 = arith.constant 8 : index
    %c0_77 = arith.constant 0 : index
    %c0_78 = arith.constant 0 : index
    %58 = vector.load %arg2[%c8, %c0_77, %c0_78] : memref<9x8x8xbf16, #tpu.memory_space<vmem>>, vector<1x8x8xbf16>
    %59 = vector.shape_cast %58 : vector<1x8x8xbf16> to vector<8x8xbf16>
    %cst_79 = arith.constant dense<0.000000e+00> : vector<128x8xf32>
    %60 = tpu.matmul %57, %59, %cst_79 {dimension_numbers = #tpu.dot_dimension_numbers<[1], [0], [0], [1], [0, 0, 1, 1], [], []>} : vector<128x8xbf16>, vector<8x8xbf16>, vector<128x8xf32> -> vector<128x8xf32>
    %61 = arith.addf %54, %60 : vector<128x8xf32>
    %c0_80 = arith.constant 0 : index
    %c0_81 = arith.constant 0 : index
    %62 = vector.load %arg3[%c0_80, %c0_81] : memref<1x8xf32, #tpu.memory_space<vmem>>, vector<1x8xf32>
    %c0_82 = arith.constant 0 : index
    %c0_83 = arith.constant 0 : index
    %63 = vector.load %arg4[%c0_82, %c0_83] : memref<1x8xf32, #tpu.memory_space<vmem>>, vector<1x8xf32>
    %cst_84 = arith.constant dense<0.000000e+00> : vector<8xf32>
    %64 = vector.multi_reduction <add>, %61, %cst_84 [0] : vector<128x8xf32> to vector<8xf32>
    %65 = vector.shape_cast %64 : vector<8xf32> to vector<1x8xf32>
    %cst_85 = arith.constant 1.280000e+02 : f32
    %66 = vector.broadcast %cst_85 : f32 to vector<1x8xf32>
    %67 = arith.divf %65, %66 : vector<1x8xf32>
    %68 = vector.broadcast %67 : vector<1x8xf32> to vector<128x8xf32>
    %69 = arith.subf %61, %68 : vector<128x8xf32>
    %70 = arith.mulf %69, %69 : vector<128x8xf32>
    %cst_86 = arith.constant dense<0.000000e+00> : vector<8xf32>
    %71 = vector.multi_reduction <add>, %70, %cst_86 [0] : vector<128x8xf32> to vector<8xf32>
    %72 = vector.shape_cast %71 : vector<8xf32> to vector<1x8xf32>
    %cst_87 = arith.constant 1.280000e+02 : f32
    %73 = vector.broadcast %cst_87 : f32 to vector<1x8xf32>
    %74 = arith.divf %72, %73 : vector<1x8xf32>
    %75 = vector.broadcast %67 : vector<1x8xf32> to vector<128x8xf32>
    %76 = arith.subf %61, %75 : vector<128x8xf32>
    %cst_88 = arith.constant 9.99999974E-6 : f32
    %77 = vector.broadcast %cst_88 : f32 to vector<1x8xf32>
    %78 = arith.addf %74, %77 : vector<1x8xf32>
    %79 = math.rsqrt %78 : vector<1x8xf32>
    %80 = vector.broadcast %79 : vector<1x8xf32> to vector<128x8xf32>
    %81 = arith.mulf %76, %80 : vector<128x8xf32>
    %82 = vector.broadcast %62 : vector<1x8xf32> to vector<128x8xf32>
    %83 = arith.mulf %81, %82 : vector<128x8xf32>
    %84 = vector.broadcast %63 : vector<1x8xf32> to vector<128x8xf32>
    %85 = arith.addf %83, %84 : vector<128x8xf32>
    %cst_89 = arith.constant 0.000000e+00 : f32
    %86 = vector.broadcast %cst_89 : f32 to vector<128x8xf32>
    %87 = arith.maximumf %85, %86 : vector<128x8xf32>
    %88 = arith.truncf %87 : vector<128x8xf32> to vector<128x8xbf16>
    %c0_90 = arith.constant 0 : index
    %c0_91 = arith.constant 0 : index
    %89 = vector.load %arg5[%c0_90, %c0_91] : memref<8x64xbf16, #tpu.memory_space<vmem>>, vector<8x64xbf16>
    %cst_92 = arith.constant dense<0.000000e+00> : vector<128x64xf32>
    %90 = tpu.matmul %88, %89, %cst_92 {dimension_numbers = #tpu.dot_dimension_numbers<[1], [0], [0], [1], [0, 0, 1, 1], [], []>} : vector<128x8xbf16>, vector<8x64xbf16>, vector<128x64xf32> -> vector<128x64xf32>
    %c0_93 = arith.constant 0 : index
    %c0_94 = arith.constant 0 : index
    %91 = vector.load %arg6[%c0_93, %c0_94] : memref<1x64xf32, #tpu.memory_space<vmem>>, vector<1x64xf32>
    %c0_95 = arith.constant 0 : index
    %c0_96 = arith.constant 0 : index
    %92 = vector.load %arg7[%c0_95, %c0_96] : memref<1x64xf32, #tpu.memory_space<vmem>>, vector<1x64xf32>
    %cst_97 = arith.constant dense<0.000000e+00> : vector<64xf32>
    %93 = vector.multi_reduction <add>, %90, %cst_97 [0] : vector<128x64xf32> to vector<64xf32>
    %94 = vector.shape_cast %93 : vector<64xf32> to vector<1x64xf32>
    %cst_98 = arith.constant 1.280000e+02 : f32
    %95 = vector.broadcast %cst_98 : f32 to vector<1x64xf32>
    %96 = arith.divf %94, %95 : vector<1x64xf32>
    %97 = vector.broadcast %96 : vector<1x64xf32> to vector<128x64xf32>
    %98 = arith.subf %90, %97 : vector<128x64xf32>
    %99 = arith.mulf %98, %98 : vector<128x64xf32>
    %cst_99 = arith.constant dense<0.000000e+00> : vector<64xf32>
    %100 = vector.multi_reduction <add>, %99, %cst_99 [0] : vector<128x64xf32> to vector<64xf32>
    %101 = vector.shape_cast %100 : vector<64xf32> to vector<1x64xf32>
    %cst_100 = arith.constant 1.280000e+02 : f32
    %102 = vector.broadcast %cst_100 : f32 to vector<1x64xf32>
    %103 = arith.divf %101, %102 : vector<1x64xf32>
    %104 = vector.broadcast %96 : vector<1x64xf32> to vector<128x64xf32>
    %105 = arith.subf %90, %104 : vector<128x64xf32>
    %cst_101 = arith.constant 9.99999974E-6 : f32
    %106 = vector.broadcast %cst_101 : f32 to vector<1x64xf32>
    %107 = arith.addf %103, %106 : vector<1x64xf32>
    %108 = math.rsqrt %107 : vector<1x64xf32>
    %109 = vector.broadcast %108 : vector<1x64xf32> to vector<128x64xf32>
    %110 = arith.mulf %105, %109 : vector<128x64xf32>
    %111 = vector.broadcast %91 : vector<1x64xf32> to vector<128x64xf32>
    %112 = arith.mulf %110, %111 : vector<128x64xf32>
    %113 = vector.broadcast %92 : vector<1x64xf32> to vector<128x64xf32>
    %114 = arith.addf %112, %113 : vector<128x64xf32>
    %c0_102 = arith.constant 0 : index
    %c0_103 = arith.constant 0 : index
    %115 = vector.load %arg1[%c0_102, %c0_103] : memref<128x16xbf16, #tpu.memory_space<vmem>>, vector<128x16xbf16>
    %c0_104 = arith.constant 0 : index
    %c0_105 = arith.constant 0 : index
    %116 = vector.load %arg8[%c0_104, %c0_105] : memref<16x64xbf16, #tpu.memory_space<vmem>>, vector<16x64xbf16>
    %cst_106 = arith.constant dense<0.000000e+00> : vector<128x64xf32>
    %117 = tpu.matmul %115, %116, %cst_106 {dimension_numbers = #tpu.dot_dimension_numbers<[1], [0], [0], [1], [0, 0, 1, 1], [], []>} : vector<128x16xbf16>, vector<16x64xbf16>, vector<128x64xf32> -> vector<128x64xf32>
    %c0_107 = arith.constant 0 : index
    %c0_108 = arith.constant 0 : index
    %118 = vector.load %arg9[%c0_107, %c0_108] : memref<1x64xf32, #tpu.memory_space<vmem>>, vector<1x64xf32>
    %c0_109 = arith.constant 0 : index
    %c0_110 = arith.constant 0 : index
    %119 = vector.load %arg10[%c0_109, %c0_110] : memref<1x64xf32, #tpu.memory_space<vmem>>, vector<1x64xf32>
    %cst_111 = arith.constant dense<0.000000e+00> : vector<64xf32>
    %120 = vector.multi_reduction <add>, %117, %cst_111 [0] : vector<128x64xf32> to vector<64xf32>
    %121 = vector.shape_cast %120 : vector<64xf32> to vector<1x64xf32>
    %cst_112 = arith.constant 1.280000e+02 : f32
    %122 = vector.broadcast %cst_112 : f32 to vector<1x64xf32>
    %123 = arith.divf %121, %122 : vector<1x64xf32>
    %124 = vector.broadcast %123 : vector<1x64xf32> to vector<128x64xf32>
    %125 = arith.subf %117, %124 : vector<128x64xf32>
    %126 = arith.mulf %125, %125 : vector<128x64xf32>
    %cst_113 = arith.constant dense<0.000000e+00> : vector<64xf32>
    %127 = vector.multi_reduction <add>, %126, %cst_113 [0] : vector<128x64xf32> to vector<64xf32>
    %128 = vector.shape_cast %127 : vector<64xf32> to vector<1x64xf32>
    %cst_114 = arith.constant 1.280000e+02 : f32
    %129 = vector.broadcast %cst_114 : f32 to vector<1x64xf32>
    %130 = arith.divf %128, %129 : vector<1x64xf32>
    %131 = vector.broadcast %123 : vector<1x64xf32> to vector<128x64xf32>
    %132 = arith.subf %117, %131 : vector<128x64xf32>
    %cst_115 = arith.constant 9.99999974E-6 : f32
    %133 = vector.broadcast %cst_115 : f32 to vector<1x64xf32>
    %134 = arith.addf %130, %133 : vector<1x64xf32>
    %135 = math.rsqrt %134 : vector<1x64xf32>
    %136 = vector.broadcast %135 : vector<1x64xf32> to vector<128x64xf32>
    %137 = arith.mulf %132, %136 : vector<128x64xf32>
    %138 = vector.broadcast %118 : vector<1x64xf32> to vector<128x64xf32>
    %139 = arith.mulf %137, %138 : vector<128x64xf32>
    %140 = vector.broadcast %119 : vector<1x64xf32> to vector<128x64xf32>
    %141 = arith.addf %139, %140 : vector<128x64xf32>
    %142 = arith.addf %114, %141 : vector<128x64xf32>
    %cst_116 = arith.constant 0.000000e+00 : f32
    %143 = vector.broadcast %cst_116 : f32 to vector<128x64xf32>
    %144 = arith.maximumf %142, %143 : vector<128x64xf32>
    %c0_117 = arith.constant 0 : index
    %c0_118 = arith.constant 0 : index
    %145 = vector.load %arg11[%c0_117, %c0_118] : memref<128x64xf32, #tpu.memory_space<vmem>>, vector<128x64xf32>
    tpu.vector_store %arg11[%c0_117, %c0_118], %144 {strides = array<i32>} : memref<128x64xf32, #tpu.memory_space<vmem>>, vector<128x64xf32>,
    return
  }
}

</mosaic_0001>

<bundles_post_ra>
// kernel: resnext_block_forward.2
= control target key start
LH: loop header
LB: loop body
LE: loop exit
PB: predicated region body
PF: predicated region fallthrough
CT: control target
= control target key end

     0   :  { %vm250_vm0 = vcmask 130048   ;;  %vm518_vm1 = vcmask 64512   ;;  %vm1259_vm6 = vcmask 60416   ;;  %s3092_s1 = inlined_call_operand.vmem [shape: bf16[16,8], index: 1, kind: input, shape index: {}]   ;;  %s3093_s0 = inlined_call_operand.vmem [shape: bf16[512,16], index: 0, kind: input, shape index: {}]   ;;  %s3094_s2 = inlined_call_operand.vmem [shape: f32[1,8], index: 2, kind: input, shape index: {}]   ;;  %s3095_s3 = inlined_call_operand.vmem [shape: f32[1,8], index: 3, kind: input, shape index: {}]   ;;  %s3096_s4 = inlined_call_operand.vmem [shape: bf16[512,8], index: 4, kind: output, shape index: {}]  }
   0x1   :  { %v1524_v0 = vld [vmem:[%s3092_s1] sm:$0xff]  ;;  %v1493_v3 = vld [vmem:[%s3093_s0 + $0x8] sm:$0xff]  ;;  %v1494_v6 = vld [vmem:[%s3093_s0 + $0x10] sm:$0xff] }
   0x2   :  { %v1492_v1 = vld [vmem:[%s3093_s0] sm:$0xff]  ;;  %354 = vmatpush.bf16.msra.mxu0 %v1524_v0  ;;  %1525 = vmatpush.bf16.msra.mxu1 %v1524_v0  ;;  %v1501_v4 = vld [vmem:[%s3093_s0 + $0x48] sm:$0xff]  ;;  %v1502_v7 = vld [vmem:[%s3093_s0 + $0x50] sm:$0xff] }
   0x3   :  { %v1500_v2 = vld [vmem:[%s3093_s0 + $0x40] sm:$0xff]  ;;  %1526 = vmatpush.bf16.msra.mxu2 %v1524_v0  ;;  %1527 = vmatpush.bf16.msra.mxu3 %v1524_v0  ;;  %v1509_v8 = vld [vmem:[%s3093_s0 + $0x88] sm:$0xff]  ;;  %v1495_v9 = vld [vmem:[%s3093_s0 + $0x18] sm:$0xff] }
   0x4   :  { %v1508_v5 = vld [vmem:[%s3093_s0 + $0x80] sm:$0xff]  ;;  %v1503_v10 = vld [vmem:[%s3093_s0 + $0x58] sm:$0xff]  ;;  %v1510_v11 = vld [vmem:[%s3093_s0 + $0x90] sm:$0xff] }
   0x5   :  { %1460 = vmatmul.msk.bf16.vlgmr.msra.gmra.mxu0 %vm250_vm0, %v1492_v1  ;;  %1468 = vmatmul.msk.bf16.vlgmr.msra.gmra.mxu1 %vm250_vm0, %v1500_v2  ;;  %v1516_v12 = vld [vmem:[%s3093_s0 + $0xc0] sm:$0xff]  ;;  %v1511_v15 = vld [vmem:[%s3093_s0 + $0x98] sm:$0xff]  ;;  %v1517_v16 = vld [vmem:[%s3093_s0 + $0xc8] sm:$0xff] }
   0x6   :  { %1476 = vmatmul.msk.bf16.vlgmr.msra.gmra.mxu2 %vm250_vm0, %v1508_v5  ;;  %1484 = vmatmul.msk.bf16.vlgmr.msra.gmra.mxu3 %vm250_vm0, %v1516_v12  ;;  %v1496_v13 = vld [vmem:[%s3093_s0 + $0x20] sm:$0xff]  ;;  %v1497_v17 = vld [vmem:[%s3093_s0 + $0x28] sm:$0xff]  ;;  %v1518_v20 = vld [vmem:[%s3093_s0 + $0xd0] sm:$0xff] }
   0x7   :  { %v1504_v14 = vld [vmem:[%s3093_s0 + $0x60] sm:$0xff]  ;;  %v1505_v18 = vld [vmem:[%s3093_s0 + $0x68] sm:$0xff]  ;;  %v1498_v21 = vld [vmem:[%s3093_s0 + $0x30] sm:$0xff] }
   0x8   :  { %v1512_v19 = vld [vmem:[%s3093_s0 + $0xa0] sm:$0xff]  ;;  %v1506_v22 = vld [vmem:[%s3093_s0 + $0x70] sm:$0xff]  ;;  %v1513_v23 = vld [vmem:[%s3093_s0 + $0xa8] sm:$0xff] }
   0x9   :  { %v1519_v24 = vld [vmem:[%s3093_s0 + $0xd8] sm:$0xff]  ;;  %v1514_v27 = vld [vmem:[%s3093_s0 + $0xb0] sm:$0xff]  ;;  %v1520_v28 = vld [vmem:[%s3093_s0 + $0xe0] sm:$0xff] }
   0xa   :  { %v1499_v25 = vld [vmem:[%s3093_s0 + $0x38] sm:$0xff]  ;;  %v1521_v32 = vld [vmem:[%s3093_s0 + $0xe8] sm:$0xff]  ;;  %v1522_v36 = vld [vmem:[%s3093_s0 + $0xf0] sm:$0xff] }
   0xb   :  { %v1507_v26 = vld [vmem:[%s3093_s0 + $0x78] sm:$0xff] }
   0xc   :  { %v1515_v31 = vld [vmem:[%s3093_s0 + $0xb8] sm:$0xff] }
   0xd   :  { %v1523_v42 = vld [vmem:[%s3093_s0 + $0xf8] sm:$0xff] }
  0x15   :  { %1461 = vmatmul.msk.bf16.gmra.mxu0 %vm250_vm0, %v1493_v3  ;;  %1469 = vmatmul.msk.bf16.gmra.mxu1 %vm250_vm0, %v1501_v4 }
  0x16   :  { %1477 = vmatmul.msk.bf16.gmra.mxu2 %vm250_vm0, %v1509_v8  ;;  %1485 = vmatmul.msk.bf16.gmra.mxu3 %vm250_vm0, %v1517_v16 }
  0x25   :  { %1462 = vmatmul.msk.bf16.gmra.mxu0 %vm250_vm0, %v1494_v6  ;;  %1470 = vmatmul.msk.bf16.gmra.mxu1 %vm250_vm0, %v1502_v7 }
  0x26   :  { %1478 = vmatmul.msk.bf16.gmra.mxu2 %vm250_vm0, %v1510_v11  ;;  %1486 = vmatmul.msk.bf16.gmra.mxu3 %vm250_vm0, %v1518_v20 }
  0x35   :  { %1463 = vmatmul.msk.bf16.gmra.mxu0 %vm250_vm0, %v1495_v9  ;;  %1471 = vmatmul.msk.bf16.gmra.mxu1 %vm250_vm0, %v1503_v10 }
  0x36   :  { %1479 = vmatmul.msk.bf16.gmra.mxu2 %vm250_vm0, %v1511_v15  ;;  %1487 = vmatmul.msk.bf16.gmra.mxu3 %vm250_vm0, %v1519_v24 }
  0x45   :  { %1464 = vmatmul.msk.bf16.gmra.mxu0 %vm250_vm0, %v1496_v13  ;;  %1472 = vmatmul.msk.bf16.gmra.mxu1 %vm250_vm0, %v1504_v14 }
  0x46   :  { %1480 = vmatmul.msk.bf16.gmra.mxu2 %vm250_vm0, %v1512_v19  ;;  %1488 = vmatmul.msk.bf16.gmra.mxu3 %vm250_vm0, %v1520_v28 }
  0x55   :  { %1465 = vmatmul.msk.bf16.gmra.mxu0 %vm250_vm0, %v1497_v17  ;;  %1473 = vmatmul.msk.bf16.gmra.mxu1 %vm250_vm0, %v1505_v18 }
  0x56   :  { %1481 = vmatmul.msk.bf16.gmra.mxu2 %vm250_vm0, %v1513_v23  ;;  %1489 = vmatmul.msk.bf16.gmra.mxu3 %vm250_vm0, %v1521_v32 }
  0x65   :  { %1466 = vmatmul.msk.bf16.gmra.mxu0 %vm250_vm0, %v1498_v21  ;;  %1474 = vmatmul.msk.bf16.gmra.mxu1 %vm250_vm0, %v1506_v22 }
  0x66   :  { %1482 = vmatmul.msk.bf16.gmra.mxu2 %vm250_vm0, %v1514_v27  ;;  %1490 = vmatmul.msk.bf16.gmra.mxu3 %vm250_vm0, %v1522_v36 }
  0x75   :  { %1467 = vmatmul.msk.bf16.gmra.mxu0 %vm250_vm0, %v1499_v25  ;;  %1475 = vmatmul.msk.bf16.gmra.mxu1 %vm250_vm0, %v1507_v26 }
  0x76   :  { %1483 = vmatmul.msk.bf16.gmra.mxu2 %vm250_vm0, %v1515_v31  ;;  %1491 = vmatmul.msk.bf16.gmra.mxu3 %vm250_vm0, %v1523_v42 }
  0x82   :  { %v1676_v29 = vpop.f32.mrf.mxu0  ;;  %v1678_v30 = vpop.f32.mrf.mxu1 }
  0x83   :  { %v519_v2 = vsel %vm518_vm1, %v1676_v29, 0.0 }
  0x89   :  { %v1704_v40 = vpop.f32.mrf.mxu2  ;;  %v1738_v56 = vpop.f32.mrf.mxu3 }
  0x8a   :  { %v1688_v33 = vpop.f32.mrf.mxu0  ;;  %v1690_v34 = vpop.f32.mrf.mxu1 }
  0x8b   :  { %v520_v63 = vsel %vm518_vm1, %v1688_v33, 0.0 }
  0x8c   :  { %v521_v4 = vadd.f32 %v520_v63, %v519_v2 }
  0x91   :  { %v1716_v45 = vpop.f32.mrf.mxu2  ;;  %v1746_v60 = vpop.f32.mrf.mxu3 }
  0x92   :  { %v1692_v35 = vpop.f32.mrf.mxu0  ;;  %v1697_v37 = vpop.f32.mrf.mxu1 }
  0x93   :  { %v522_v3 = vsel %vm518_vm1, %v1692_v35, 0.0 }
  0x94   :  { %v523_v6 = vadd.f32 %v522_v3, %v521_v4 }
  0x99   :  { %v1722_v48 = vpop.f32.mrf.mxu2  ;;  %v1756_v1 = vpop.f32.mrf.mxu3 }
  0x9a   :  { %v1700_v38 = vpop.f32.mrf.mxu0  ;;  %v1702_v39 = vpop.f32.mrf.mxu1  ;;  %3137 = vst [vmem:[#allocation4_spill] sm:$0xff] %v1756_v1 }
  0x9b   :  { %v524_v5 = vsel %vm518_vm1, %v1700_v38, 0.0 }
  0x9c   :  { %v525_v9 = vadd.f32 %v524_v5, %v523_v6 }
  0xa1   :  { %v1728_v51 = vpop.f32.mrf.mxu2  ;;  %v1776_v16 = vpop.f32.mrf.mxu3 }
  0xa2   :  { %v1706_v41 = vpop.f32.mrf.mxu0  ;;  %v1714_v44 = vpop.f32.mrf.mxu1  ;;  %3135 = vst [vmem:[#allocation2_spill] sm:$0xff] %v1728_v51 }
  0xa3   :  { %v526_v8 = vsel %vm518_vm1, %v1706_v41, 0.0 }
  0xa4   :  { %v527_v11 = vadd.f32 %v526_v8, %v525_v9 }
  0xa9   :  { %v1734_v54 = vpop.f32.mrf.mxu2  ;;  %v1796_v36 = vpop.f32.mrf.mxu3 }
  0xaa   :  { %v1712_v43 = vpop.f32.mrf.mxu0  ;;  %v1720_v47 = vpop.f32.mrf.mxu1  ;;  %3136 = vst [vmem:[#allocation3_spill] sm:$0xff] %v1734_v54 }
  0xab   :  { %v528_v10 = vsel %vm518_vm1, %v1712_v43, 0.0 }
  0xac   :  { %v529_v15 = vadd.f32 %v528_v10, %v527_v11 }
  0xb1   :  { %v1744_v59 = vpop.f32.mrf.mxu2 }
  0xb2   :  { %v1718_v46 = vpop.f32.mrf.mxu0  ;;  %v1726_v50 = vpop.f32.mrf.mxu1 }
  0xb3   :  { %v530_v13 = vsel %vm518_vm1, %v1718_v46, 0.0 }
  0xb4   :  { %v531_v18 = vadd.f32 %v530_v13, %v529_v15  ;;  %v1812_v15 = vpop.f32.mrf.mxu3 }
  0xb9   :  { %v1754_v0 = vpop.f32.mrf.mxu2 }
  0xba   :  { %v1724_v49 = vpop.f32.mrf.mxu0  ;;  %v1732_v53 = vpop.f32.mrf.mxu1 }
  0xbb   :  { %v532_v17 = vsel %vm518_vm1, %v1724_v49, 0.0 }
  0xbc   :  { %v533_v21 = vadd.f32 %v532_v17, %v531_v18  ;;  %v550_v17 = vsel %vm518_vm1, %v1678_v30, 0.0 }
  0xc1   :  { %v1774_v14 = vpop.f32.mrf.mxu2 }
  0xc2   :  { %v1730_v52 = vpop.f32.mrf.mxu0  ;;  %v1742_v58 = vpop.f32.mrf.mxu1 }
  0xc3   :  { %v534_v20 = vsel %vm518_vm1, %v1730_v52, 0.0 }
  0xc4   :  { %v535_v23 = vadd.f32 %v534_v20, %v533_v21  ;;  %v552_v20 = vsel %vm518_vm1, %v1690_v34, 0.0 }
  0xc9   :  { %v1792_v28 = vpop.f32.mrf.mxu2 }
  0xca   :  { %v1736_v55 = vpop.f32.mrf.mxu0  ;;  %v1750_v62 = vpop.f32.mrf.mxu1  ;;  %3138 = vst [vmem:[#allocation5_spill] sm:$0xff] %v1792_v28 }
  0xcb   :  { %v536_v22 = vsel %vm518_vm1, %v1736_v55, 0.0 }
  0xcc   :  { %v537_v25 = vadd.f32 %v536_v22, %v535_v23  ;;  %v554_v22 = vsel %vm518_vm1, %v1697_v37, 0.0 }
  0xd1   :  { %v1810_v13 = vpop.f32.mrf.mxu2 }
  0xd2   :  { %v1740_v57 = vpop.f32.mrf.mxu0  ;;  %v1770_v12 = vpop.f32.mrf.mxu1  ;;  %3139 = vst [vmem:[#allocation6_spill] sm:$0xff] %v1810_v13 }
  0xd3   :  { %v538_v24 = vsel %vm518_vm1, %v1740_v57, 0.0 }
  0xd4   :  { %v539_v31 = vadd.f32 %v538_v24, %v537_v25  ;;  %v556_v24 = vsel %vm518_vm1, %v1702_v39, 0.0 }
  0xda   :  { %v1748_v61 = vpop.f32.mrf.mxu0  ;;  %v1788_v26 = vpop.f32.mrf.mxu1 }
  0xdb   :  { %v540_v27 = vsel %vm518_vm1, %v1748_v61, 0.0 }
  0xdc   :  { %v541_v63 = vadd.f32 %v540_v27, %v539_v31  ;;  %v558_v31 = vsel %vm518_vm1, %v1714_v44, 0.0 }
  0xe2   :  { %v1764_v7 = vpop.f32.mrf.mxu0  ;;  %v1806_v9 = vpop.f32.mrf.mxu1 }
  0xe3   :  { %v542_v42 = vsel %vm518_vm1, %v1764_v7, 0.0 }
  0xe4   :  { %v543_v3 = vadd.f32 %v542_v42, %v541_v63  ;;  %v1826_v63 = vpop.f32.mrf.mxu2 }
  0xea   :  { %v1780_v19 = vpop.f32.mrf.mxu0  ;;  %v1822_v27 = vpop.f32.mrf.mxu1 }
  0xeb   :  { %v544_v2 = vsel %vm518_vm1, %v1780_v19, 0.0  ;;  %3140 = vst [vmem:[#allocation7_spill] sm:$0xff] %v1822_v27 }
  0xec   :  { %v545_v5 = vadd.f32 %v544_v2, %v543_v3  ;;  %v1828_v2 = vpop.f32.mrf.mxu3  ;;  %v560_v3 = vsel %vm518_vm1, %v1720_v47, 0.0 }
  0xf2   :  { %v1794_v32 = vpop.f32.mrf.mxu0 }
  0xf3   :  { %v546_v4 = vsel %vm518_vm1, %v1794_v32, 0.0 }
  0xf4   :  { %v547_v6 = vadd.f32 %v546_v4, %v545_v5  ;;  %v562_v5 = vsel %vm518_vm1, %v1726_v50, 0.0 }
  0xfa   :  { %v1804_v8 = vpop.f32.mrf.mxu0 }
  0xfb   :  { %v548_v10 = vsel %vm518_vm1, %v1804_v8, 0.0 }
  0xfc   :  { %v549_v11 = vadd.f32 %v548_v10, %v547_v6  ;;  %v564_v10 = vsel %vm518_vm1, %v1732_v53, 0.0 }
  0xfe   :  { %v551_v18 = vadd.f32 %v550_v17, %v549_v11  ;;  %v566_v17 = vsel %vm518_vm1, %v1742_v58, 0.0 }
 0x100   :  { %v553_v21 = vadd.f32 %v552_v20, %v551_v18  ;;  %v1838_v20 = vpop.f32.mrf.mxu1 }
 0x101   :  { %3141 = vst [vmem:[#allocation8_spill] sm:$0xff] %v1838_v20 }
 0x102   :  { %v555_v23 = vadd.f32 %v554_v22, %v553_v21  ;;  %v568_v21 = vsel %vm518_vm1, %v1750_v62, 0.0 }
 0x104   :  { %v557_v25 = vadd.f32 %v556_v24, %v555_v23  ;;  %v1842_v23 = vpop.f32.mrf.mxu2  ;;  %v1844_v24 = vpop.f32.mrf.mxu3 }
 0x105   :  { %3142 = vst [vmem:[#allocation9_spill] sm:$0xff] %v1844_v24 }
 0x106   :  { %v559_v42 = vadd.f32 %v558_v31, %v557_v25  ;;  %v570_v25 = vsel %vm518_vm1, %v1770_v12, 0.0 }
 0x108   :  { %v561_v4 = vadd.f32 %v560_v3, %v559_v42  ;;  %v572_v42 = vsel %vm518_vm1, %v1788_v26, 0.0 }
 0x10a   :  { %v563_v6 = vadd.f32 %v562_v5, %v561_v4  ;;  %v574_v4 = vsel %vm518_vm1, %v1806_v9, 0.0 }
 0x10c   :  { %v565_v11 = vadd.f32 %v564_v10, %v563_v6  ;;  %v576_v6 = vsel %vm518_vm1, %v1822_v27, 0.0 }
 0x10e   :  { %v567_v18 = vadd.f32 %v566_v17, %v565_v11  ;;  %v1854_v11 = vpop.f32.mrf.mxu1  ;;  %v578_v17 = vsel %vm518_vm1, %v1838_v20, 0.0 }
 0x10f   :  { %3143 = vst [vmem:[#allocation10_spill] sm:$0xff] %v1854_v11 }
 0x110   :  { %v569_v22 = vadd.f32 %v568_v21, %v567_v18  ;;  %v1858_v21 = vpop.f32.mrf.mxu2 }
 0x112   :  { %v571_v31 = vadd.f32 %v570_v25, %v569_v22  ;;  %v1860_v22 = vpop.f32.mrf.mxu3  ;;  %v580_v25 = vsel %vm518_vm1, %v1854_v11, 0.0 }
 0x113   :  { %3144 = vst [vmem:[#allocation11_spill] sm:$0xff] %v1860_v22 }
 0x114   :  { %v573_v3 = vadd.f32 %v572_v42, %v571_v31  ;;  %v582_v42 = vsel %vm518_vm1, %v1704_v40, 0.0 }
 0x116   :  { %v575_v5 = vadd.f32 %v574_v4, %v573_v3  ;;  %v584_v4 = vsel %vm518_vm1, %v1716_v45, 0.0 }
 0x118   :  { %v577_v10 = vadd.f32 %v576_v6, %v575_v5  ;;  %v586_v6 = vsel %vm518_vm1, %v1722_v48, 0.0  ;;  %v1872_v27 = vpop.f32.mrf.mxu2 }
 0x119   :  { %3145 = vst [vmem:[#allocation12_spill] sm:$0xff] %v1872_v27 }
 0x11a   :  { %v579_v18 = vadd.f32 %v578_v17, %v577_v10  ;;  %v588_v17 = vsel %vm518_vm1, %v1728_v51, 0.0  ;;  %v1874_v11 = vpop.f32.mrf.mxu3 }
 0x11b   :  { %3146 = vst [vmem:[#allocation13_spill] sm:$0xff] %v1874_v11 }
 0x11c   :  { %v581_v31 = vadd.f32 %v580_v25, %v579_v18  ;;  %v590_v18 = vsel %vm518_vm1, %v1734_v54, 0.0 }
 0x11e   :  { %v583_v3 = vadd.f32 %v582_v42, %v581_v31  ;;  %v592_v31 = vsel %vm518_vm1, %v1744_v59, 0.0 }
 0x120   :  { %v585_v5 = vadd.f32 %v584_v4, %v583_v3  ;;  %v594_v3 = vsel %vm518_vm1, %v1754_v0, 0.0  ;;  %v1886_v51 = vpop.f32.mrf.mxu2 }
 0x122   :  { %v587_v10 = vadd.f32 %v586_v6, %v585_v5  ;;  %v596_v5 = vsel %vm518_vm1, %v1774_v14, 0.0  ;;  %v1888_v54 = vpop.f32.mrf.mxu3 }
 0x123   :  { %3147 = vst [vmem:[#allocation14_spill] sm:$0xff] %v1888_v54 }
 0x124   :  { %v589_v20 = vadd.f32 %v588_v17, %v587_v10  ;;  %v598_v10 = vsel %vm518_vm1, %v1792_v28, 0.0 }
 0x126   :  { %v591_v25 = vadd.f32 %v590_v18, %v589_v20  ;;  %v600_v20 = vsel %vm518_vm1, %v1810_v13, 0.0 }
 0x128   :  { %v593_v42 = vadd.f32 %v592_v31, %v591_v25  ;;  %v602_v25 = vsel %vm518_vm1, %v1826_v63, 0.0  ;;  %v1900_v28 = vpop.f32.mrf.mxu2 }
 0x12a   :  { %v595_v4 = vadd.f32 %v594_v3, %v593_v42  ;;  %v604_v42 = vsel %vm518_vm1, %v1842_v23, 0.0  ;;  %v1902_v13 = vpop.f32.mrf.mxu3 }
 0x12b   :  { %3148 = vst [vmem:[#allocation15_spill] sm:$0xff] %v1902_v13 }
 0x12c   :  { %v597_v6 = vadd.f32 %v596_v5, %v595_v4  ;;  %v606_v4 = vsel %vm518_vm1, %v1858_v21, 0.0 }
 0x12e   :  { %v599_v17 = vadd.f32 %v598_v10, %v597_v6  ;;  %v608_v6 = vsel %vm518_vm1, %v1872_v27, 0.0 }
 0x130   :  { %v601_v18 = vadd.f32 %v600_v20, %v599_v17  ;;  %v610_v17 = vsel %vm518_vm1, %v1886_v51, 0.0 }
 0x132   :  { %v603_v31 = vadd.f32 %v602_v25, %v601_v18  ;;  %v612_v18 = vsel %vm518_vm1, %v1900_v28, 0.0  ;;  %v1914_v27 = vpop.f32.mrf.mxu3 }
 0x133   :  { %3149 = vst [vmem:[#allocation16_spill] sm:$0xff] %v1914_v27 }
 0x134   :  { %v605_v3 = vadd.f32 %v604_v42, %v603_v31  ;;  %v614_v31 = vsel %vm518_vm1, %v1738_v56, 0.0 }
 0x136   :  { %v607_v5 = vadd.f32 %v606_v4, %v605_v3  ;;  %v616_v3 = vsel %vm518_vm1, %v1746_v60, 0.0 }
 0x138   :  { %v609_v10 = vadd.f32 %v608_v6, %v607_v5  ;;  %v618_v5 = vsel %vm518_vm1, %v1756_v1, 0.0 }
 0x13a   :  { %v611_v20 = vadd.f32 %v610_v17, %v609_v10  ;;  %v620_v10 = vsel %vm518_vm1, %v1776_v16, 0.0  ;;  %v1926_v1 = vpop.f32.mrf.mxu3 }
 0x13b   :  { %3150 = vst [vmem:[#allocation17_spill] sm:$0xff] %v1926_v1 }
 0x13c   :  { %v613_v25 = vadd.f32 %v612_v18, %v611_v20  ;;  %v622_v20 = vsel %vm518_vm1, %v1796_v36, 0.0 }
 0x13e   :  { %v615_v42 = vadd.f32 %v614_v31, %v613_v25  ;;  %v624_v25 = vsel %vm518_vm1, %v1812_v15, 0.0 }
 0x140   :  { %v617_v4 = vadd.f32 %v616_v3, %v615_v42  ;;  %v626_v42 = vsel %vm518_vm1, %v1828_v2, 0.0 }
 0x142   :  { %v619_v6 = vadd.f32 %v618_v5, %v617_v4  ;;  %v628_v4 = vsel %vm518_vm1, %v1844_v24, 0.0  ;;  %v1936_v24 = vpop.f32.mrf.mxu3 }
 0x143   :  { %3151 = vst [vmem:[#allocation18_spill] sm:$0xff] %v1936_v24 }
 0x144   :  { %v621_v17 = vadd.f32 %v620_v10, %v619_v6  ;;  %v630_v6 = vsel %vm518_vm1, %v1860_v22, 0.0 }
 0x146   :  { %v623_v18 = vadd.f32 %v622_v20, %v621_v17  ;;  %v632_v17 = vsel %vm518_vm1, %v1874_v11, 0.0 }
 0x148   :  { %v625_v31 = vadd.f32 %v624_v25, %v623_v18  ;;  %v634_v18 = vsel %vm518_vm1, %v1888_v54, 0.0 }
 0x14a   :  { %v627_v3 = vadd.f32 %v626_v42, %v625_v31  ;;  %v636_v31 = vsel %vm518_vm1, %v1902_v13, 0.0  ;;  %v1944_v54 = vpop.f32.mrf.mxu3 }
 0x14c   :  { %v629_v5 = vadd.f32 %v628_v4, %v627_v3  ;;  %v638_v3 = vsel %vm518_vm1, %v1914_v27, 0.0 }
 0x14e   :  { %v631_v10 = vadd.f32 %v630_v6, %v629_v5  ;;  %v640_v5 = vsel %vm518_vm1, %v1926_v1, 0.0 }
 0x150   :  { %v633_v20 = vadd.f32 %v632_v17, %v631_v10  ;;  %v642_v10 = vsel %vm518_vm1, %v1936_v24, 0.0 }
 0x152   :  { %v635_v25 = vadd.f32 %v634_v18, %v633_v20  ;;  %v644_v20 = vsel %vm518_vm1, %v1944_v54, 0.0 }
 0x154   :  { %v637_v42 = vadd.f32 %v636_v31, %v635_v25  ;;  %v1535_v25 = vmov 512.0  }
 0x155   :  { %1531 = vrcp.f32 %v1535_v25 }
 0x156   :  { %v639_v4 = vadd.f32 %v638_v3, %v637_v42 }
 0x158   :  { %v641_v6 = vadd.f32 %v640_v5, %v639_v4 }
 0x15a   :  { %v643_v17 = vadd.f32 %v642_v10, %v641_v6 }
 0x15b   :  { %v1532_v13 = vpop.eup %1531 }
 0x15c   :  { %v645_v18 = vadd.f32 %v644_v20, %v643_v17  ;;  %v653_v42 = vmul.f32 512.0, %v1532_v13  ;;  %vm657_vm2 = vweird.f32 %v1532_v13 }
 0x15e   :  { %v646_v31 = vrot.slane %v645_v18, 4  ;;  %v654_v11 = vsub.f32 1.0, %v653_v42 }
 0x160   :  { %v647_v27 = vadd.f32 %v646_v31, %v645_v18  ;;  %v655_v4 = vmul.f32 %v1532_v13, %v654_v11 }
 0x162   :  { %v648_v3 = vrot.slane %v647_v27, 2  ;;  %v656_v22 = vadd.f32 %v1532_v13, %v655_v4 }
 0x164   :  { %v649_v1 = vadd.f32 %v648_v3, %v647_v27  ;;  %v1948_v10 = vsel %vm657_vm2, %v1532_v13, %v656_v22 }
 0x166   :  { %v650_v5 = vrot.slane %v649_v1, 1 }
 0x168   :  { %v651_v6 = vadd.f32 %v650_v5, %v649_v1 }
 0x16a   :  { %v1951_v24 = vmul.f32 %v1948_v10, %v651_v6 }
 0x16c   :  { %v1955_v17 = vsub.f32 %v1676_v29, %v1951_v24  ;;  %v1959_v20 = vsub.f32 %v1688_v33, %v1951_v24  ;;  %v1963_v27 = vsub.f32 %v1692_v35, %v1951_v24  ;;  %v1967_v1 = vsub.f32 %v1700_v38, %v1951_v24 }
 0x16d   :  { %v1975_v29 = vsub.f32 %v1706_v41, %v1951_v24  ;;  %v1981_v35 = vsub.f32 %v1712_v43, %v1951_v24  ;;  %v1989_v31 = vsub.f32 %v1718_v46, %v1951_v24  ;;  %v1996_v43 = vsub.f32 %v1724_v49, %v1951_v24 }
 0x16e   :  { %v724_v13 = vmul.f32 %v1955_v17, %v1955_v17  ;;  %v725_v11 = vmul.f32 %v1959_v20, %v1959_v20  ;;  %v726_v33 = vmul.f32 %v1963_v27, %v1963_v27  ;;  %v727_v38 = vmul.f32 %v1967_v1, %v1967_v1 }
 0x16f   :  { %v728_v41 = vmul.f32 %v1975_v29, %v1975_v29  ;;  %v729_v4 = vmul.f32 %v1981_v35, %v1981_v35  ;;  %v2003_v46 = vsub.f32 %v1730_v52, %v1951_v24  ;;  %v2010_v49 = vsub.f32 %v1736_v55, %v1951_v24 }
 0x170   :  { %v788_v22 = vsel %vm518_vm1, %v724_v13, 0.0  ;;  %v789_v18 = vsel %vm518_vm1, %v725_v11, 0.0  ;;  %v791_v42 = vsel %vm518_vm1, %v726_v33, 0.0  ;;  %v793_v5 = vsel %vm518_vm1, %v727_v38, 0.0 }
 0x171   :  { %v790_v25 = vadd.f32 %v789_v18, %v788_v22  ;;  %v730_v13 = vmul.f32 %v1989_v31, %v1989_v31  ;;  %v795_v11 = vsel %vm518_vm1, %v728_v41, 0.0  ;;  %v731_v22 = vmul.f32 %v1996_v43, %v1996_v43 }
 0x172   :  { %v797_v38 = vsel %vm518_vm1, %v729_v4, 0.0  ;;  %v2017_v52 = vsub.f32 %v1740_v57, %v1951_v24  ;;  %v2024_v55 = vsub.f32 %v1748_v61, %v1951_v24  ;;  %v2031_v57 = vsub.f32 %v1764_v7, %v1951_v24 }
 0x173   :  { %v792_v3 = vadd.f32 %v791_v42, %v790_v25  ;;  %v732_v25 = vmul.f32 %v2003_v46, %v2003_v46  ;;  %v799_v41 = vsel %vm518_vm1, %v730_v13, 0.0  ;;  %v801_v4 = vsel %vm518_vm1, %v731_v22, 0.0 }
 0x174   :  { %v2038_v61 = vsub.f32 %v1780_v19, %v1951_v24  ;;  %v2045_v7 = vsub.f32 %v1794_v32, %v1951_v24  ;;  %v2052_v19 = vsub.f32 %v1804_v8, %v1951_v24  ;;  %v2059_v32 = vsub.f32 %v1678_v30, %v1951_v24 }
 0x175   :  { %v794_v6 = vadd.f32 %v793_v5, %v792_v3  ;;  %v733_v3 = vmul.f32 %v2010_v49, %v2010_v49  ;;  %v803_v13 = vsel %vm518_vm1, %v732_v25, 0.0  ;;  %v2066_v8 = vsub.f32 %v1690_v34, %v1951_v24 }
 0x176   :  { %v2073_v30 = vsub.f32 %v1697_v37, %v1951_v24  ;;  %v2080_v34 = vsub.f32 %v1702_v39, %v1951_v24  ;;  %v2087_v37 = vsub.f32 %v1714_v44, %v1951_v24  ;;  %v2094_v39 = vsub.f32 %v1720_v47, %v1951_v24 }
 0x177   :  { %v796_v33 = vadd.f32 %v795_v11, %v794_v6  ;;  %v734_v6 = vmul.f32 %v2017_v52, %v2017_v52  ;;  %v805_v22 = vsel %vm518_vm1, %v733_v3, 0.0  ;;  %v2101_v44 = vsub.f32 %v1726_v50, %v1951_v24 }
 0x178   :  { %v2108_v47 = vsub.f32 %v1732_v53, %v1951_v24  ;;  %v2115_v50 = vsub.f32 %v1742_v58, %v1951_v24  ;;  %v2122_v53 = vsub.f32 %v1750_v62, %v1951_v24  ;;  %v2129_v58 = vsub.f32 %v1770_v12, %v1951_v24 }
 0x179   :  { %v798_v18 = vadd.f32 %v797_v38, %v796_v33  ;;  %v735_v33 = vmul.f32 %v2024_v55, %v2024_v55  ;;  %v807_v25 = vsel %vm518_vm1, %v734_v6, 0.0  ;;  %v2136_v62 = vsub.f32 %v1788_v26, %v1951_v24 }
 0x17a   :  { %v2143_v12 = vsub.f32 %v1806_v9, %v1951_v24 }
 0x17b   :  { %v800_v42 = vadd.f32 %v799_v41, %v798_v18  ;;  %v736_v18 = vmul.f32 %v2031_v57, %v2031_v57  ;;  %v809_v3 = vsel %vm518_vm1, %v735_v33, 0.0 }
 0x17d   :  { %v802_v5 = vadd.f32 %v801_v4, %v800_v42  ;;  %v737_v42 = vmul.f32 %v2038_v61, %v2038_v61  ;;  %v811_v6 = vsel %vm518_vm1, %v736_v18, 0.0 }
 0x17f   :  { %v804_v11 = vadd.f32 %v803_v13, %v802_v5  ;;  %v738_v5 = vmul.f32 %v2045_v7, %v2045_v7  ;;  %v813_v33 = vsel %vm518_vm1, %v737_v42, 0.0 }
 0x181   :  { %v806_v38 = vadd.f32 %v805_v22, %v804_v11  ;;  %v739_v11 = vmul.f32 %v2052_v19, %v2052_v19  ;;  %v815_v18 = vsel %vm518_vm1, %v738_v5, 0.0 }
 0x183   :  { %v808_v41 = vadd.f32 %v807_v25, %v806_v38  ;;  %v740_v38 = vmul.f32 %v2059_v32, %v2059_v32  ;;  %v817_v42 = vsel %vm518_vm1, %v739_v11, 0.0 }
 0x185   :  { %v810_v4 = vadd.f32 %v809_v3, %v808_v41  ;;  %v741_v41 = vmul.f32 %v2066_v8, %v2066_v8  ;;  %v819_v5 = vsel %vm518_vm1, %v740_v38, 0.0 }
 0x187   :  { %v812_v13 = vadd.f32 %v811_v6, %v810_v4  ;;  %v742_v4 = vmul.f32 %v2073_v30, %v2073_v30  ;;  %v821_v11 = vsel %vm518_vm1, %v741_v41, 0.0 }
 0x189   :  { %v814_v22 = vadd.f32 %v813_v33, %v812_v13  ;;  %v743_v13 = vmul.f32 %v2080_v34, %v2080_v34  ;;  %v823_v38 = vsel %vm518_vm1, %v742_v4, 0.0 }
 0x18b   :  { %v816_v25 = vadd.f32 %v815_v18, %v814_v22  ;;  %v744_v22 = vmul.f32 %v2087_v37, %v2087_v37  ;;  %v825_v41 = vsel %vm518_vm1, %v743_v13, 0.0 }
 0x18d   :  { %v818_v3 = vadd.f32 %v817_v42, %v816_v25  ;;  %v745_v25 = vmul.f32 %v2094_v39, %v2094_v39  ;;  %v827_v4 = vsel %vm518_vm1, %v744_v22, 0.0 }
 0x18f   :  { %v820_v6 = vadd.f32 %v819_v5, %v818_v3  ;;  %v746_v3 = vmul.f32 %v2101_v44, %v2101_v44  ;;  %v829_v13 = vsel %vm518_vm1, %v745_v25, 0.0 }
 0x191   :  { %v822_v33 = vadd.f32 %v821_v11, %v820_v6  ;;  %v747_v6 = vmul.f32 %v2108_v47, %v2108_v47  ;;  %v831_v22 = vsel %vm518_vm1, %v746_v3, 0.0 }
 0x193   :  { %v824_v18 = vadd.f32 %v823_v38, %v822_v33  ;;  %v748_v33 = vmul.f32 %v2115_v50, %v2115_v50  ;;  %v833_v25 = vsel %vm518_vm1, %v747_v6, 0.0 }
 0x195   :  { %v826_v42 = vadd.f32 %v825_v41, %v824_v18  ;;  %v749_v18 = vmul.f32 %v2122_v53, %v2122_v53  ;;  %v835_v3 = vsel %vm518_vm1, %v748_v33, 0.0 }
 0x197   :  { %v828_v5 = vadd.f32 %v827_v4, %v826_v42  ;;  %v750_v42 = vmul.f32 %v2129_v58, %v2129_v58  ;;  %v837_v6 = vsel %vm518_vm1, %v749_v18, 0.0 }
 0x199   :  { %v830_v11 = vadd.f32 %v829_v13, %v828_v5  ;;  %v3152_v5 = vld [vmem:[#allocation7_spill] sm:$0xff]  ;;  %v751_v13 = vmul.f32 %v2136_v62, %v2136_v62  ;;  %v839_v33 = vsel %vm518_vm1, %v750_v42, 0.0 }
 0x19a   :  { %v2150_v26 = vsub.f32 %v3152_v5, %v1951_v24 }
 0x19b   :  { %v832_v38 = vadd.f32 %v831_v22, %v830_v11  ;;  %v3153_v22 = vld [vmem:[#allocation8_spill] sm:$0xff]  ;;  %v841_v18 = vsel %vm518_vm1, %v751_v13, 0.0 }
 0x19c   :  { %v2157_v9 = vsub.f32 %v3153_v22, %v1951_v24  ;;  %v753_v5 = vmul.f32 %v2150_v26, %v2150_v26 }
 0x19d   :  { %v834_v41 = vadd.f32 %v833_v25, %v832_v38  ;;  %v752_v38 = vmul.f32 %v2143_v12, %v2143_v12 }
 0x19e   :  { %v754_v22 = vmul.f32 %v2157_v9, %v2157_v9  ;;  %v845_v13 = vsel %vm518_vm1, %v753_v5, 0.0 }
 0x19f   :  { %v836_v4 = vadd.f32 %v835_v3, %v834_v41  ;;  %v3154_v41 = vld [vmem:[#allocation10_spill] sm:$0xff]  ;;  %v843_v42 = vsel %vm518_vm1, %v752_v38, 0.0 }
 0x1a0   :  { %v2164_v3 = vsub.f32 %v3154_v41, %v1951_v24  ;;  %v847_v38 = vsel %vm518_vm1, %v754_v22, 0.0 }
 0x1a1   :  { %v838_v11 = vadd.f32 %v837_v6, %v836_v4  ;;  %v2171_v6 = vsub.f32 %v1704_v40, %v1951_v24  ;;  %v2185_v40 = vsub.f32 %v1722_v48, %v1951_v24 }
 0x1a2   :  { %3155 = vst [vmem:[#allocation7_spill] sm:$0xff] %v2164_v3  ;;  %v755_v41 = vmul.f32 %v2164_v3, %v2164_v3 }
 0x1a3   :  { %v840_v25 = vadd.f32 %v839_v33, %v838_v11  ;;  %3156 = vst [vmem:[#allocation8_spill] sm:$0xff] %v2171_v6  ;;  %v2178_v33 = vsub.f32 %v1716_v45, %v1951_v24 }
 0x1a4   :  { %v849_v5 = vsel %vm518_vm1, %v755_v41, 0.0 }
 0x1a5   :  { %v842_v4 = vadd.f32 %v841_v18, %v840_v25  ;;  %v756_v18 = vmul.f32 %v2171_v6, %v2171_v6  ;;  %v757_v3 = vmul.f32 %v2178_v33, %v2178_v33  ;;  %v758_v6 = vmul.f32 %v2185_v40, %v2185_v40 }
 0x1a7   :  { %v844_v11 = vadd.f32 %v843_v42, %v842_v4  ;;  %v3157_v42 = vld [vmem:[#allocation2_spill] sm:$0xff]  ;;  %v851_v22 = vsel %vm518_vm1, %v756_v18, 0.0  ;;  %v853_v41 = vsel %vm518_vm1, %v757_v3, 0.0  ;;  %v855_v18 = vsel %vm518_vm1, %v758_v6, 0.0 }
 0x1a8   :  { %v2192_v45 = vsub.f32 %v3157_v42, %v1951_v24 }
 0x1a9   :  { %v846_v25 = vadd.f32 %v845_v13, %v844_v11  ;;  %v3158_v13 = vld [vmem:[#allocation3_spill] sm:$0xff] }
 0x1aa   :  { %v2199_v48 = vsub.f32 %v3158_v13, %v1951_v24  ;;  %v759_v42 = vmul.f32 %v2192_v45, %v2192_v45 }
 0x1ab   :  { %v848_v4 = vadd.f32 %v847_v38, %v846_v25  ;;  %v2206_v38 = vsub.f32 %v1744_v59, %v1951_v24  ;;  %v2220_v59 = vsub.f32 %v1774_v14, %v1951_v24 }
 0x1ac   :  { %3159 = vst [vmem:[#allocation10_spill] sm:$0xff] %v2199_v48  ;;  %v760_v13 = vmul.f32 %v2199_v48, %v2199_v48  ;;  %v857_v3 = vsel %vm518_vm1, %v759_v42, 0.0 }
 0x1ad   :  { %v850_v11 = vadd.f32 %v849_v5, %v848_v4  ;;  %3160 = vst [vmem:[#allocation2_spill] sm:$0xff] %v2206_v38  ;;  %v2213_v5 = vsub.f32 %v1754_v0, %v1951_v24 }
 0x1ae   :  { %v859_v6 = vsel %vm518_vm1, %v760_v13, 0.0 }
 0x1af   :  { %v852_v25 = vadd.f32 %v851_v22, %v850_v11  ;;  %v761_v22 = vmul.f32 %v2206_v38, %v2206_v38  ;;  %v762_v48 = vmul.f32 %v2213_v5, %v2213_v5  ;;  %v763_v38 = vmul.f32 %v2220_v59, %v2220_v59 }
 0x1b1   :  { %v854_v4 = vadd.f32 %v853_v41, %v852_v25  ;;  %v3161_v41 = vld [vmem:[#allocation5_spill] sm:$0xff]  ;;  %v861_v42 = vsel %vm518_vm1, %v761_v22, 0.0  ;;  %v863_v13 = vsel %vm518_vm1, %v762_v48, 0.0  ;;  %v865_v22 = vsel %vm518_vm1, %v763_v38, 0.0 }
 0x1b2   :  { %v2227_v0 = vsub.f32 %v3161_v41, %v1951_v24 }
 0x1b3   :  { %v856_v11 = vadd.f32 %v855_v18, %v854_v4  ;;  %v3162_v18 = vld [vmem:[#allocation6_spill] sm:$0xff] }
 0x1b4   :  { %v2234_v14 = vsub.f32 %v3162_v18, %v1951_v24  ;;  %v764_v41 = vmul.f32 %v2227_v0, %v2227_v0 }
 0x1b5   :  { %v858_v25 = vadd.f32 %v857_v3, %v856_v11  ;;  %v2241_v3 = vsub.f32 %v1826_v63, %v1951_v24  ;;  %v2255_v63 = vsub.f32 %v1858_v21, %v1951_v24  ;;  %v2269_v21 = vsub.f32 %v1886_v51, %v1951_v24 }
 0x1b6   :  { %3163 = vst [vmem:[#allocation3_spill] sm:$0xff] %v2234_v14  ;;  %v765_v18 = vmul.f32 %v2234_v14, %v2234_v14  ;;  %v867_v48 = vsel %vm518_vm1, %v764_v41, 0.0  ;;  %v2283_v51 = vsub.f32 %v1738_v56, %v1951_v24 }
 0x1b7   :  { %v860_v4 = vadd.f32 %v859_v6, %v858_v25  ;;  %v2248_v6 = vsub.f32 %v1842_v23, %v1951_v24  ;;  %3165 = vst [vmem:[#allocation5_spill] sm:$0xff] %v2269_v21 }
 0x1b8   :  { %v869_v38 = vsel %vm518_vm1, %v765_v18, 0.0  ;;  %3166 = vst [vmem:[#allocation6_spill] sm:$0xff] %v2283_v51 }
 0x1b9   :  { %v862_v11 = vadd.f32 %v861_v42, %v860_v4  ;;  %v766_v42 = vmul.f32 %v2241_v3, %v2241_v3  ;;  %v767_v14 = vmul.f32 %v2248_v6, %v2248_v6 }
 0x1bb   :  { %v864_v25 = vadd.f32 %v863_v13, %v862_v11  ;;  %v3164_v13 = vld [vmem:[#allocation12_spill] sm:$0xff]  ;;  %v871_v41 = vsel %vm518_vm1, %v766_v42, 0.0  ;;  %v873_v18 = vsel %vm518_vm1, %v767_v14, 0.0 }
 0x1bc   :  { %v2262_v23 = vsub.f32 %v3164_v13, %v1951_v24 }
 0x1bd   :  { %v866_v4 = vadd.f32 %v865_v22, %v864_v25  ;;  %v768_v22 = vmul.f32 %v2255_v63, %v2255_v63 }
 0x1be   :  { %v769_v13 = vmul.f32 %v2262_v23, %v2262_v23 }
 0x1bf   :  { %v868_v11 = vadd.f32 %v867_v48, %v866_v4  ;;  %v2276_v48 = vsub.f32 %v1900_v28, %v1951_v24  ;;  %v875_v42 = vsel %vm518_vm1, %v768_v22, 0.0  ;;  %v2290_v28 = vsub.f32 %v1746_v60, %v1951_v24 }
 0x1c0   :  { %v877_v14 = vsel %vm518_vm1, %v769_v13, 0.0  ;;  %v2304_v60 = vsub.f32 %v1776_v16, %v1951_v24  ;;  %v2318_v16 = vsub.f32 %v1812_v15, %v1951_v24 }
 0x1c1   :  { %v870_v25 = vadd.f32 %v869_v38, %v868_v11  ;;  %v770_v38 = vmul.f32 %v2269_v21, %v2269_v21  ;;  %3167 = vst [vmem:[#allocation12_spill] sm:$0xff] %v2290_v28  ;;  %v772_v21 = vmul.f32 %v2283_v51, %v2283_v51 }
 0x1c2   :  { %3170 = vst [vmem:[#allocation19_spill] sm:$0xff] %v2304_v60 }
 0x1c3   :  { %v872_v4 = vadd.f32 %v871_v41, %v870_v25  ;;  %v771_v41 = vmul.f32 %v2276_v48, %v2276_v48  ;;  %v879_v22 = vsel %vm518_vm1, %v770_v38, 0.0  ;;  %v883_v38 = vsel %vm518_vm1, %v772_v21, 0.0  ;;  %3172 = vst [vmem:[#allocation21_spill] sm:$0xff] %v2318_v16 }
 0x1c5   :  { %v874_v11 = vadd.f32 %v873_v18, %v872_v4  ;;  %v3168_v18 = vld [vmem:[#allocation4_spill] sm:$0xff]  ;;  %v881_v13 = vsel %vm518_vm1, %v771_v41, 0.0 }
 0x1c6   :  { %v2297_v56 = vsub.f32 %v3168_v18, %v1951_v24 }
 0x1c7   :  { %v876_v25 = vadd.f32 %v875_v42, %v874_v11  ;;  %v773_v42 = vmul.f32 %v2290_v28, %v2290_v28 }
 0x1c8   :  { %3169 = vst [vmem:[#allocation4_spill] sm:$0xff] %v2297_v56  ;;  %v774_v18 = vmul.f32 %v2297_v56, %v2297_v56 }
 0x1c9   :  { %v878_v4 = vadd.f32 %v877_v14, %v876_v25  ;;  %v2311_v14 = vsub.f32 %v1796_v36, %v1951_v24  ;;  %v885_v41 = vsel %vm518_vm1, %v773_v42, 0.0  ;;  %v2325_v36 = vsub.f32 %v1828_v2, %v1951_v24 }
 0x1ca   :  { %v887_v21 = vsel %vm518_vm1, %v774_v18, 0.0 }
 0x1cb   :  { %v880_v11 = vadd.f32 %v879_v22, %v878_v4  ;;  %3171 = vst [vmem:[#allocation20_spill] sm:$0xff] %v2311_v14  ;;  %v775_v22 = vmul.f32 %v2304_v60, %v2304_v60  ;;  %v777_v60 = vmul.f32 %v2318_v16, %v2318_v16 }
 0x1cc   :  { %3173 = vst [vmem:[#allocation22_spill] sm:$0xff] %v2325_v36 }
 0x1cd   :  { %v882_v25 = vadd.f32 %v881_v13, %v880_v11  ;;  %v776_v13 = vmul.f32 %v2311_v14, %v2311_v14  ;;  %v889_v42 = vsel %vm518_vm1, %v775_v22, 0.0  ;;  %v778_v14 = vmul.f32 %v2325_v36, %v2325_v36 }
 0x1ce   :  { %v893_v22 = vsel %vm518_vm1, %v777_v60, 0.0 }
 0x1cf   :  { %v884_v4 = vadd.f32 %v883_v38, %v882_v25  ;;  %v3174_v38 = vld [vmem:[#allocation9_spill] sm:$0xff]  ;;  %v891_v18 = vsel %vm518_vm1, %v776_v13, 0.0  ;;  %v895_v13 = vsel %vm518_vm1, %v778_v14, 0.0 }
 0x1d0   :  { %v2332_v15 = vsub.f32 %v3174_v38, %v1951_v24 }
 0x1d1   :  { %v886_v11 = vadd.f32 %v885_v41, %v884_v4  ;;  %v3176_v41 = vld [vmem:[#allocation11_spill] sm:$0xff] }
 0x1d2   :  { %3175 = vst [vmem:[#allocation9_spill] sm:$0xff] %v2332_v15  ;;  %v2339_v2 = vsub.f32 %v3176_v41, %v1951_v24  ;;  %v779_v16 = vmul.f32 %v2332_v15, %v2332_v15 }
 0x1d3   :  { %v888_v25 = vadd.f32 %v887_v21, %v886_v11  ;;  %v3178_v21 = vld [vmem:[#allocation13_spill] sm:$0xff] }
 0x1d4   :  { %3177 = vst [vmem:[#allocation11_spill] sm:$0xff] %v2339_v2  ;;  %v2346_v38 = vsub.f32 %v3178_v21, %v1951_v24  ;;  %v780_v36 = vmul.f32 %v2339_v2, %v2339_v2  ;;  %v897_v60 = vsel %vm518_vm1, %v779_v16, 0.0  ;;  %v3184_v2 = vld [vmem:[#allocation16_spill] sm:$0xff]  ;;  %v3186_v16 = vld [vmem:[#allocation17_spill] sm:$0xff] }
 0x1d5   :  { %v890_v4 = vadd.f32 %v889_v42, %v888_v25  ;;  %v3180_v42 = vld [vmem:[#allocation14_spill] sm:$0xff]  ;;  %v2370_v56 = vsub.f32 %v3184_v2, %v1951_v24 }
 0x1d6   :  { %3179 = vst [vmem:[#allocation13_spill] sm:$0xff] %v2346_v38  ;;  %v2353_v41 = vsub.f32 %v3180_v42, %v1951_v24  ;;  %v781_v15 = vmul.f32 %v2346_v38, %v2346_v38  ;;  %v899_v42 = vsel %vm518_vm1, %v780_v36, 0.0 }
 0x1d7   :  { %v892_v11 = vadd.f32 %v891_v18, %v890_v4  ;;  %v3182_v18 = vld [vmem:[#allocation15_spill] sm:$0xff]  ;;  %3185 = vst [vmem:[#allocation16_spill] sm:$0xff] %v2370_v56  ;;  %v784_v36 = vmul.f32 %v2370_v56, %v2370_v56 }
 0x1d8   :  { %3181 = vst [vmem:[#allocation14_spill] sm:$0xff] %v2353_v41  ;;  %v2360_v21 = vsub.f32 %v3182_v18, %v1951_v24 }
 0x1d9   :  { %v894_v25 = vadd.f32 %v893_v22, %v892_v11  ;;  %v782_v22 = vmul.f32 %v2353_v41, %v2353_v41 }
 0x1da   :  { %3183 = vst [vmem:[#allocation15_spill] sm:$0xff] %v2360_v21 }
 0x1db   :  { %v896_v4 = vadd.f32 %v895_v13, %v894_v25  ;;  %v783_v25 = vmul.f32 %v2360_v21, %v2360_v21  ;;  %v901_v13 = vsel %vm518_vm1, %v781_v15, 0.0  ;;  %v903_v38 = vsel %vm518_vm1, %v782_v22, 0.0 }
 0x1dc   :  { %v907_v22 = vsel %vm518_vm1, %v784_v36, 0.0 }
 0x1dd   :  { %v898_v11 = vadd.f32 %v897_v60, %v896_v4  ;;  %v2378_v4 = vsub.f32 %v3186_v16, %v1951_v24  ;;  %v905_v2 = vsel %vm518_vm1, %v783_v25, 0.0 }
 0x1df   :  { %v900_v14 = vadd.f32 %v899_v42, %v898_v11  ;;  %3187 = vst [vmem:[#allocation17_spill] sm:$0xff] %v2378_v4  ;;  %v3188_v11 = vld [vmem:[#allocation18_spill] sm:$0xff]  ;;  %v785_v15 = vmul.f32 %v2378_v4, %v2378_v4 }
 0x1e0   :  { %v2385_v42 = vsub.f32 %v3188_v11, %v1951_v24 }
 0x1e1   :  { %v902_v18 = vadd.f32 %v901_v13, %v900_v14  ;;  %v723_v13 = vsub.f32 %v1944_v54, %v1951_v24 }
 0x1e2   :  { %3189 = vst [vmem:[#allocation18_spill] sm:$0xff] %v2385_v42  ;;  %v786_v16 = vmul.f32 %v2385_v42, %v2385_v42 }
 0x1e3   :  { %v904_v60 = vadd.f32 %v903_v38, %v902_v18  ;;  %v909_v38 = vsel %vm518_vm1, %v785_v15, 0.0  ;;  %v787_v18 = vmul.f32 %v723_v13, %v723_v13 }
 0x1e5   :  { %v906_v41 = vadd.f32 %v905_v2, %v904_v60  ;;  %v911_v60 = vsel %vm518_vm1, %v786_v16, 0.0  ;;  %v913_v11 = vsel %vm518_vm1, %v787_v18, 0.0 }
 0x1e7   :  { %v908_v14 = vadd.f32 %v907_v22, %v906_v41 }
 0x1e9   :  { %v910_v25 = vadd.f32 %v909_v38, %v908_v14 }
 0x1eb   :  { %v912_v2 = vadd.f32 %v911_v60, %v910_v25 }
 0x1ed   :  { %v914_v56 = vadd.f32 %v913_v11, %v912_v2 }
 0x1ef   :  { %v915_v4 = vrot.slane %v914_v56, 4 }
 0x1f1   :  { %v916_v21 = vadd.f32 %v915_v4, %v914_v56 }
 0x1f3   :  { %v917_v36 = vrot.slane %v916_v21, 2 }
 0x1f5   :  { %v918_v41 = vadd.f32 %v917_v36, %v916_v21  ;;  %v2404_v21 = vld [vmem:[%s3094_s2] ss:$0 sm:$0xff] }
 0x1f6   :  { %v3193_v36 = vld [vmem:[#allocation10_spill] sm:$0xff] }
 0x1f7   :  { %v919_v22 = vrot.slane %v918_v41, 1 }
 0x1f9   :  { %v920_v28 = vadd.f32 %v919_v22, %v918_v41  ;;  %v3194_v22 = vld [vmem:[#allocation2_spill] sm:$0xff] }
 0x1fb   :  { %v921_v54 = vmul.f32 %v920_v28, %v1948_v10  ;;  %v2410_v28 = vld [vmem:[%s3095_s3] ss:$0 sm:$0xff] }
 0x1fd   :  { %v922_v24 = vadd.f32 1e-05, %v921_v54 }
 0x1ff   :  { %1533 = vrsqrt.f32 %v922_v24  ;;  %vm929_vm4 = vweird.f32 %v922_v24 }
 0x205   :  { %v1534_v42 = vpop.eup %1533 }
 0x206   :  { %v924_v15 = vmul.f32 %v1534_v42, %v922_v24  ;;  %vm930_vm3 = vweird.f32 %v1534_v42  ;;  %v3195_v24 = vld [vmem:[#allocation3_spill] sm:$0xff] }
 0x207   :  { %vm931_vm5 = vmor %vm929_vm4, %vm930_vm3 }
 0x208   :  { %v925_v14 = vmul.f32 %v1534_v42, %v924_v15 }
 0x20a   :  { %v926_v38 = vmul.f32 0.5, %v925_v14 }
 0x20c   :  { %v927_v51 = vsub.f32 1.5, %v926_v38 }
 0x20e   :  { %v928_v16 = vmul.f32 %v1534_v42, %v927_v51 }
 0x210   :  { %v2398_v25 = vsel %vm931_vm5, %v1534_v42, %v928_v16 }
 0x211   :  { %v996_v56 = vmul.f32 %v2398_v25, %v723_v13  ;;  %v933_v4 = vmul.f32 %v2398_v25, %v1955_v17  ;;  %v934_v42 = vmul.f32 %v2398_v25, %v1959_v20  ;;  %v935_v13 = vmul.f32 %v2398_v25, %v1963_v27 }
 0x212   :  { %v936_v18 = vmul.f32 %v2398_v25, %v1967_v1  ;;  %v937_v60 = vmul.f32 %v2398_v25, %v1975_v29  ;;  %v938_v2 = vmul.f32 %v2398_v25, %v1981_v35  ;;  %v939_v11 = vmul.f32 %v2398_v25, %v1989_v31 }
 0x213   :  { %v1063_v10 = vmul.f32 %v2404_v21, %v996_v56  ;;  %v2431_v17 = vmul.f32 %v2398_v25, %v1996_v43  ;;  %v2435_v20 = vmul.f32 %v2398_v25, %v2003_v46  ;;  %v2439_v27 = vmul.f32 %v2398_v25, %v2010_v49  ;;  %v3196_v56 = vld [vmem:[#allocation5_spill] sm:$0xff] }
 0x214   :  { %v2443_v1 = vmul.f32 %v2398_v25, %v2017_v52  ;;  %v2447_v29 = vmul.f32 %v2398_v25, %v2024_v55  ;;  %v2451_v35 = vmul.f32 %v2398_v25, %v2031_v57  ;;  %v2455_v31 = vmul.f32 %v2398_v25, %v2038_v61 }
 0x215   :  { %v2413_v51 = vadd.f32 %v2410_v28, %v1063_v10  ;;  %v2459_v43 = vmul.f32 %v2398_v25, %v2045_v7  ;;  %v2463_v46 = vmul.f32 %v2398_v25, %v2052_v19  ;;  %v2467_v49 = vmul.f32 %v2398_v25, %v2059_v32 }
 0x216   :  { %v2471_v52 = vmul.f32 %v2398_v25, %v2066_v8  ;;  %v2475_v55 = vmul.f32 %v2398_v25, %v2073_v30  ;;  %v2479_v57 = vmul.f32 %v2398_v25, %v2080_v34  ;;  %v2483_v61 = vmul.f32 %v2398_v25, %v2087_v37 }
 0x217   :  { %3190 = vst [vmem:[#allocation23_spill] sm:$0xff] %v2413_v51  ;;  %v2487_v7 = vmul.f32 %v2398_v25, %v2094_v39  ;;  %v2491_v19 = vmul.f32 %v2398_v25, %v2101_v44  ;;  %v2495_v32 = vmul.f32 %v2398_v25, %v2108_v47  ;;  %v2499_v8 = vmul.f32 %v2398_v25, %v2115_v50  ;;  %v3191_v50 = vld [vmem:[#allocation7_spill] sm:$0xff] }
 0x218   :  { %v2503_v30 = vmul.f32 %v2398_v25, %v2122_v53  ;;  %v2507_v34 = vmul.f32 %v2398_v25, %v2129_v58  ;;  %v2511_v37 = vmul.f32 %v2398_v25, %v2136_v62  ;;  %v2515_v39 = vmul.f32 %v2398_v25, %v2143_v12  ;;  %v3192_v58 = vld [vmem:[#allocation8_spill] sm:$0xff] }
 0x219   :  { %v2519_v44 = vmul.f32 %v2398_v25, %v2150_v26  ;;  %v2523_v47 = vmul.f32 %v2398_v25, %v2157_v9  ;;  %v2527_v53 = vmul.f32 %v2398_v25, %v3191_v50  ;;  %v2531_v62 = vmul.f32 %v2398_v25, %v3192_v58  ;;  %v3198_v50 = vld [vmem:[#allocation12_spill] sm:$0xff] }
 0x21a   :  { %v2535_v12 = vmul.f32 %v2398_v25, %v2178_v33  ;;  %v2539_v26 = vmul.f32 %v2398_v25, %v2185_v40  ;;  %v2543_v9 = vmul.f32 %v2398_v25, %v2192_v45  ;;  %v2547_v41 = vmul.f32 %v2398_v25, %v3193_v36  ;;  %v3200_v58 = vld [vmem:[#allocation4_spill] sm:$0xff]  ;;  %v3202_v36 = vld [vmem:[#allocation19_spill] sm:$0xff] }
 0x21b   :  { %v2551_v54 = vmul.f32 %v2398_v25, %v3194_v22  ;;  %v2555_v33 = vmul.f32 %v2398_v25, %v2213_v5  ;;  %v2559_v40 = vmul.f32 %v2398_v25, %v2220_v59  ;;  %v2563_v45 = vmul.f32 %v2398_v25, %v2227_v0 }
 0x21c   :  { %v2567_v15 = vmul.f32 %v2398_v25, %v3195_v24  ;;  %v2571_v14 = vmul.f32 %v2398_v25, %v2241_v3  ;;  %v1000_v38 = vmul.f32 %v2404_v21, %v933_v4  ;;  %v2576_v5 = vmul.f32 %v2398_v25, %v2248_v6  ;;  %v3197_v6 = vld [vmem:[#allocation6_spill] sm:$0xff]  ;;  %v3204_v24 = vld [vmem:[#allocation20_spill] sm:$0xff] }
 0x21d   :  { %v2580_v59 = vmul.f32 %v2398_v25, %v2255_v63  ;;  %v2584_v0 = vmul.f32 %v2398_v25, %v2262_v23  ;;  %v1001_v16 = vmul.f32 %v2404_v21, %v934_v42  ;;  %v2589_v3 = vmul.f32 %v2398_v25, %v3196_v56 }
 0x21e   :  { %v2593_v10 = vmul.f32 %v2398_v25, %v2276_v48  ;;  %v2597_v4 = vmul.f32 %v2398_v25, %v3197_v6  ;;  %v1002_v63 = vmul.f32 %v2404_v21, %v935_v13  ;;  %v2602_v23 = vmul.f32 %v2398_v25, %v3198_v50  ;;  %v3206_v6 = vld [vmem:[#allocation21_spill] sm:$0xff] }
 0x21f   :  { %v2606_v42 = vmul.f32 %v2398_v25, %v3200_v58  ;;  %v2610_v22 = vmul.f32 %v2398_v25, %v3202_v36  ;;  %v1003_v48 = vmul.f32 %v2404_v21, %v936_v18  ;;  %v2615_v56 = vmul.f32 %v2398_v25, %v3204_v24  ;;  %v3208_v58 = vld [vmem:[#allocation22_spill] sm:$0xff]  ;;  %v3210_v36 = vld [vmem:[#allocation9_spill] sm:$0xff] }
 0x220   :  { %3199 = vst [vmem:[#allocation7_spill] sm:$0xff] %v2602_v23  ;;  %v2619_v13 = vmul.f32 %v2398_v25, %v3206_v6  ;;  %v1004_v50 = vmul.f32 %v2404_v21, %v937_v60  ;;  %v1067_v51 = vadd.f32 %v2410_v28, %v1000_v38  ;;  %v1005_v18 = vmul.f32 %v2404_v21, %v938_v2 }
 0x221   :  { %3201 = vst [vmem:[#allocation8_spill] sm:$0xff] %v2606_v42  ;;  %v2625_v42 = vmul.f32 %v2398_v25, %v3208_v58  ;;  %v1068_v24 = vadd.f32 %v2410_v28, %v1001_v16  ;;  %v1006_v38 = vmul.f32 %v2404_v21, %v939_v11  ;;  %v1069_v58 = vadd.f32 %v2410_v28, %v1002_v63 }
 0x222   :  { %3203 = vst [vmem:[#allocation10_spill] sm:$0xff] %v2610_v22  ;;  %v2629_v22 = vmul.f32 %v2398_v25, %v3210_v36  ;;  %v1007_v16 = vmul.f32 %v2404_v21, %v2431_v17  ;;  %v1008_v11 = vmul.f32 %v2404_v21, %v2435_v20  ;;  %v1071_v63 = vadd.f32 %v2410_v28, %v1004_v50 }
 0x223   :  { %3205 = vst [vmem:[#allocation2_spill] sm:$0xff] %v2615_v56  ;;  %v3212_v56 = vld [vmem:[#allocation11_spill] sm:$0xff]  ;;  %v1072_v17 = vadd.f32 %v2410_v28, %v1005_v18  ;;  %v1010_v20 = vmul.f32 %v2404_v21, %v2443_v1  ;;  %v1073_v50 = vadd.f32 %v2410_v28, %v1006_v38  ;;  %v1014_v1 = vmul.f32 %v2404_v21, %v2459_v43 }
 0x224   :  { %3207 = vst [vmem:[#allocation3_spill] sm:$0xff] %v2619_v13  ;;  %v2635_v6 = vmul.f32 %v2398_v25, %v3212_v56  ;;  %v3214_v13 = vld [vmem:[#allocation13_spill] sm:$0xff]  ;;  %v1070_v56 = vadd.f32 %v2410_v28, %v1003_v48  ;;  %v1132_v48 = vmax.f32 %v1068_v24, 0.0  ;;  %v1013_v24 = vmul.f32 %v2404_v21, %v2455_v31 }
 0x225   :  { %3209 = vst [vmem:[#allocation5_spill] sm:$0xff] %v2625_v42  ;;  %v2639_v60 = vmul.f32 %v2398_v25, %v3214_v13  ;;  %v3216_v42 = vld [vmem:[#allocation14_spill] sm:$0xff] }
 0x226   :  { %3211 = vst [vmem:[#allocation6_spill] sm:$0xff] %v2629_v22  ;;  %v2645_v36 = vmul.f32 %v2398_v25, %v3216_v42  ;;  %v3218_v22 = vld [vmem:[#allocation15_spill] sm:$0xff]  ;;  %v1131_v42 = vmax.f32 %v1067_v51, 0.0  ;;  %v1133_v51 = vmax.f32 %v1069_v58, 0.0  ;;  %v1134_v18 = vmax.f32 %v1070_v56, 0.0 }
 0x227   :  { %3213 = vst [vmem:[#allocation12_spill] sm:$0xff] %v2635_v6  ;;  %v2649_v2 = vmul.f32 %v2398_v25, %v3218_v22  ;;  %v3220_v6 = vld [vmem:[#allocation16_spill] sm:$0xff]  ;;  %v1009_v22 = vmul.f32 %v2404_v21, %v2439_v27  ;;  %v1074_v27 = vadd.f32 %v2410_v28, %v1007_v16  ;;  %v1136_v58 = vmax.f32 %v1072_v17, 0.0 }
 0x228   :  { %3215 = vst [vmem:[#allocation4_spill] sm:$0xff] %v2639_v60  ;;  %v2656_v13 = vmul.f32 %v2398_v25, %v3220_v6  ;;  %v1077_v16 = vadd.f32 %v2410_v28, %v1010_v20  ;;  %v1137_v56 = vmax.f32 %v1073_v50, 0.0  ;;  %v1080_v17 = vadd.f32 %v2410_v28, %v1013_v24 }
 0x229   :  { %3217 = vst [vmem:[#allocation19_spill] sm:$0xff] %v2645_v36  ;;  %v3222_v36 = vld [vmem:[#allocation17_spill] sm:$0xff]  ;;  %v1076_v38 = vadd.f32 %v2410_v28, %v1009_v22  ;;  %v1138_v23 = vmax.f32 %v1074_v27, 0.0  ;;  %v1200_v20 = vpack.c.bf16 %v1136_v58, %v1136_v58 }
 0x22a   :  { %3219 = vst [vmem:[#allocation20_spill] sm:$0xff] %v2649_v2  ;;  %v2663_v60 = vmul.f32 %v2398_v25, %v3222_v36  ;;  %v3224_v2 = vld [vmem:[#allocation18_spill] sm:$0xff]  ;;  %v1011_v36 = vmul.f32 %v2404_v21, %v2447_v29  ;;  %v1196_v29 = vpack.c.bf16 %v1132_v48, %v1132_v48  ;;  %v1141_v50 = vmax.f32 %v1077_v16, 0.0 }
 0x22b   :  { %3221 = vst [vmem:[#allocation21_spill] sm:$0xff] %v2656_v13  ;;  %v2670_v6 = vmul.f32 %v2398_v25, %v3224_v2  ;;  %v1075_v25 = vadd.f32 %v2410_v28, %v1008_v11  ;;  %v1135_v2 = vmax.f32 %v1071_v63, 0.0  ;;  %v1197_v13 = vpack.c.bf16 %v1133_v51, %v1133_v51 }
 0x22c   :  { %3223 = vst [vmem:[#allocation22_spill] sm:$0xff] %v2663_v60  ;;  %v1012_v60 = vmul.f32 %v2404_v21, %v2451_v35  ;;  %v1015_v35 = vmul.f32 %v2404_v21, %v2463_v46  ;;  %v1078_v31 = vadd.f32 %v2410_v28, %v1011_v36  ;;  %v1198_v11 = vpack.c.bf16 %v1134_v18, %v1134_v18 }
 0x22d   :  { %3225 = vst [vmem:[#allocation9_spill] sm:$0xff] %v2670_v6  ;;  %v1195_v6 = vpack.c.bf16 %v1131_v42, %v1131_v42  ;;  %v1016_v63 = vmul.f32 %v2404_v21, %v2467_v49  ;;  %v1139_v42 = vmax.f32 %v1075_v25, 0.0  ;;  %v1199_v22 = vpack.c.bf16 %v1135_v2, %v1135_v2 }
 0x22e   :  { %v1079_v43 = vadd.f32 %v2410_v28, %v1012_v60  ;;  %v1017_v46 = vmul.f32 %v2404_v21, %v2471_v52  ;;  %v1140_v48 = vmax.f32 %v1076_v38, 0.0  ;;  %1261 = vst.msk [vmem:[%s3096_s4 + $0x4] sm:$0xf] %vm1259_vm6, %v1196_v29  ;;  %v1018_v49 = vmul.f32 %v2404_v21, %v2475_v55 }
 0x22f   :  { %1260 = vst.msk [vmem:[%s3096_s4] sm:$0xf] %vm1259_vm6, %v1195_v6  ;;  %v1081_v60 = vadd.f32 %v2410_v28, %v1014_v1  ;;  %v1201_v51 = vpack.c.bf16 %v1137_v56, %v1137_v56  ;;  %v1019_v52 = vmul.f32 %v2404_v21, %v2479_v57  ;;  %v1082_v6 = vadd.f32 %v2410_v28, %v1015_v35 }
 0x230   :  { %1262 = vst.msk [vmem:[%s3096_s4 + $0x8] sm:$0xf] %vm1259_vm6, %v1197_v13  ;;  %v1142_v36 = vmax.f32 %v1078_v31, 0.0  ;;  %v1202_v27 = vpack.c.bf16 %v1138_v23, %v1138_v23  ;;  %v1020_v55 = vmul.f32 %v2404_v21, %v2483_v61  ;;  %v1083_v18 = vadd.f32 %v2410_v28, %v1016_v63 }
 0x231   :  { %1263 = vst.msk [vmem:[%s3096_s4 + $0xc] sm:$0xf] %vm1259_vm6, %v1198_v11  ;;  %v1143_v24 = vmax.f32 %v1079_v43, 0.0  ;;  %v1203_v25 = vpack.c.bf16 %v1139_v42, %v1139_v42  ;;  %v1021_v57 = vmul.f32 %v2404_v21, %v2487_v7  ;;  %v1084_v23 = vadd.f32 %v2410_v28, %v1017_v46 }
 0x232   :  { %1264 = vst.msk [vmem:[%s3096_s4 + $0x10] sm:$0xf] %vm1259_vm6, %v1199_v22  ;;  %v1144_v13 = vmax.f32 %v1080_v17, 0.0  ;;  %v1204_v2 = vpack.c.bf16 %v1140_v48, %v1140_v48  ;;  %v1022_v61 = vmul.f32 %v2404_v21, %v2491_v19  ;;  %v1085_v1 = vadd.f32 %v2410_v28, %v1018_v49 }
 0x233   :  { %1265 = vst.msk [vmem:[%s3096_s4 + $0x14] sm:$0xf] %vm1259_vm6, %v1200_v20  ;;  %v1145_v38 = vmax.f32 %v1081_v60, 0.0  ;;  %v1205_v58 = vpack.c.bf16 %v1141_v50, %v1141_v50  ;;  %v1023_v7 = vmul.f32 %v2404_v21, %v2495_v32  ;;  %v1086_v29 = vadd.f32 %v2410_v28, %v1019_v52 }
 0x234   :  { %1266 = vst.msk [vmem:[%s3096_s4 + $0x18] sm:$0xf] %vm1259_vm6, %v1201_v51  ;;  %v1146_v35 = vmax.f32 %v1082_v6, 0.0  ;;  %v1206_v16 = vpack.c.bf16 %v1142_v36, %v1142_v36  ;;  %v1024_v19 = vmul.f32 %v2404_v21, %v2499_v8  ;;  %v1087_v56 = vadd.f32 %v2410_v28, %v1020_v55 }
 0x235   :  { %1267 = vst.msk [vmem:[%s3096_s4 + $0x1c] sm:$0xf] %vm1259_vm6, %v1202_v27  ;;  %v1147_v31 = vmax.f32 %v1083_v18, 0.0  ;;  %v1207_v11 = vpack.c.bf16 %v1143_v24, %v1143_v24  ;;  %v1025_v32 = vmul.f32 %v2404_v21, %v2503_v30  ;;  %v1088_v63 = vadd.f32 %v2410_v28, %v1021_v57 }
 0x236   :  { %1268 = vst.msk [vmem:[%s3096_s4 + $0x20] sm:$0xf] %vm1259_vm6, %v1203_v25  ;;  %v1148_v43 = vmax.f32 %v1084_v23, 0.0  ;;  %v1208_v42 = vpack.c.bf16 %v1144_v13, %v1144_v13  ;;  %v1026_v8 = vmul.f32 %v2404_v21, %v2507_v34  ;;  %v1089_v22 = vadd.f32 %v2410_v28, %v1022_v61 }
 0x237   :  { %1269 = vst.msk [vmem:[%s3096_s4 + $0x24] sm:$0xf] %vm1259_vm6, %v1204_v2  ;;  %v1149_v46 = vmax.f32 %v1085_v1, 0.0  ;;  %v1209_v17 = vpack.c.bf16 %v1145_v38, %v1145_v38  ;;  %v1027_v30 = vmul.f32 %v2404_v21, %v2511_v37  ;;  %v1090_v48 = vadd.f32 %v2410_v28, %v1023_v7 }
 0x238   :  { %1270 = vst.msk [vmem:[%s3096_s4 + $0x28] sm:$0xf] %vm1259_vm6, %v1205_v58  ;;  %v1150_v20 = vmax.f32 %v1086_v29, 0.0  ;;  %v1210_v49 = vpack.c.bf16 %v1146_v35, %v1146_v35  ;;  %v1028_v34 = vmul.f32 %v2404_v21, %v2515_v39  ;;  %v1091_v60 = vadd.f32 %v2410_v28, %v1024_v19 }
 0x239   :  { %1271 = vst.msk [vmem:[%s3096_s4 + $0x2c] sm:$0xf] %vm1259_vm6, %v1206_v16  ;;  %v1151_v50 = vmax.f32 %v1087_v56, 0.0  ;;  %v1211_v51 = vpack.c.bf16 %v1147_v31, %v1147_v31  ;;  %v1029_v37 = vmul.f32 %v2404_v21, %v2519_v44  ;;  %v1092_v52 = vadd.f32 %v2410_v28, %v1025_v32 }
 0x23a   :  { %1272 = vst.msk [vmem:[%s3096_s4 + $0x30] sm:$0xf] %vm1259_vm6, %v1207_v11  ;;  %v1152_v6 = vmax.f32 %v1088_v63, 0.0  ;;  %v1212_v36 = vpack.c.bf16 %v1148_v43, %v1148_v43  ;;  %v1030_v39 = vmul.f32 %v2404_v21, %v2523_v47  ;;  %v1093_v27 = vadd.f32 %v2410_v28, %v1026_v8 }
 0x23b   :  { %1273 = vst.msk [vmem:[%s3096_s4 + $0x34] sm:$0xf] %vm1259_vm6, %v1208_v42  ;;  %v1153_v55 = vmax.f32 %v1089_v22, 0.0  ;;  %v1213_v18 = vpack.c.bf16 %v1149_v46, %v1149_v46  ;;  %v1031_v44 = vmul.f32 %v2404_v21, %v2527_v53  ;;  %v1094_v24 = vadd.f32 %v2410_v28, %v1027_v30 }
 0x23c   :  { %1274 = vst.msk [vmem:[%s3096_s4 + $0x38] sm:$0xf] %vm1259_vm6, %v1209_v17  ;;  %v1154_v25 = vmax.f32 %v1090_v48, 0.0  ;;  %v1214_v57 = vpack.c.bf16 %v1150_v20, %v1150_v20  ;;  %v1032_v47 = vmul.f32 %v2404_v21, %v2531_v62  ;;  %v1095_v23 = vadd.f32 %v2410_v28, %v1028_v34 }
 0x23d   :  { %1275 = vst.msk [vmem:[%s3096_s4 + $0x3c] sm:$0xf] %vm1259_vm6, %v1210_v49  ;;  %v1155_v13 = vmax.f32 %v1091_v60, 0.0  ;;  %v1215_v2 = vpack.c.bf16 %v1151_v50, %v1151_v50  ;;  %v1033_v53 = vmul.f32 %v2404_v21, %v2535_v12  ;;  %v1096_v61 = vadd.f32 %v2410_v28, %v1029_v37 }
 0x23e   :  { %1276 = vst.msk [vmem:[%s3096_s4 + $0x40] sm:$0xf] %vm1259_vm6, %v1211_v51  ;;  %v1156_v1 = vmax.f32 %v1092_v52, 0.0  ;;  %v1216_v38 = vpack.c.bf16 %v1152_v6, %v1152_v6  ;;  %v1034_v62 = vmul.f32 %v2404_v21, %v2539_v26  ;;  %v1097_v58 = vadd.f32 %v2410_v28, %v1030_v39 }
 0x23f   :  { %1277 = vst.msk [vmem:[%s3096_s4 + $0x44] sm:$0xf] %vm1259_vm6, %v1212_v36  ;;  %v1157_v7 = vmax.f32 %v1093_v27, 0.0  ;;  %v1217_v29 = vpack.c.bf16 %v1153_v55, %v1153_v55  ;;  %v1035_v12 = vmul.f32 %v2404_v21, %v2543_v9  ;;  %v1098_v35 = vadd.f32 %v2410_v28, %v1031_v44 }
 0x240   :  { %1278 = vst.msk [vmem:[%s3096_s4 + $0x48] sm:$0xf] %vm1259_vm6, %v1213_v18  ;;  %v1158_v16 = vmax.f32 %v1094_v24, 0.0  ;;  %v1218_v19 = vpack.c.bf16 %v1154_v25, %v1154_v25  ;;  %v1036_v26 = vmul.f32 %v2404_v21, %v2547_v41  ;;  %v1099_v56 = vadd.f32 %v2410_v28, %v1032_v47 }
 0x241   :  { %1279 = vst.msk [vmem:[%s3096_s4 + $0x4c] sm:$0xf] %vm1259_vm6, %v1214_v57  ;;  %v1159_v31 = vmax.f32 %v1095_v23, 0.0  ;;  %v1219_v11 = vpack.c.bf16 %v1155_v13, %v1155_v13  ;;  %v1037_v9 = vmul.f32 %v2404_v21, %v2551_v54  ;;  %v1100_v32 = vadd.f32 %v2410_v28, %v1033_v53 }
 0x242   :  { %1280 = vst.msk [vmem:[%s3096_s4 + $0x50] sm:$0xf] %vm1259_vm6, %v1215_v2  ;;  %v1160_v63 = vmax.f32 %v1096_v61, 0.0  ;;  %v1220_v43 = vpack.c.bf16 %v1156_v1, %v1156_v1  ;;  %v1038_v41 = vmul.f32 %v2404_v21, %v2555_v33  ;;  %v1101_v42 = vadd.f32 %v2410_v28, %v1034_v62 }
 0x243   :  { %1281 = vst.msk [vmem:[%s3096_s4 + $0x54] sm:$0xf] %vm1259_vm6, %v1216_v38  ;;  %v1161_v8 = vmax.f32 %v1097_v58, 0.0  ;;  %v1221_v22 = vpack.c.bf16 %v1157_v7, %v1157_v7  ;;  %v1039_v54 = vmul.f32 %v2404_v21, %v2559_v40  ;;  %v1102_v46 = vadd.f32 %v2410_v28, %v1035_v12 }
 0x244   :  { %1282 = vst.msk [vmem:[%s3096_s4 + $0x58] sm:$0xf] %vm1259_vm6, %v1217_v29  ;;  %v1162_v17 = vmax.f32 %v1098_v35, 0.0  ;;  %v1222_v30 = vpack.c.bf16 %v1158_v16, %v1158_v16  ;;  %v1040_v33 = vmul.f32 %v2404_v21, %v2563_v45  ;;  %v1103_v48 = vadd.f32 %v2410_v28, %v1036_v26  ;;  %v3228_v26 = vld [vmem:[#allocation10_spill] sm:$0xff] }
 0x245   :  { %1283 = vst.msk [vmem:[%s3096_s4 + $0x5c] sm:$0xf] %vm1259_vm6, %v1218_v19  ;;  %v1163_v20 = vmax.f32 %v1099_v56, 0.0  ;;  %v1223_v49 = vpack.c.bf16 %v1159_v31, %v1159_v31  ;;  %v1041_v40 = vmul.f32 %v2404_v21, %v2567_v15  ;;  %v1104_v34 = vadd.f32 %v2410_v28, %v1037_v9 }
 0x246   :  { %1284 = vst.msk [vmem:[%s3096_s4 + $0x60] sm:$0xf] %vm1259_vm6, %v1219_v11  ;;  %v1164_v60 = vmax.f32 %v1100_v32, 0.0  ;;  %v1224_v50 = vpack.c.bf16 %v1160_v63, %v1160_v63  ;;  %v1042_v45 = vmul.f32 %v2404_v21, %v2571_v14  ;;  %v1105_v51 = vadd.f32 %v2410_v28, %v1038_v41  ;;  %v3229_v32 = vld [vmem:[#allocation2_spill] sm:$0xff] }
 0x247   :  { %1285 = vst.msk [vmem:[%s3096_s4 + $0x64] sm:$0xf] %vm1259_vm6, %v1220_v43  ;;  %v1165_v37 = vmax.f32 %v1101_v42, 0.0  ;;  %v1225_v52 = vpack.c.bf16 %v1161_v8, %v1161_v8  ;;  %v1043_v15 = vmul.f32 %v2404_v21, %v2576_v5  ;;  %v1106_v6 = vadd.f32 %v2410_v28, %v1039_v54  ;;  %v3230_v8 = vld [vmem:[#allocation3_spill] sm:$0xff] }
 0x248   :  { %1286 = vst.msk [vmem:[%s3096_s4 + $0x68] sm:$0xf] %vm1259_vm6, %v1221_v22  ;;  %v1166_v36 = vmax.f32 %v1102_v46, 0.0  ;;  %v1226_v39 = vpack.c.bf16 %v1162_v17, %v1162_v17  ;;  %v1044_v14 = vmul.f32 %v2404_v21, %v2580_v59  ;;  %v1107_v27 = vadd.f32 %v2410_v28, %v1040_v33 }
 0x249   :  { %1287 = vst.msk [vmem:[%s3096_s4 + $0x6c] sm:$0xf] %vm1259_vm6, %v1222_v30  ;;  %v1167_v55 = vmax.f32 %v1103_v48, 0.0  ;;  %v1227_v18 = vpack.c.bf16 %v1163_v20, %v1163_v20  ;;  %v1045_v5 = vmul.f32 %v2404_v21, %v2584_v0  ;;  %v1108_v44 = vadd.f32 %v2410_v28, %v1041_v40  ;;  %v3231_v30 = vld [vmem:[#allocation5_spill] sm:$0xff]  ;;  %v3232_v40 = vld [vmem:[#allocation6_spill] sm:$0xff] }
 0x24a   :  { %1288 = vst.msk [vmem:[%s3096_s4 + $0x70] sm:$0xf] %vm1259_vm6, %v1223_v49  ;;  %v1168_v24 = vmax.f32 %v1104_v34, 0.0  ;;  %v1228_v25 = vpack.c.bf16 %v1164_v60, %v1164_v60  ;;  %v1046_v59 = vmul.f32 %v2404_v21, %v2589_v3  ;;  %v1109_v57 = vadd.f32 %v2410_v28, %v1042_v45 }
 0x24b   :  { %1289 = vst.msk [vmem:[%s3096_s4 + $0x74] sm:$0xf] %vm1259_vm6, %v1224_v50  ;;  %v1169_v47 = vmax.f32 %v1105_v51, 0.0  ;;  %v1229_v23 = vpack.c.bf16 %v1165_v37, %v1165_v37  ;;  %v1047_v0 = vmul.f32 %v2404_v21, %v2593_v10  ;;  %v1110_v13 = vadd.f32 %v2410_v28, %v1043_v15  ;;  %v3226_v10 = vld [vmem:[#allocation7_spill] sm:$0xff]  ;;  %v3233_v51 = vld [vmem:[#allocation12_spill] sm:$0xff] }
 0x24c   :  { %1290 = vst.msk [vmem:[%s3096_s4 + $0x78] sm:$0xf] %vm1259_vm6, %v1225_v52  ;;  %v1170_v2 = vmax.f32 %v1106_v6, 0.0  ;;  %v1230_v53 = vpack.c.bf16 %v1166_v36, %v1166_v36  ;;  %v1048_v3 = vmul.f32 %v2404_v21, %v2597_v4  ;;  %v1111_v61 = vadd.f32 %v2410_v28, %v1044_v14  ;;  %v3227_v4 = vld [vmem:[#allocation8_spill] sm:$0xff] }
 0x24d   :  { %1291 = vst.msk [vmem:[%s3096_s4 + $0x7c] sm:$0xf] %vm1259_vm6, %v1226_v39  ;;  %v1171_v1 = vmax.f32 %v1107_v27, 0.0  ;;  %v1231_v38 = vpack.c.bf16 %v1167_v55, %v1167_v55  ;;  %v1049_v62 = vmul.f32 %v2404_v21, %v3226_v10  ;;  %v1112_v58 = vadd.f32 %v2410_v28, %v1045_v5  ;;  %v3234_v36 = vld [vmem:[#allocation4_spill] sm:$0xff] }
 0x24e   :  { %1292 = vst.msk [vmem:[%s3096_s4 + $0x80] sm:$0xf] %vm1259_vm6, %v1227_v18  ;;  %v1172_v7 = vmax.f32 %v1108_v44, 0.0  ;;  %v1232_v29 = vpack.c.bf16 %v1168_v24, %v1168_v24  ;;  %v1050_v12 = vmul.f32 %v2404_v21, %v3227_v4  ;;  %v1113_v35 = vadd.f32 %v2410_v28, %v1046_v59  ;;  %v3235_v18 = vld [vmem:[#allocation19_spill] sm:$0xff]  ;;  %v3236_v59 = vld [vmem:[#allocation20_spill] sm:$0xff] }
 0x24f   :  { %1293 = vst.msk [vmem:[%s3096_s4 + $0x84] sm:$0xf] %vm1259_vm6, %v1228_v25  ;;  %v1173_v16 = vmax.f32 %v1109_v57, 0.0  ;;  %v1233_v19 = vpack.c.bf16 %v1169_v47, %v1169_v47  ;;  %v1051_v56 = vmul.f32 %v2404_v21, %v3228_v26  ;;  %v1114_v31 = vadd.f32 %v2410_v28, %v1047_v0 }
 0x250   :  { %1294 = vst.msk [vmem:[%s3096_s4 + $0x88] sm:$0xf] %vm1259_vm6, %v1229_v23  ;;  %v1174_v11 = vmax.f32 %v1110_v13, 0.0  ;;  %v1234_v9 = vpack.c.bf16 %v1170_v2, %v1170_v2  ;;  %v1052_v63 = vmul.f32 %v2404_v21, %v3229_v32  ;;  %v1115_v43 = vadd.f32 %v2410_v28, %v1048_v3  ;;  %v3237_v13 = vld [vmem:[#allocation21_spill] sm:$0xff] }
 0x251   :  { %1295 = vst.msk [vmem:[%s3096_s4 + $0x8c] sm:$0xf] %vm1259_vm6, %v1230_v53  ;;  %v1175_v41 = vmax.f32 %v1111_v61, 0.0  ;;  %v1235_v42 = vpack.c.bf16 %v1171_v1, %v1171_v1  ;;  %v1053_v22 = vmul.f32 %v2404_v21, %v3230_v8  ;;  %v1116_v54 = vadd.f32 %v2410_v28, %v1049_v62  ;;  %v3238_v1 = vld [vmem:[#allocation22_spill] sm:$0xff] }
 0x252   :  { %1296 = vst.msk [vmem:[%s3096_s4 + $0x90] sm:$0xf] %vm1259_vm6, %v1231_v38  ;;  %v1176_v46 = vmax.f32 %v1112_v58, 0.0  ;;  %v1236_v17 = vpack.c.bf16 %v1172_v7, %v1172_v7  ;;  %v1054_v33 = vmul.f32 %v2404_v21, %v3231_v30  ;;  %v1117_v48 = vadd.f32 %v2410_v28, %v1050_v12  ;;  %v3239_v7 = vld [vmem:[#allocation9_spill] sm:$0xff] }
 0x253   :  { %1297 = vst.msk [vmem:[%s3096_s4 + $0x94] sm:$0xf] %vm1259_vm6, %v1232_v29  ;;  %v1177_v20 = vmax.f32 %v1113_v35, 0.0  ;;  %v1237_v49 = vpack.c.bf16 %v1173_v16, %v1173_v16  ;;  %v1055_v34 = vmul.f32 %v2404_v21, %v3232_v40  ;;  %v1118_v60 = vadd.f32 %v2410_v28, %v1051_v56 }
 0x254   :  { %1298 = vst.msk [vmem:[%s3096_s4 + $0x98] sm:$0xf] %vm1259_vm6, %v1233_v19  ;;  %v1178_v50 = vmax.f32 %v1114_v31, 0.0  ;;  %v1238_v45 = vpack.c.bf16 %v1174_v11, %v1174_v11  ;;  %v1056_v37 = vmul.f32 %v2404_v21, %v3233_v51  ;;  %v1119_v52 = vadd.f32 %v2410_v28, %v1052_v63 }
 0x255   :  { %1299 = vst.msk [vmem:[%s3096_s4 + $0x9c] sm:$0xf] %vm1259_vm6, %v1234_v9  ;;  %v1179_v15 = vmax.f32 %v1115_v43, 0.0  ;;  %v1239_v6 = vpack.c.bf16 %v1175_v41, %v1175_v41  ;;  %v1057_v39 = vmul.f32 %v2404_v21, %v3234_v36  ;;  %v1120_v14 = vadd.f32 %v2410_v28, %v1053_v22 }
 0x256   :  { %1300 = vst.msk [vmem:[%s3096_s4 + $0xa0] sm:$0xf] %vm1259_vm6, %v1235_v42  ;;  %v1180_v27 = vmax.f32 %v1116_v54, 0.0  ;;  %v1240_v55 = vpack.c.bf16 %v1176_v46, %v1176_v46  ;;  %v1058_v5 = vmul.f32 %v2404_v21, %v3235_v18  ;;  %v1121_v44 = vadd.f32 %v2410_v28, %v1054_v33  ;;  %v3240_v33 = vld [vmem:[#allocation23_spill] sm:$0xff] }
 0x257   :  { %1301 = vst.msk [vmem:[%s3096_s4 + $0xa4] sm:$0xf] %vm1259_vm6, %v1236_v17  ;;  %v1181_v24 = vmax.f32 %v1117_v48, 0.0  ;;  %v1241_v25 = vpack.c.bf16 %v1177_v20, %v1177_v20  ;;  %v1059_v57 = vmul.f32 %v2404_v21, %v3236_v59  ;;  %v1122_v47 = vadd.f32 %v2410_v28, %v1055_v34 }
 0x258   :  { %1302 = vst.msk [vmem:[%s3096_s4 + $0xa8] sm:$0xf] %vm1259_vm6, %v1237_v49  ;;  %v1182_v23 = vmax.f32 %v1118_v60, 0.0  ;;  %v1242_v0 = vpack.c.bf16 %v1178_v50, %v1178_v50  ;;  %v1060_v2 = vmul.f32 %v2404_v21, %v3237_v13  ;;  %v1123_v53 = vadd.f32 %v2410_v28, %v1056_v37 }
 0x259   :  { %1303 = vst.msk [vmem:[%s3096_s4 + $0xac] sm:$0xf] %vm1259_vm6, %v1238_v45  ;;  %v1183_v3 = vmax.f32 %v1119_v52, 0.0  ;;  %v1243_v61 = vpack.c.bf16 %v1179_v15, %v1179_v15  ;;  %v1061_v38 = vmul.f32 %v2404_v21, %v3238_v1  ;;  %v1124_v10 = vadd.f32 %v2410_v28, %v1057_v39 }
 0x25a   :  { %1304 = vst.msk [vmem:[%s3096_s4 + $0xb0] sm:$0xf] %vm1259_vm6, %v1239_v6  ;;  %v1184_v62 = vmax.f32 %v1120_v14, 0.0  ;;  %v1244_v58 = vpack.c.bf16 %v1180_v27, %v1180_v27  ;;  %v1062_v29 = vmul.f32 %v2404_v21, %v3239_v7  ;;  %v1125_v4 = vadd.f32 %v2410_v28, %v1058_v5 }
 0x25b   :  { %1305 = vst.msk [vmem:[%s3096_s4 + $0xb4] sm:$0xf] %vm1259_vm6, %v1240_v55  ;;  %v1185_v12 = vmax.f32 %v1121_v44, 0.0  ;;  %v1245_v35 = vpack.c.bf16 %v1181_v24, %v1181_v24  ;;  %v1126_v16 = vadd.f32 %v2410_v28, %v1059_v57  ;;  %v1186_v19 = vmax.f32 %v1122_v47, 0.0 }
 0x25c   :  { %1306 = vst.msk [vmem:[%s3096_s4 + $0xb8] sm:$0xf] %vm1259_vm6, %v1241_v25  ;;  %v1246_v26 = vpack.c.bf16 %v1182_v23, %v1182_v23  ;;  %v1127_v21 = vadd.f32 %v2410_v28, %v1060_v2  ;;  %v1187_v56 = vmax.f32 %v1123_v53, 0.0  ;;  %v1247_v31 = vpack.c.bf16 %v1183_v3, %v1183_v3 }
 0x25d   :  { %1307 = vst.msk [vmem:[%s3096_s4 + $0xbc] sm:$0xf] %vm1259_vm6, %v1242_v0  ;;  %v1128_v11 = vadd.f32 %v2410_v28, %v1061_v38  ;;  %v1188_v9 = vmax.f32 %v1124_v10, 0.0  ;;  %v1248_v32 = vpack.c.bf16 %v1184_v62, %v1184_v62  ;;  %v1129_v63 = vadd.f32 %v2410_v28, %v1062_v29 }
 0x25e   :  { %1308 = vst.msk [vmem:[%s3096_s4 + $0xc0] sm:$0xf] %vm1259_vm6, %v1243_v61  ;;  %v1189_v43 = vmax.f32 %v1125_v4, 0.0  ;;  %v1249_v41 = vpack.c.bf16 %v1185_v12, %v1185_v12  ;;  %v1190_v42 = vmax.f32 %v1126_v16, 0.0  ;;  %v1250_v8 = vpack.c.bf16 %v1186_v19, %v1186_v19 }
 0x25f   :  { %1309 = vst.msk [vmem:[%s3096_s4 + $0xc4] sm:$0xf] %vm1259_vm6, %v1244_v58  ;;  %v1191_v22 = vmax.f32 %v1127_v21, 0.0  ;;  %v1251_v54 = vpack.c.bf16 %v1187_v56, %v1187_v56  ;;  %v1192_v28 = vmax.f32 %v1128_v11, 0.0  ;;  %v1252_v46 = vpack.c.bf16 %v1188_v9, %v1188_v9 }
 0x260   :  { %1310 = vst.msk [vmem:[%s3096_s4 + $0xc8] sm:$0xf] %vm1259_vm6, %v1245_v35  ;;  %v1193_v17 = vmax.f32 %v1129_v63, 0.0  ;;  %v1253_v30 = vpack.c.bf16 %v1189_v43, %v1189_v43  ;;  %v1194_v48 = vmax.f32 %v3240_v33, 0.0  ;;  %v1254_v20 = vpack.c.bf16 %v1190_v42, %v1190_v42 }
 0x261   :  { %1311 = vst.msk [vmem:[%s3096_s4 + $0xcc] sm:$0xf] %vm1259_vm6, %v1246_v26  ;;  %v1255_v49 = vpack.c.bf16 %v1191_v22, %v1191_v22  ;;  %v1256_v40 = vpack.c.bf16 %v1192_v28, %v1192_v28 }
 0x262   :  { %1312 = vst.msk [vmem:[%s3096_s4 + $0xd0] sm:$0xf] %vm1259_vm6, %v1247_v31  ;;  %v1257_v34 = vpack.c.bf16 %v1193_v17, %v1193_v17  ;;  %v1258_v60 = vpack.c.bf16 %v1194_v48, %v1194_v48 }
 0x263   :  { %1313 = vst.msk [vmem:[%s3096_s4 + $0xd4] sm:$0xf] %vm1259_vm6, %v1248_v32 }
 0x264   :  { %1314 = vst.msk [vmem:[%s3096_s4 + $0xd8] sm:$0xf] %vm1259_vm6, %v1249_v41 }
 0x265   :  { %1315 = vst.msk [vmem:[%s3096_s4 + $0xdc] sm:$0xf] %vm1259_vm6, %v1250_v8 }
 0x266   :  { %1316 = vst.msk [vmem:[%s3096_s4 + $0xe0] sm:$0xf] %vm1259_vm6, %v1251_v54 }
 0x267   :  { %1317 = vst.msk [vmem:[%s3096_s4 + $0xe4] sm:$0xf] %vm1259_vm6, %v1252_v46 }
 0x268   :  { %1318 = vst.msk [vmem:[%s3096_s4 + $0xe8] sm:$0xf] %vm1259_vm6, %v1253_v30 }
 0x269   :  { %1319 = vst.msk [vmem:[%s3096_s4 + $0xec] sm:$0xf] %vm1259_vm6, %v1254_v20 }
 0x26a   :  { %1320 = vst.msk [vmem:[%s3096_s4 + $0xf0] sm:$0xf] %vm1259_vm6, %v1255_v49 }
 0x26b   :  { %1321 = vst.msk [vmem:[%s3096_s4 + $0xf4] sm:$0xf] %vm1259_vm6, %v1256_v40 }
 0x26c   :  { %1322 = vst.msk [vmem:[%s3096_s4 + $0xf8] sm:$0xf] %vm1259_vm6, %v1257_v34 }
 0x26d   :  { %1323 = vst.msk [vmem:[%s3096_s4 + $0xfc] sm:$0xf] %vm1259_vm6, %v1258_v60 }

// kernel: resnext_block_forward.3
= control target key start
LH: loop header
LB: loop body
LE: loop exit
PB: predicated region body
PF: predicated region fallthrough
CT: control target
= control target key end

     0   :  { %vm141_vm0 = vcmask 1043456   ;;  %vm116_vm1 = vcmask 64512   ;;  %vm342_vm2 = vsmask.f32 3328  ;;  %vm343_vm3 = vsmask.f32 7440  ;;  %s5169_s0 = inlined_call_operand.vmem [shape: bf16[2,2,2,9,9,8], index: 0, kind: input, shape index: {}]   ;;  %s5170_s1 = inlined_call_operand.vmem [shape: bf16[128,16], index: 1, kind: input, shape index: {}]   ;;  %s5171_s2 = inlined_call_operand.vmem [shape: bf16[9,8,8], index: 2, kind: input, shape index: {}]   ;;  %s5172_s3 = inlined_call_operand.vmem [shape: f32[1,8], index: 3, kind: input, shape index: {}]   ;;  %s5173_s4 = inlined_call_operand.vmem [shape: f32[1,8], index: 4, kind: input, shape index: {}]   ;;  %s5174_s5 = inlined_call_operand.vmem [shape: bf16[8,64], index: 5, kind: input, shape index: {}]   ;;  %s5175_s6 = inlined_call_operand.vmem [shape: f32[1,64], index: 6, kind: input, shape index: {}]   ;;  %s5176_s7 = inlined_call_operand.vmem [shape: f32[1,64], index: 7, kind: input, shape index: {}]   ;;  %s5177_s8 = inlined_call_operand.vmem [shape: bf16[16,64], index: 8, kind: input, shape index: {}]   ;;  %s5178_s9 = inlined_call_operand.vmem [shape: f32[1,64], index: 9, kind: input, shape index: {}]   ;;  %s5179_s10 = inlined_call_operand.vmem [shape: f32[1,64], index: 10, kind: input, shape index: {}]   ;;  %s5180_s11 = inlined_call_operand.hbm [shape: f32[128,64], index: 11, kind: output, shape index: {}]  }
   0x1   :  { %v2893_v0 = vld [vmem:[%s5171_s2 + $0x4] sm:$0xf]  ;;  %v56_v1 = vld [vmem:[%s5171_s2] sm:$0xf]  ;;  %v2896_v4 = vld [vmem:[%s5169_s0 + $0x90] sm:$0xf] }
   0x2   :  { %v143_v2 = vsel %vm141_vm0, %v2893_v0, 0  ;;  %v259_v3 = vsel %vm141_vm0, %v56_v1, 0  ;;  %v3353_v5 = vld [vmem:[%s5169_s0 + $0x94] sm:$0xf0]  ;;  %v3359_v8 = vld [vmem:[%s5169_s0 + $0xfc] sm:$0xf0]  ;;  %vm3562_vm4 = vmor %vm342_vm2, %vm343_vm3 }
   0x3   :  { %152 = vmatpush.bf16.msra.mxu0 %v143_v2  ;;  %3402 = vmatpush.bf16.msra.mxu3 %v143_v2  ;;  %v2897_v6 = vor.u32 %v3353_v5, %v2896_v4  ;;  %v2920_v7 = vld [vmem:[%s5169_s0 + $0xf8] sm:$0xf]  ;;  %v2936_v9 = vld [vmem:[%s5169_s0] sm:$0xf]  ;;  %v3345_v11 = vld [vmem:[%s5169_s0 + $0x4] sm:$0xf0] }
   0x4   :  { %268 = vmatpush.bf16.msra.mxu1 %v259_v3  ;;  %v2921_v10 = vor.u32 %v3359_v8, %v2920_v7  ;;  %v2974_v12 = vld [vmem:[%s5171_s2 + $0x8] sm:$0xf]  ;;  %v3056_v13 = vld [vmem:[%s5171_s2 + $0x10] sm:$0xf]  ;;  %v2937_v14 = vor.u32 %v3345_v11, %v2936_v9  ;;  %v310_v17 = vld [vmem:[%s5169_s0] sm:$0xf] }
   0x5   :  { %v620_v15 = vsel %vm141_vm0, %v2974_v12, 0  ;;  %v922_v16 = vsel %vm141_vm0, %v3056_v13, 0  ;;  %v311_v18 = vld [vmem:[%s5169_s0 + $0x4] sm:$0x1]  ;;  %v312_v19 = vld [vmem:[%s5169_s0 + $0x8] sm:$0xf] }
   0x6   :  { %2926 = vmatmul.msk.bf16.vlgmr.msra.gmra.mxu0 %vm116_vm1, %v2897_v6  ;;  %2932 = vmatmul.msk.bf16.vlgmr.msra.gmra.mxu3 %vm116_vm1, %v2921_v10  ;;  %v313_v20 = vld [vmem:[%s5169_s0 + $0xc] sm:$0x1]  ;;  %v346_v21 = vshrl.u32 %v310_v17, 16  ;;  %v349_v22 = vshll.u32 %v310_v17, 16  ;;  %v355_v23 = vshll.u32 %v311_v18, 16  ;;  %v360_v24 = vshrl.u32 %v312_v19, 16 }
   0x7   :  { %3403 = vmatpush.bf16.msrb.mxu3 %v259_v3  ;;  %2966 = vmatmul.msk.bf16.vlgmr.msra.gmra.mxu1 %vm116_vm1, %v2937_v14  ;;  %v363_v25 = vshll.u32 %v312_v19, 16  ;;  %v369_v26 = vshll.u32 %v313_v20, 16  ;;  %v2900_v36 = vld [vmem:[%s5169_s0 + $0xa0] sm:$0xf]  ;;  %v3354_v37 = vld [vmem:[%s5169_s0 + $0xa4] sm:$0xf0] }
   0x8   :  { %629 = vmatpush.bf16.msra.mxu2 %v620_v15  ;;  %931 = vmatpush.bf16.msrb.mxu0 %v922_v16  ;;  %v348_v27 = vrot.slane %v346_v21, 4  ;;  %v351_v28 = vrot.slane %v349_v22, 5  ;;  %v362_v29 = vrot.slane %v360_v24, 4  ;;  %v357_v32 = vrot.slane %v355_v23, 5  ;;  %v314_v38 = vld [vmem:[%s5169_s0 + $0x10] sm:$0xf] }
   0x9   :  { %v365_v30 = vrot.slane %v363_v25, 5  ;;  %v371_v35 = vrot.slane %v369_v26, 5  ;;  %v316_v39 = vld [vmem:[%s5169_s0 + $0x18] sm:$0xf]  ;;  %v2924_v41 = vld [vmem:[%s5169_s0 + $0x108] sm:$0xf]  ;;  %v2901_v60 = vor.u32 %v3354_v37, %v2900_v36 }
   0xa   :  { %v352_v31 = vor.u32 %v351_v28, %v348_v27  ;;  %v374_v42 = vshrl.u32 %v314_v38, 16  ;;  %v377_v43 = vshll.u32 %v314_v38, 16  ;;  %v3360_v45 = vld [vmem:[%s5169_s0 + $0x10c] sm:$0xf0]  ;;  %v388_v46 = vshrl.u32 %v316_v39, 16 }
   0xb   :  { %3404 = vmatpush.bf16.msra.mxu3 %v620_v15  ;;  %v366_v34 = vor.u32 %v365_v30, %v362_v29  ;;  %v391_v47 = vshll.u32 %v316_v39, 16  ;;  %v315_v49 = vld [vmem:[%s5169_s0 + $0x14] sm:$0x1]  ;;  %v317_v50 = vld [vmem:[%s5169_s0 + $0x1c] sm:$0x1]  ;;  %v2925_v61 = vor.u32 %v3360_v45, %v2924_v41 }
   0xc   :  { %v353_v40 = vrot.slane %v352_v31, 4  ;;  %v376_v51 = vrot.slane %v374_v42, 4  ;;  %v379_v52 = vrot.slane %v377_v43, 5  ;;  %v2940_v55 = vld [vmem:[%s5169_s0 + $0x10] sm:$0xf]  ;;  %v390_v57 = vrot.slane %v388_v46, 4 }
   0xd   :  { %v367_v44 = vrot.slane %v366_v34, 4  ;;  %v3346_v56 = vld [vmem:[%s5169_s0 + $0x14] sm:$0xf0]  ;;  %v393_v58 = vrot.slane %v391_v47, 5  ;;  %v383_v63 = vshll.u32 %v315_v49, 16  ;;  %v397_v1 = vshll.u32 %v317_v50, 16 }
   0xe   :  { %v358_v48 = vsel %vm3562_vm4, %v353_v40, %v357_v32  ;;  %v380_v62 = vor.u32 %v379_v52, %v376_v51  ;;  %v2941_v3 = vor.u32 %v3346_v56, %v2940_v55  ;;  %v318_v8 = vld [vmem:[%s5169_s0 + $0x20] sm:$0xf]  ;;  %v320_v9 = vld [vmem:[%s5169_s0 + $0x28] sm:$0xf]  ;;  %v2904_v18 = vld [vmem:[%s5169_s0 + $0xb0] sm:$0xf] }
   0xf   :  { %v372_v53 = vsel %vm3562_vm4, %v367_v44, %v371_v35  ;;  %v571_v54 = vunpack.c.l.b16 %v358_v48  ;;  %v394_v0 = vor.u32 %v393_v58, %v390_v57  ;;  %v385_v5 = vrot.slane %v383_v63, 5  ;;  %v3355_v19 = vld [vmem:[%s5169_s0 + $0xb4] sm:$0xf0]  ;;  %v2960_v20 = vld [vmem:[%s5169_s0 + $0x68] sm:$0xf] }
  0x10   :  { %v572_v59 = vunpack.c.l.b16 %v372_v53  ;;  %v381_v4 = vrot.slane %v380_v62, 4  ;;  %v399_v7 = vrot.slane %v397_v1, 5  ;;  %v402_v10 = vshrl.u32 %v318_v8, 16  ;;  %v319_v23 = vld [vmem:[%s5169_s0 + $0x24] sm:$0x1] }
  0x11   :  { %v395_v6 = vrot.slane %v394_v0, 4  ;;  %v405_v11 = vshll.u32 %v318_v8, 16  ;;  %v416_v14 = vshrl.u32 %v320_v9, 16  ;;  %v419_v15 = vshll.u32 %v320_v9, 16  ;;  %v3351_v26 = vld [vmem:[%s5169_s0 + $0x6c] sm:$0xf0] }
  0x12   :  { %v587_v2 = vpack.c.b16 %v572_v59, %v571_v54  ;;  %v386_v12 = vsel %vm3562_vm4, %v381_v4, %v385_v5  ;;  %v404_v21 = vrot.slane %v402_v10, 4  ;;  %v321_v27 = vld [vmem:[%s5169_s0 + $0x2c] sm:$0x1] }
  0x13   :  { %v400_v13 = vsel %vm3562_vm4, %v395_v6, %v399_v7  ;;  %v573_v16 = vunpack.c.l.b16 %v386_v12  ;;  %v407_v22 = vrot.slane %v405_v11, 5  ;;  %v418_v24 = vrot.slane %v416_v14, 4 }
  0x14   :  { %2975 = vmatmul.msk.bf16.vlgmr.msra.gmra.mxu2 %vm116_vm1, %v587_v2  ;;  %v574_v17 = vunpack.c.l.b16 %v400_v13  ;;  %v421_v25 = vrot.slane %v419_v15, 5 }
  0x16   :  { %2927 = vmatmul.msk.bf16.gmra.mxu0 %vm116_vm1, %v2901_v60  ;;  %2933 = vmatmul.msk.bf16.gmra.mxu3 %vm116_vm1, %v2925_v61 }
  0x17   :  { %2967 = vmatmul.msk.bf16.gmra.mxu1 %vm116_vm1, %v2941_v3 }
  0x18   :  { %16 = vsyncpa [#allocation3], 0  ;;  %v2944_v28 = vld [vmem:[%s5169_s0 + $0x20] sm:$0xf]  ;;  %v3347_v29 = vld [vmem:[%s5169_s0 + $0x24] sm:$0xf0]  ;;  %v588_v30 = vpack.c.b16 %v574_v17, %v573_v16  ;;  %v408_v31 = vor.u32 %v407_v22, %v404_v21  ;;  %v2905_v34 = vor.u32 %v3355_v19, %v2904_v18  ;;  %v2961_v35 = vor.u32 %v3351_v26, %v2960_v20 }
  0x19   :  { %v411_v32 = vshll.u32 %v319_v23, 16  ;;  %v422_v36 = vor.u32 %v421_v25, %v418_v24  ;;  %v425_v37 = vshll.u32 %v321_v27, 16  ;;  %v2945_v38 = vor.u32 %v3347_v29, %v2944_v28  ;;  %v322_v43 = vld [vmem:[%s5169_s0 + $0x30] sm:$0xf]  ;;  %v324_v44 = vld [vmem:[%s5169_s0 + $0x38] sm:$0xf] }
  0x1a   :  { %v409_v39 = vrot.slane %v408_v31, 4  ;;  %v334_v45 = vld [vmem:[%s5169_s0 + $0x68] sm:$0xf]  ;;  %v2999_v46 = vld [vmem:[%s5171_s2 + $0xc] sm:$0xf]  ;;  %v430_v50 = vshrl.u32 %v322_v43, 16 }
  0x1b   :  { %v413_v40 = vrot.slane %v411_v32, 5  ;;  %v423_v41 = vrot.slane %v422_v36, 4  ;;  %v427_v42 = vrot.slane %v425_v37, 5  ;;  %v336_v47 = vld [vmem:[%s5169_s0 + $0x70] sm:$0xf]  ;;  %v771_v48 = vsel %vm141_vm0, %v2999_v46, 0 }
  0x1c   :  { %v433_v51 = vshll.u32 %v322_v43, 16  ;;  %v444_v52 = vshrl.u32 %v324_v44, 16  ;;  %v447_v54 = vshll.u32 %v324_v44, 16  ;;  %v514_v55 = vshrl.u32 %v334_v45, 16  ;;  %v2908_v59 = vld [vmem:[%s5169_s0 + $0xc0] sm:$0xf] }
  0x1d   :  { %v414_v49 = vsel %vm3562_vm4, %v409_v39, %v413_v40  ;;  %v428_v53 = vsel %vm3562_vm4, %v423_v41, %v427_v42  ;;  %v517_v56 = vshll.u32 %v334_v45, 16  ;;  %v528_v57 = vshrl.u32 %v336_v47, 16  ;;  %v3356_v60 = vld [vmem:[%s5169_s0 + $0xc4] sm:$0xf0]  ;;  %v2964_v61 = vld [vmem:[%s5169_s0 + $0x78] sm:$0xf] }
  0x1e   :  { %v531_v58 = vshll.u32 %v336_v47, 16  ;;  %v575_v62 = vunpack.c.l.b16 %v414_v49  ;;  %v576_v63 = vunpack.c.l.b16 %v428_v53  ;;  %v3352_v0 = vld [vmem:[%s5169_s0 + $0x7c] sm:$0xf0]  ;;  %v323_v1 = vld [vmem:[%s5169_s0 + $0x34] sm:$0x1]  ;;  %v432_v2 = vrot.slane %v430_v50, 4 }
  0x1f   :  { %v435_v3 = vrot.slane %v433_v51, 5  ;;  %v325_v4 = vld [vmem:[%s5169_s0 + $0x3c] sm:$0x1]  ;;  %v446_v5 = vrot.slane %v444_v52, 4  ;;  %v449_v6 = vrot.slane %v447_v54, 5  ;;  %v516_v7 = vrot.slane %v514_v55, 4 }
  0x20   :  { %v519_v8 = vrot.slane %v517_v56, 5  ;;  %v335_v9 = vld [vmem:[%s5169_s0 + $0x6c] sm:$0x1]  ;;  %v530_v10 = vrot.slane %v528_v57, 4  ;;  %v533_v11 = vrot.slane %v531_v58, 5  ;;  %v2909_v12 = vor.u32 %v3356_v60, %v2908_v59  ;;  %s2865_s29 = sshll.u32 %s5180_s11, 4  ;;  %s2866_s29 = int_to_ptr.hbm [resolvable:$true] %s2865_s29 }
  0x21   :  { %v2948_v13 = vld [vmem:[%s5169_s0 + $0x30] sm:$0xf]  ;;  %v3348_v14 = vld [vmem:[%s5169_s0 + $0x34] sm:$0xf0]  ;;  %v337_v15 = vld [vmem:[%s5169_s0 + $0x74] sm:$0x1]  ;;  %v589_v16 = vpack.c.b16 %v576_v63, %v575_v62  ;;  %v2965_v17 = vor.u32 %v3352_v0, %v2964_v61  ;;  %v436_v20 = vor.u32 %v435_v3, %v432_v2  ;;  %v450_v21 = vor.u32 %v449_v6, %v446_v5 }
  0x22   :  { %v439_v18 = vshll.u32 %v323_v1, 16  ;;  %v453_v19 = vshll.u32 %v325_v4, 16  ;;  %v520_v22 = vor.u32 %v519_v8, %v516_v7  ;;  %v523_v23 = vshll.u32 %v335_v9, 16  ;;  %v326_v27 = vld [vmem:[%s5169_s0 + $0x48] sm:$0xf]  ;;  %s3451_s30 = smov 128  }
  0x23   :  { %v2949_v24 = vor.u32 %v3348_v14, %v2948_v13  ;;  %v534_v25 = vor.u32 %v533_v11, %v530_v10  ;;  %v537_v26 = vshll.u32 %v337_v15, 16  ;;  %v437_v31 = vrot.slane %v436_v20, 4  ;;  %v338_v36 = vld [vmem:[%s5169_s0 + $0x78] sm:$0xf]  ;;  %v340_v41 = vld [vmem:[%s5169_s0 + $0x80] sm:$0xf] }
  0x24   :  { %2976 = vmatmul.msk.bf16.gmra.mxu2 %vm116_vm1, %v588_v30  ;;  %v441_v28 = vrot.slane %v439_v18, 5  ;;  %v455_v29 = vrot.slane %v453_v19, 5  ;;  %v328_v30 = vld [vmem:[%s5169_s0 + $0x50] sm:$0xf]  ;;  %v451_v32 = vrot.slane %v450_v21, 4  ;;  %v458_v39 = vshrl.u32 %v326_v27, 16 }
  0x25   :  { %v535_v37 = vrot.slane %v534_v25, 4  ;;  %v461_v40 = vshll.u32 %v326_v27, 16  ;;  %v472_v42 = vshrl.u32 %v328_v30, 16  ;;  %v475_v43 = vshll.u32 %v328_v30, 16  ;;  %v327_v54 = vld [vmem:[%s5169_s0 + $0x4c] sm:$0x1] }
  0x26   :  { %2928 = vmatmul.msk.bf16.gmra.mxu0 %vm116_vm1, %v2905_v34  ;;  %2972 = vmatmul.msk.bf16.vlgmr.msrb.gmra.mxu3 %vm116_vm1, %v2961_v35  ;;  %v521_v34 = vrot.slane %v520_v22, 4  ;;  %v525_v35 = vrot.slane %v523_v23, 5  ;;  %v542_v44 = vshrl.u32 %v338_v36, 16  ;;  %v545_v45 = vshll.u32 %v338_v36, 16  ;;  %v329_v59 = vld [vmem:[%s5169_s0 + $0x54] sm:$0x1] }
  0x27   :  { %2968 = vmatmul.msk.bf16.gmra.mxu1 %vm116_vm1, %v2945_v38  ;;  %780 = vmatpush.bf16.msrb.mxu3 %v771_v48  ;;  %v539_v38 = vrot.slane %v537_v26, 5  ;;  %v442_v46 = vsel %vm3562_vm4, %v437_v31, %v441_v28  ;;  %v456_v47 = vsel %vm3562_vm4, %v451_v32, %v455_v29  ;;  %v556_v48 = vshrl.u32 %v340_v41, 16  ;;  %v2912_v62 = vld [vmem:[%s5169_s0 + $0xd8] sm:$0xf]  ;;  %v3357_v63 = vld [vmem:[%s5169_s0 + $0xdc] sm:$0xf0] }
  0x28   :  { %v559_v49 = vshll.u32 %v340_v41, 16  ;;  %v526_v50 = vsel %vm3562_vm4, %v521_v34, %v525_v35  ;;  %v460_v52 = vrot.slane %v458_v39, 4  ;;  %v463_v53 = vrot.slane %v461_v40, 5  ;;  %v2952_v4 = vld [vmem:[%s5169_s0 + $0x48] sm:$0xf]  ;;  %s3452_s12 = smov 8  }
  0x29   :  { %v540_v51 = vsel %vm3562_vm4, %v535_v37, %v539_v38  ;;  %v474_v55 = vrot.slane %v472_v42, 4  ;;  %v477_v56 = vrot.slane %v475_v43, 5  ;;  %v577_v57 = vunpack.c.l.b16 %v442_v46  ;;  %v339_v7 = vld [vmem:[%s5169_s0 + $0x7c] sm:$0x1]  ;;  %v3349_v8 = vld [vmem:[%s5169_s0 + $0x4c] sm:$0xf0] }
  0x2a   :  { %v578_v58 = vunpack.c.l.b16 %v456_v47  ;;  %v544_v60 = vrot.slane %v542_v44, 4  ;;  %v547_v61 = vrot.slane %v545_v45, 5  ;;  %v583_v0 = vunpack.c.l.b16 %v526_v50  ;;  %v341_v11 = vld [vmem:[%s5169_s0 + $0x84] sm:$0x1]  ;;  %v330_v25 = vld [vmem:[%s5169_s0 + $0x58] sm:$0xf] }
  0x2b   :  { %v584_v1 = vunpack.c.l.b16 %v540_v51  ;;  %v558_v2 = vrot.slane %v556_v48, 4  ;;  %v561_v3 = vrot.slane %v559_v49, 5  ;;  %v464_v5 = vor.u32 %v463_v53, %v460_v52  ;;  %v332_v28 = vld [vmem:[%s5169_s0 + $0x60] sm:$0xf]  ;;  %v3211_v29 = vld [vmem:[%s5171_s2 + $0x1c] sm:$0xf] }
  0x2c   :  { %v467_v6 = vshll.u32 %v327_v54, 16  ;;  %v478_v9 = vor.u32 %v477_v56, %v474_v55  ;;  %v481_v10 = vshll.u32 %v329_v59, 16  ;;  %v548_v13 = vor.u32 %v547_v61, %v544_v60  ;;  %v3154_v34 = vld [vmem:[%s5171_s2 + $0x18] sm:$0xf]  ;;  %v3129_v35 = vld [vmem:[%s5171_s2 + $0x14] sm:$0xf] }
  0x2d   :  { %v2913_v14 = vor.u32 %v3357_v63, %v2912_v62  ;;  %v593_v15 = vpack.c.b16 %v584_v1, %v583_v0  ;;  %v2953_v18 = vor.u32 %v3349_v8, %v2952_v4  ;;  %v465_v19 = vrot.slane %v464_v5, 4  ;;  %v3284_v40 = vld [vmem:[%s5171_s2 + $0x20] sm:$0xf]  ;;  %v3099_v46 = vld [vmem:[%s5169_s0 + $0x128] sm:$0xf] }
  0x2e   :  { %v469_v20 = vrot.slane %v467_v6, 5  ;;  %v565_v21 = vshll.u32 %v341_v11, 16  ;;  %v479_v22 = vrot.slane %v478_v9, 4  ;;  %v483_v23 = vrot.slane %v481_v10, 5  ;;  %v3097_v45 = vld [vmem:[%s5169_s0 + $0x120] sm:$0xf] }
  0x2f   :  { %v1598_v32 = vsel %vm141_vm0, %v3211_v29, 0  ;;  %v486_v37 = vshrl.u32 %v330_v25, 16  ;;  %v1447_v38 = vsel %vm141_vm0, %v3154_v34, 0  ;;  %v1296_v39 = vsel %vm141_vm0, %v3129_v35, 0  ;;  %v2916_v55 = vld [vmem:[%s5169_s0 + $0xe8] sm:$0xf] }
  0x30   :  { %v470_v30 = vsel %vm3562_vm4, %v465_v19, %v469_v20  ;;  %v567_v31 = vrot.slane %v565_v21, 5  ;;  %v484_v36 = vsel %vm3562_vm4, %v479_v22, %v483_v23  ;;  %v489_v41 = vshll.u32 %v330_v25, 16  ;;  %1456 = vmatpush.bf16.msrb.mxu2 %v1447_v38  ;;  %1305 = vmatpush.bf16.msrb.mxu1 %v1296_v39  ;;  %v3358_v60 = vld [vmem:[%s5169_s0 + $0xec] sm:$0xf0]  ;;  %v331_v63 = vld [vmem:[%s5169_s0 + $0x5c] sm:$0x1] }
  0x31   :  { %v500_v42 = vshrl.u32 %v332_v28, 16  ;;  %v503_v43 = vshll.u32 %v332_v28, 16  ;;  %v1972_v44 = vsel %vm141_vm0, %v3284_v40, 0  ;;  %v579_v47 = vunpack.c.l.b16 %v470_v30  ;;  %v333_v0 = vld [vmem:[%s5169_s0 + $0x64] sm:$0x1] }
  0x32   :  { %1981 = vmatpush.bf16.msra.mxu0 %v1972_v44  ;;  %v580_v48 = vunpack.c.l.b16 %v484_v36  ;;  %v1022_v51 = vshrl.u32 %v3097_v45, 16  ;;  %v1025_v52 = vshll.u32 %v3097_v45, 16  ;;  %v1036_v53 = vshrl.u32 %v3099_v46, 16  ;;  %v3098_v4 = vld [vmem:[%s5169_s0 + $0x124] sm:$0x1] }
  0x33   :  { %v1039_v54 = vshll.u32 %v3099_v46, 16  ;;  %v488_v56 = vrot.slane %v486_v37, 4  ;;  %v505_v59 = vrot.slane %v503_v43, 5  ;;  %v3100_v5 = vld [vmem:[%s5169_s0 + $0x12c] sm:$0x1]  ;;  %v495_v11 = vshll.u32 %v331_v63, 16 }
  0x34   :  { %2977 = vmatmul.msk.bf16.gmra.mxu2 %vm116_vm1, %v589_v16  ;;  %v551_v16 = vshll.u32 %v339_v7, 16  ;;  %v591_v1 = vpack.c.b16 %v580_v48, %v579_v47  ;;  %v1024_v6 = vrot.slane %v1022_v51, 4  ;;  %v1027_v7 = vrot.slane %v1025_v52, 5  ;;  %v3101_v29 = vld [vmem:[%s5169_s0 + $0x130] sm:$0xf] }
  0x35   :  { %v1038_v8 = vrot.slane %v1036_v53, 4  ;;  %v1041_v9 = vrot.slane %v1039_v54, 5  ;;  %v497_v22 = vrot.slane %v495_v11, 5  ;;  %v3103_v30 = vld [vmem:[%s5169_s0 + $0x138] sm:$0xf]  ;;  %v1050_v34 = vshrl.u32 %v3101_v29, 16 }
  0x36   :  { %2929 = vmatmul.msk.bf16.gmra.mxu0 %vm116_vm1, %v2909_v12  ;;  %2973 = vmatmul.msk.bf16.gmra.mxu3 %vm116_vm1, %v2965_v17  ;;  %v590_v12 = vpack.c.b16 %v578_v58, %v577_v57  ;;  %v562_v17 = vor.u32 %v561_v3, %v558_v2  ;;  %v553_v26 = vrot.slane %v551_v16, 5  ;;  %v491_v57 = vrot.slane %v489_v41, 5  ;;  %v2956_v2 = vld [vmem:[%s5169_s0 + $0x58] sm:$0xf]  ;;  %v3350_v3 = vld [vmem:[%s5169_s0 + $0x5c] sm:$0xf0] }
  0x37   :  { %2969 = vmatmul.msk.bf16.gmra.mxu1 %vm116_vm1, %v2949_v24  ;;  %v549_v24 = vrot.slane %v548_v13, 4  ;;  %v502_v58 = vrot.slane %v500_v42, 4  ;;  %v509_v13 = vshll.u32 %v333_v0, 16  ;;  %v2957_v16 = vor.u32 %v3350_v3, %v2956_v2  ;;  %v3002_v42 = vld [vmem:[%s5169_s0 + $0x120] sm:$0xf] }
  0x38   :  { %v563_v27 = vrot.slane %v562_v17, 4  ;;  %v492_v10 = vor.u32 %v491_v57, %v488_v56  ;;  %v1031_v17 = vshll.u32 %v3098_v4, 16  ;;  %v1028_v19 = vor.u32 %v1027_v7, %v1024_v6  ;;  %v3361_v43 = vld [vmem:[%s5169_s0 + $0x124] sm:$0xf0]  ;;  %v3059_v44 = vld [vmem:[%s5169_s0 + $0x1b0] sm:$0xf] }
  0x39   :  { %v554_v49 = vsel %vm3562_vm4, %v549_v24, %v553_v26  ;;  %v1042_v20 = vor.u32 %v1041_v9, %v1038_v8  ;;  %v511_v24 = vrot.slane %v509_v13, 5  ;;  %v1053_v35 = vshll.u32 %v3101_v29, 16  ;;  %v3369_v45 = vld [vmem:[%s5169_s0 + $0x1b4] sm:$0xf0]  ;;  %v3102_v52 = vld [vmem:[%s5169_s0 + $0x134] sm:$0x1] }
  0x3a   :  { %v568_v50 = vsel %vm3562_vm4, %v563_v27, %v567_v31  ;;  %v585_v61 = vunpack.c.l.b16 %v554_v49  ;;  %v493_v21 = vrot.slane %v492_v10, 4  ;;  %v1033_v25 = vrot.slane %v1031_v17, 5  ;;  %v3104_v53 = vld [vmem:[%s5169_s0 + $0x13c] sm:$0x1]  ;;  %v3105_v2 = vld [vmem:[%s5169_s0 + $0x140] sm:$0xf] }
  0x3b   :  { %v586_v62 = vunpack.c.l.b16 %v568_v50  ;;  %v1029_v27 = vrot.slane %v1028_v19, 4  ;;  %v1043_v28 = vrot.slane %v1042_v20, 4  ;;  %v1064_v36 = vshrl.u32 %v3103_v30, 16  ;;  %v3107_v3 = vld [vmem:[%s5169_s0 + $0x148] sm:$0xf] }
  0x3c   :  { %v498_v31 = vsel %vm3562_vm4, %v493_v21, %v497_v22  ;;  %v1067_v37 = vshll.u32 %v3103_v30, 16  ;;  %v1052_v46 = vrot.slane %v1050_v34, 4  ;;  %v1055_v47 = vrot.slane %v1053_v35, 5  ;;  %v3157_v10 = vld [vmem:[%s5169_s0 + $0x8] sm:$0xf] }
  0x3d   :  { %v1034_v38 = vsel %vm3562_vm4, %v1029_v27, %v1033_v25  ;;  %v581_v40 = vunpack.c.l.b16 %v498_v31  ;;  %v1066_v48 = vrot.slane %v1064_v36, 4  ;;  %v3060_v56 = vor.u32 %v3369_v45, %v3059_v44  ;;  %v3377_v11 = vld [vmem:[%s5169_s0 + $0xc] sm:$0xf0]  ;;  %v3362_v13 = vld [vmem:[%s5169_s0 + $0x134] sm:$0xf0] }
  0x3e   :  { %v1069_v49 = vrot.slane %v1067_v37, 5  ;;  %v1247_v50 = vunpack.c.l.b16 %v1034_v38  ;;  %v1056_v57 = vor.u32 %v1055_v47, %v1052_v46  ;;  %v1078_v6 = vshrl.u32 %v3105_v2, 16  ;;  %v3370_v17 = vld [vmem:[%s5169_s0 + $0x1c4] sm:$0xf0]  ;;  %v3106_v22 = vld [vmem:[%s5169_s0 + $0x144] sm:$0x1] }
  0x3f   :  { %v1081_v7 = vshll.u32 %v3105_v2, 16  ;;  %v1092_v8 = vshrl.u32 %v3107_v3, 16  ;;  %v1095_v9 = vshll.u32 %v3107_v3, 16  ;;  %v1087_v29 = vshll.u32 %v3106_v22, 16  ;;  %v3109_v37 = vld [vmem:[%s5169_s0 + $0x150] sm:$0xf] }
  0x40   :  { %v3111_v38 = vld [vmem:[%s5169_s0 + $0x158] sm:$0xf]  ;;  %v3378_v46 = vld [vmem:[%s5169_s0 + $0x1c] sm:$0xf0]  ;;  %v3165_v22 = vld [vmem:[%s5169_s0 + $0x28] sm:$0xf] }
  0x41   :  { %v1083_v19 = vrot.slane %v1081_v7, 5  ;;  %v1094_v20 = vrot.slane %v1092_v8, 4  ;;  %v1097_v21 = vrot.slane %v1095_v9, 5  ;;  %v1089_v34 = vrot.slane %v1087_v29, 5  ;;  %v3161_v45 = vld [vmem:[%s5169_s0 + $0x18] sm:$0xf] }
  0x42   :  { %v1123_v44 = vshll.u32 %v3111_v38, 16  ;;  %v3010_v47 = vld [vmem:[%s5169_s0 + $0x140] sm:$0xf]  ;;  %vm2562_vm5 = vcmask 130048   ;;  %vm2324_vm7 = vcmask 523264  }
  0x43   :  { %v1098_v30 = vor.u32 %v1097_v21, %v1094_v20 }
  0x44   :  { %2978 = vmatmul.msk.bf16.gmra.mxu2 %vm116_vm1, %v590_v12  ;;  %v506_v12 = vor.u32 %v505_v59, %v502_v58  ;;  %v1059_v58 = vshll.u32 %v3102_v52, 16  ;;  %v1070_v59 = vor.u32 %v1069_v49, %v1066_v48  ;;  %v3363_v48 = vld [vmem:[%s5169_s0 + $0x144] sm:$0xf0]  ;;  %v3067_v49 = vld [vmem:[%s5169_s0 + $0x1d0] sm:$0xf] }
  0x45   :  { %v1099_v35 = vrot.slane %v1098_v30, 4 }
  0x46   :  { %2930 = vmatmul.msk.bf16.gmra.mxu0 %vm116_vm1, %v2913_v14  ;;  %2981 = vmatmul.msk.bf16.vlgmr.msra.gmra.mxu3 %vm116_vm1, %v593_v15  ;;  %v2917_v14 = vor.u32 %v3358_v60, %v2916_v55  ;;  %v594_v15 = vpack.c.b16 %v586_v62, %v585_v61  ;;  %v507_v23 = vrot.slane %v506_v12, 4  ;;  %v3003_v55 = vor.u32 %v3361_v43, %v3002_v42  ;;  %v3006_v12 = vld [vmem:[%s5169_s0 + $0x130] sm:$0xf] }
  0x47   :  { %2970 = vmatmul.msk.bf16.gmra.mxu1 %vm116_vm1, %v2953_v18  ;;  %1607 = vmatpush.bf16.msra.mxu3 %v1598_v32  ;;  %v1045_v18 = vshll.u32 %v3100_v5, 16  ;;  %v1073_v60 = vshll.u32 %v3104_v53, 16  ;;  %v1057_v62 = vrot.slane %v1056_v57, 4  ;;  %v1061_v63 = vrot.slane %v1059_v58, 5  ;;  %v3110_v58 = vld [vmem:[%s5169_s0 + $0x154] sm:$0x1] }
  0x48   :  { %v512_v32 = vsel %vm3562_vm4, %v507_v23, %v511_v24  ;;  %v1071_v0 = vrot.slane %v1070_v59, 4  ;;  %v3108_v23 = vld [vmem:[%s5169_s0 + $0x14c] sm:$0x1]  ;;  %v3158_v24 = vor.u32 %v3377_v11, %v3157_v10  ;;  %v3007_v25 = vor.u32 %v3362_v13, %v3006_v12  ;;  %v3112_v59 = vld [vmem:[%s5169_s0 + $0x15c] sm:$0x1] }
  0x49   :  { %v1047_v26 = vrot.slane %v1045_v18, 5  ;;  %v582_v41 = vunpack.c.l.b16 %v512_v32  ;;  %v1062_v4 = vsel %vm3562_vm4, %v1057_v62, %v1061_v63  ;;  %v1080_v18 = vrot.slane %v1078_v6, 4  ;;  %v3113_v10 = vld [vmem:[%s5169_s0 + $0x168] sm:$0xf]  ;;  %v3115_v12 = vld [vmem:[%s5169_s0 + $0x170] sm:$0xf] }
  0x4a   :  { %v1101_v31 = vshll.u32 %v3108_v23, 16  ;;  %v1109_v42 = vshll.u32 %v3109_v37, 16  ;;  %v1120_v43 = vshrl.u32 %v3111_v38, 16  ;;  %v3162_v57 = vor.u32 %v3378_v46, %v3161_v45  ;;  %v3379_v23 = vld [vmem:[%s5169_s0 + $0x2c] sm:$0xf0] }
  0x4b   :  { %v1048_v39 = vsel %vm3562_vm4, %v1043_v28, %v1047_v26  ;;  %v592_v54 = vpack.c.b16 %v582_v41, %v581_v40  ;;  %v1084_v28 = vor.u32 %v1083_v19, %v1080_v18  ;;  %v1106_v41 = vshrl.u32 %v3109_v37, 16  ;;  %v3116_v38 = vld [vmem:[%s5169_s0 + $0x174] sm:$0x1] }
  0x4c   :  { %v1248_v51 = vunpack.c.l.b16 %v1048_v39  ;;  %v1103_v36 = vrot.slane %v1101_v31, 5  ;;  %v1115_v2 = vshll.u32 %v3110_v58, 16  ;;  %v1148_v19 = vshrl.u32 %v3115_v12, 16 }
  0x4d   :  { %v1085_v32 = vrot.slane %v1084_v28, 4  ;;  %v1108_v53 = vrot.slane %v1106_v41, 4  ;;  %v1151_v20 = vshll.u32 %v3115_v12, 16 }
  0x4e   :  { %v1263_v61 = vpack.c.b16 %v1248_v51, %v1247_v50  ;;  %v1104_v40 = vsel %vm3562_vm4, %v1099_v35, %v1103_v36  ;;  %v3371_v50 = vld [vmem:[%s5169_s0 + $0x1d4] sm:$0xf0]  ;;  %v1117_v7 = vrot.slane %v1115_v2, 5  ;;  %v3166_v36 = vor.u32 %v3379_v23, %v3165_v22 }
  0x4f   :  { %v1090_v39 = vsel %vm3562_vm4, %v1085_v32, %v1089_v34  ;;  %v1252_v52 = vunpack.c.l.b16 %v1104_v40  ;;  %v3114_v32 = vld [vmem:[%s5169_s0 + $0x16c] sm:$0x1]  ;;  %v1150_v34 = vrot.slane %v1148_v19, 4  ;;  %v1153_v35 = vrot.slane %v1151_v20, 5 }
  0x50   :  { %v1251_v51 = vunpack.c.l.b16 %v1090_v39 }
  0x51   :  { %v1154_v46 = vor.u32 %v1153_v35, %v1150_v34 }
  0x52   :  { %v1265_v63 = vpack.c.b16 %v1252_v52, %v1251_v51 }
  0x53   :  { %v1155_v52 = vrot.slane %v1154_v46, 4 }
  0x54   :  { %2979 = vmatmul.msk.bf16.gmra.mxu2 %vm116_vm1, %v591_v1  ;;  %v1075_v1 = vrot.slane %v1073_v60, 5  ;;  %v3011_v60 = vor.u32 %v3363_v48, %v3010_v47  ;;  %v1157_v47 = vshll.u32 %v3116_v38, 16 }
  0x56   :  { %2931 = vmatmul.msk.bf16.gmra.mxu0 %vm116_vm1, %v2917_v14  ;;  %2982 = vmatmul.msk.bf16.gmra.mxu3 %vm116_vm1, %v594_v15  ;;  %v1076_v5 = vsel %vm3562_vm4, %v1071_v0, %v1075_v1  ;;  %v3063_v14 = vld [vmem:[%s5169_s0 + $0x1c0] sm:$0xf]  ;;  %v1249_v15 = vunpack.c.l.b16 %v1062_v4  ;;  %v1129_v4 = vshll.u32 %v3112_v59, 16 }
  0x57   :  { %2971 = vmatmul.msk.bf16.gmra.mxu1 %vm116_vm1, %v2957_v16  ;;  %v1250_v16 = vunpack.c.l.b16 %v1076_v5  ;;  %v3064_v26 = vor.u32 %v3370_v17, %v3063_v14  ;;  %v1134_v14 = vshrl.u32 %v3113_v10, 16 }
  0x58   :  { %v1131_v9 = vrot.slane %v1129_v4, 5 }
  0x59   :  { %v1264_v27 = vpack.c.b16 %v1250_v16, %v1249_v15  ;;  %v1137_v15 = vshll.u32 %v3113_v10, 16  ;;  %v1136_v30 = vrot.slane %v1134_v14, 4 }
  0x5b   :  { %v1139_v31 = vrot.slane %v1137_v15, 5 }
  0x64   :  { %2980 = vmatmul.msk.bf16.gmra.mxu2 %vm116_vm1, %v592_v54  ;;  %v1111_v54 = vrot.slane %v1109_v42, 5 }
  0x66   :  { %3032 = vmatmul.msk.bf16.vlgmr.msrb.gmra.mxu3 %vm116_vm1, %v3003_v55  ;;  %3089 = vmatmul.msk.bf16.vlgmr.msrb.gmra.mxu0 %vm116_vm1, %v3060_v56  ;;  %v1122_v55 = vrot.slane %v1120_v43, 4  ;;  %v1125_v56 = vrot.slane %v1123_v44, 5  ;;  %v1112_v1 = vor.u32 %v1111_v54, %v1108_v53  ;;  %v1140_v43 = vor.u32 %v1139_v31, %v1136_v30  ;;  %v3117_v54 = vld [vmem:[%s5169_s0 + $0x178] sm:$0xf] }
  0x67   :  { %3130 = vmatmul.msk.bf16.vlgmr.msrb.gmra.mxu1 %vm116_vm1, %v1263_v61  ;;  %v3068_v61 = vor.u32 %v3371_v50, %v3067_v49  ;;  %v1143_v44 = vshll.u32 %v3114_v32, 16  ;;  %v1159_v53 = vrot.slane %v1157_v47, 5  ;;  %v1162_v58 = vshrl.u32 %v3117_v54, 16 }
  0x68   :  { %v1126_v3 = vor.u32 %v1125_v56, %v1122_v55  ;;  %v1113_v6 = vrot.slane %v1112_v1, 4  ;;  %v1141_v49 = vrot.slane %v1140_v43, 4  ;;  %v3119_v55 = vld [vmem:[%s5169_s0 + $0x180] sm:$0xf]  ;;  %v1165_v59 = vshll.u32 %v3117_v54, 16 }
  0x69   :  { %v1145_v50 = vrot.slane %v1143_v44, 5  ;;  %v3380_v1 = vld [vmem:[%s5169_s0 + $0x3c] sm:$0xf0] }
  0x6a   :  { %v1127_v8 = vrot.slane %v1126_v3, 4  ;;  %v1118_v17 = vsel %vm3562_vm4, %v1113_v6, %v1117_v7  ;;  %v1160_v3 = vsel %vm3562_vm4, %v1155_v52, %v1159_v53  ;;  %v3365_v6 = vld [vmem:[%s5169_s0 + $0x16c] sm:$0xf0]  ;;  %v3075_v7 = vld [vmem:[%s5169_s0 + $0x1f8] sm:$0xf]  ;;  %v1167_v10 = vrot.slane %v1165_v59, 5 }
  0x6b   :  { %v1253_v28 = vunpack.c.l.b16 %v1118_v17  ;;  %v1146_v2 = vsel %vm3562_vm4, %v1141_v49, %v1145_v50  ;;  %v1256_v15 = vunpack.c.l.b16 %v1160_v3  ;;  %v3120_v17 = vld [vmem:[%s5169_s0 + $0x184] sm:$0x1]  ;;  %v3022_v53 = vld [vmem:[%s5169_s0 + $0x178] sm:$0xf]  ;;  %v3366_v54 = vld [vmem:[%s5169_s0 + $0x17c] sm:$0xf0] }
  0x6c   :  { %v1132_v18 = vsel %vm3562_vm4, %v1127_v8, %v1131_v9  ;;  %v3373_v8 = vld [vmem:[%s5169_s0 + $0x1fc] sm:$0xf0]  ;;  %v1164_v9 = vrot.slane %v1162_v58, 4  ;;  %v1255_v14 = vunpack.c.l.b16 %v1146_v2  ;;  %v3122_v2 = vld [vmem:[%s5169_s0 + $0x18c] sm:$0x1] }
  0x6d   :  { %v1254_v29 = vunpack.c.l.b16 %v1132_v18  ;;  %v3124_v3 = vld [vmem:[%s5169_s0 + $0x194] sm:$0x1] }
  0x6e   :  { %v1267_v30 = vpack.c.b16 %v1256_v15, %v1255_v14  ;;  %v1199_v15 = vshll.u32 %v3122_v2, 16 }
  0x6f   :  { %v1266_v42 = vpack.c.b16 %v1254_v29, %v1253_v28  ;;  %v1185_v28 = vshll.u32 %v3120_v17, 16  ;;  %v1213_v17 = vshll.u32 %v3124_v3, 16 }
  0x74   :  { %3187 = vmatmul.msk.bf16.vlgmr.msrb.gmra.mxu2 %vm116_vm1, %v3158_v24  ;;  %v3014_v24 = vld [vmem:[%s5169_s0 + $0x150] sm:$0xf] }
  0x76   :  { %3033 = vmatmul.msk.bf16.gmra.mxu3 %vm116_vm1, %v3007_v25  ;;  %3090 = vmatmul.msk.bf16.gmra.mxu0 %vm116_vm1, %v3064_v26  ;;  %v3364_v25 = vld [vmem:[%s5169_s0 + $0x154] sm:$0xf0]  ;;  %v3071_v26 = vld [vmem:[%s5169_s0 + $0x1e0] sm:$0xf] }
  0x77   :  { %3131 = vmatmul.msk.bf16.gmra.mxu1 %vm116_vm1, %v1264_v27  ;;  %v3372_v27 = vld [vmem:[%s5169_s0 + $0x1e4] sm:$0xf0]  ;;  %v3015_v39 = vor.u32 %v3364_v25, %v3014_v24  ;;  %v3076_v24 = vor.u32 %v3373_v8, %v3075_v7  ;;  %v1168_v25 = vor.u32 %v1167_v10, %v1164_v9  ;;  %v3023_v9 = vor.u32 %v3366_v54, %v3022_v53 }
  0x78   :  { %v3072_v40 = vor.u32 %v3372_v27, %v3071_v26 }
  0x83   :  { %v154_v62 = vpop.f32.mrf.mxu0 }
  0x84   :  { %v270_v0 = vpop.f32.mrf.mxu1  ;;  %3188 = vmatmul.msk.bf16.gmra.mxu2 %vm116_vm1, %v3162_v57 }
  0x85   :  { %v271_v5 = vadd.f32 %v270_v0, %v154_v62  ;;  %v1179_v62 = vshll.u32 %v3119_v55, 16  ;;  %v3169_v0 = vld [vmem:[%s5169_s0 + $0x38] sm:$0xf] }
  0x86   :  { %3034 = vmatmul.msk.bf16.gmra.mxu3 %vm116_vm1, %v3011_v60  ;;  %3091 = vmatmul.msk.bf16.gmra.mxu0 %vm116_vm1, %v3068_v61  ;;  %v1176_v60 = vshrl.u32 %v3119_v55, 16  ;;  %v3170_v20 = vor.u32 %v3380_v1, %v3169_v0  ;;  %v3079_v55 = vld [vmem:[%s5169_s0 + $0x208] sm:$0xf] }
  0x87   :  { %3132 = vmatmul.msk.bf16.gmra.mxu1 %vm116_vm1, %v1265_v63 }
  0x88   :  { %v1178_v12 = vrot.slane %v1176_v60, 4  ;;  %v3374_v60 = vld [vmem:[%s5169_s0 + $0x20c] sm:$0xf0] }
  0x89   :  { %v3923_v11 = vpop.f32.mrf.mxu3  ;;  %v3080_v10 = vor.u32 %v3374_v60, %v3079_v55  ;;  %v3128_v60 = vld [vmem:[%s5169_s0 + $0x1a4] sm:$0x1] }
  0x8b   :  { %v156_v13 = vpop.f32.mrf.mxu0 }
  0x8c   :  { %v272_v16 = vpop.f32.mrf.mxu1 }
  0x8d   :  { %v3932_v21 = vadd.f32 %v272_v16, %v156_v13  ;;  %v1181_v13 = vrot.slane %v1179_v62, 5  ;;  %v3118_v16 = vld [vmem:[%s5169_s0 + $0x17c] sm:$0x1] }
  0x8e   :  { %v1171_v26 = vshll.u32 %v3118_v16, 16 }
  0x8f   :  { %v1182_v27 = vor.u32 %v1181_v13, %v1178_v12 }
  0x90   :  { %v1173_v34 = vrot.slane %v1171_v26, 5 }
  0x91   :  { %v3955_v37 = vpop.f32.mrf.mxu3  ;;  %v1183_v35 = vrot.slane %v1182_v27, 4 }
  0x93   :  { %v159_v41 = vpop.f32.mrf.mxu0 }
  0x94   :  { %v275_v45 = vpop.f32.mrf.mxu1  ;;  %3189 = vmatmul.msk.bf16.gmra.mxu2 %vm116_vm1, %v3166_v36  ;;  %v1187_v36 = vrot.slane %v1185_v28, 5  ;;  %v3125_v28 = vld [vmem:[%s5169_s0 + $0x198] sm:$0xf] }
  0x95   :  { %v276_v48 = vadd.f32 %v275_v45, %v159_v41 }
  0x96   :  { %3035 = vmatmul.msk.bf16.gmra.mxu3 %vm116_vm1, %v3015_v39  ;;  %3092 = vmatmul.msk.bf16.gmra.mxu0 %vm116_vm1, %v3072_v40  ;;  %v3121_v39 = vld [vmem:[%s5169_s0 + $0x188] sm:$0xf]  ;;  %v3123_v40 = vld [vmem:[%s5169_s0 + $0x190] sm:$0xf]  ;;  %v1188_v45 = vsel %vm3562_vm4, %v1183_v35, %v1187_v36  ;;  %v1218_v35 = vshrl.u32 %v3125_v28, 16  ;;  %v1221_v36 = vshll.u32 %v3125_v28, 16 }
  0x97   :  { %3133 = vmatmul.msk.bf16.gmra.mxu1 %vm116_vm1, %v1266_v42  ;;  %v631_v51 = vpop.f32.mrf.mxu2  ;;  %v1190_v47 = vshrl.u32 %v3121_v39, 16  ;;  %v1193_v49 = vshll.u32 %v3121_v39, 16  ;;  %v1204_v50 = vshrl.u32 %v3123_v40, 16  ;;  %v1258_v59 = vunpack.c.l.b16 %v1188_v45  ;;  %v3083_v45 = vld [vmem:[%s5169_s0 + $0x218] sm:$0xf] }
  0x98   :  { %v3970_v56 = vadd.f32 %v631_v51, %v271_v5  ;;  %v3018_v5 = vld [vmem:[%s5169_s0 + $0x168] sm:$0xf]  ;;  %v1207_v51 = vshll.u32 %v3123_v40, 16  ;;  %v3177_v40 = vld [vmem:[%s5169_s0 + $0x60] sm:$0xf] }
  0x99   :  { %v3972_v57 = vpop.f32.mrf.mxu3  ;;  %v3019_v23 = vor.u32 %v3365_v6, %v3018_v5  ;;  %v1195_v62 = vrot.slane %v1193_v49, 5 }
  0x9a   :  { %v1209_v0 = vrot.slane %v1207_v51, 5 }
  0x9b   :  { %v161_v61 = vpop.f32.mrf.mxu0 }
  0x9c   :  { %v277_v63 = vpop.f32.mrf.mxu1 }
  0x9d   :  { %v3984_v4 = vadd.f32 %v277_v63, %v161_v61  ;;  %v1192_v61 = vrot.slane %v1190_v47, 4  ;;  %v1206_v63 = vrot.slane %v1204_v50, 4  ;;  %v3375_v47 = vld [vmem:[%s5169_s0 + $0x21c] sm:$0xf0] }
  0x9f   :  { %v633_v18 = vpop.f32.mrf.mxu2  ;;  %v1196_v14 = vor.u32 %v1195_v62, %v1192_v61  ;;  %v1210_v16 = vor.u32 %v1209_v0, %v1206_v63  ;;  %v3084_v63 = vor.u32 %v3375_v47, %v3083_v45  ;;  %v3253_v45 = vld [vmem:[%s5169_s0 + $0xc] sm:$0x1] }
  0xa0   :  { %v4005_v19 = vadd.f32 %v633_v18, %v3932_v21  ;;  %v1169_v21 = vrot.slane %v1168_v25, 4 }
  0xa1   :  { %v4007_v22 = vpop.f32.mrf.mxu3 }
  0xa2   :  { %v1174_v44 = vsel %vm3562_vm4, %v1169_v21, %v1173_v34 }
  0xa3   :  { %v164_v29 = vpop.f32.mrf.mxu0  ;;  %v1257_v58 = vunpack.c.l.b16 %v1174_v44  ;;  %v3367_v44 = vld [vmem:[%s5169_s0 + $0x18c] sm:$0xf0] }
  0xa4   :  { %v280_v31 = vpop.f32.mrf.mxu1  ;;  %3190 = vmatmul.msk.bf16.gmra.mxu2 %vm116_vm1, %v3170_v20 }
  0xa5   :  { %v281_v32 = vadd.f32 %v280_v31, %v164_v29  ;;  %v1268_v12 = vpack.c.b16 %v1258_v59, %v1257_v58  ;;  %v3127_v29 = vld [vmem:[%s5169_s0 + $0x1a0] sm:$0xf]  ;;  %v3126_v59 = vld [vmem:[%s5169_s0 + $0x19c] sm:$0x1] }
  0xa6   :  { %3036 = vmatmul.msk.bf16.gmra.mxu3 %vm116_vm1, %v3019_v23  ;;  %3093 = vmatmul.msk.bf16.gmra.mxu0 %vm116_vm1, %v3076_v24  ;;  %v1211_v23 = vrot.slane %v1210_v16, 4  ;;  %v1215_v24 = vrot.slane %v1213_v17, 5  ;;  %v1235_v39 = vshll.u32 %v3127_v29, 16  ;;  %v3254_v17 = vld [vmem:[%s5169_s0 + $0x10] sm:$0xf] }
  0xa7   :  { %3134 = vmatmul.msk.bf16.gmra.mxu1 %vm116_vm1, %v1267_v30  ;;  %v636_v38 = vpop.f32.mrf.mxu2  ;;  %v1715_v28 = vshll.u32 %v3254_v17, 16 }
  0xa8   :  { %v4019_v41 = vadd.f32 %v636_v38, %v276_v48  ;;  %v3173_v48 = vld [vmem:[%s5169_s0 + $0x50] sm:$0xf]  ;;  %v1232_v38 = vshrl.u32 %v3127_v29, 16  ;;  %v1237_v54 = vrot.slane %v1235_v39, 5 }
  0xa9   :  { %v300_v42 = vpop.f32.mrf.mxu3 }
  0xaa   :  { %v4022_v43 = vadd.f32 %v300_v42, %v3923_v11  ;;  %v3381_v11 = vld [vmem:[%s5169_s0 + $0x54] sm:$0xf0]  ;;  %v3026_v42 = vld [vmem:[%s5169_s0 + $0x188] sm:$0xf]  ;;  %v1234_v53 = vrot.slane %v1232_v38, 4 }
  0xab   :  { %v4028_v46 = vpop.f32.mrf.mxu0  ;;  %v3174_v6 = vor.u32 %v3381_v11, %v3173_v48  ;;  %v1220_v48 = vrot.slane %v1218_v35, 4  ;;  %v1223_v11 = vrot.slane %v1221_v36, 5  ;;  %v3027_v62 = vor.u32 %v3367_v44, %v3026_v42  ;;  %v3030_v35 = vld [vmem:[%s5169_s0 + $0x198] sm:$0xf]  ;;  %v3368_v36 = vld [vmem:[%s5169_s0 + $0x19c] sm:$0xf0] }
  0xac   :  { %v4030_v52 = vpop.f32.mrf.mxu1  ;;  %v3087_v38 = vld [vmem:[%s5169_s0 + $0x228] sm:$0xf] }
  0xad   :  { %v1224_v3 = vor.u32 %v1223_v11, %v1220_v48  ;;  %v3255_v48 = vld [vmem:[%s5169_s0 + $0x14] sm:$0x1] }
  0xaf   :  { %v638_v1 = vpop.f32.mrf.mxu2 }
  0xb0   :  { %v4057_v5 = vadd.f32 %v638_v1, %v3984_v4  ;;  %v1201_v4 = vrot.slane %v1199_v15, 5 }
  0xb1   :  { %v302_v7 = vpop.f32.mrf.mxu3 }
  0xb2   :  { %v4060_v8 = vadd.f32 %v302_v7, %v3955_v37  ;;  %v1197_v37 = vrot.slane %v1196_v14, 4  ;;  %v1238_v7 = vor.u32 %v1237_v54, %v1234_v53 }
  0xb3   :  { %v169_v13 = vpop.f32.mrf.mxu0 }
  0xb4   :  { %v285_v18 = vpop.f32.mrf.mxu1  ;;  %3191 = vmatmul.msk.bf16.gmra.mxu2 %vm116_vm1, %v3174_v6  ;;  %v1202_v21 = vsel %vm3562_vm4, %v1197_v37, %v1201_v4  ;;  %v1227_v6 = vshll.u32 %v3126_v59, 16  ;;  %v1239_v15 = vrot.slane %v1238_v7, 4  ;;  %v1707_v59 = vshll.u32 %v3253_v45, 16  ;;  %v3259_v45 = vld [vmem:[%s5169_s0 + $0x24] sm:$0x1] }
  0xb5   :  { %v286_v20 = vadd.f32 %v285_v18, %v169_v13  ;;  %v1259_v49 = vunpack.c.l.b16 %v1202_v21  ;;  %v1225_v13 = vrot.slane %v1224_v3, 4 }
  0xb6   :  { %3037 = vmatmul.msk.bf16.gmra.mxu3 %vm116_vm1, %v3023_v9  ;;  %3094 = vmatmul.msk.bf16.gmra.mxu0 %vm116_vm1, %v3080_v10  ;;  %v1241_v9 = vshll.u32 %v3128_v60, 16  ;;  %v1229_v14 = vrot.slane %v1227_v6, 5  ;;  %v1709_v6 = vrot.slane %v1707_v59, 5 }
  0xb7   :  { %3135 = vmatmul.msk.bf16.gmra.mxu1 %vm116_vm1, %v1268_v12  ;;  %v641_v25 = vpop.f32.mrf.mxu2 }
  0xb8   :  { %v4066_v26 = vadd.f32 %v641_v25, %v281_v32  ;;  %v1216_v32 = vsel %vm3562_vm4, %v1211_v23, %v1215_v24  ;;  %v1243_v16 = vrot.slane %v1241_v9, 5  ;;  %v1230_v21 = vsel %vm3562_vm4, %v1225_v13, %v1229_v14  ;;  %v3258_v13 = vld [vmem:[%s5169_s0 + $0x20] sm:$0xf] }
  0xb9   :  { %v305_v27 = vpop.f32.mrf.mxu3  ;;  %v1260_v50 = vunpack.c.l.b16 %v1216_v32  ;;  %v1261_v42 = vunpack.c.l.b16 %v1230_v21  ;;  %v1743_v21 = vshll.u32 %v3258_v13, 16 }
  0xba   :  { %v4075_v30 = vadd.f32 %v305_v27, %v3972_v57  ;;  %v3382_v57 = vld [vmem:[%s5169_s0 + $0x64] sm:$0xf0]  ;;  %v1712_v27 = vshrl.u32 %v3254_v17, 16  ;;  %v1244_v32 = vsel %vm3562_vm4, %v1239_v15, %v1243_v16 }
  0xbb   :  { %v4077_v31 = vpop.f32.mrf.mxu0  ;;  %v3178_v55 = vor.u32 %v3382_v57, %v3177_v40  ;;  %v1269_v1 = vpack.c.b16 %v1260_v50, %v1259_v49  ;;  %v3376_v57 = vld [vmem:[%s5169_s0 + $0x22c] sm:$0xf0]  ;;  %v1262_v44 = vunpack.c.l.b16 %v1244_v32  ;;  %v1717_v49 = vrot.slane %v1715_v28, 5 }
  0xbc   :  { %v4083_v34 = vpop.f32.mrf.mxu1  ;;  %v1714_v47 = vrot.slane %v1712_v27, 4  ;;  %v1740_v28 = vshrl.u32 %v3258_v13, 16 }
  0xbf   :  { %v4103_v51 = vpop.f32.mrf.mxu2 }
  0xc1   :  { %v307_v58 = vpop.f32.mrf.mxu3 }
  0xc2   :  { %v4112_v61 = vadd.f32 %v307_v58, %v4007_v22  ;;  %v3252_v22 = vld [vmem:[%s5169_s0 + $0x8] sm:$0xf]  ;;  %v3088_v58 = vor.u32 %v3376_v57, %v3087_v38  ;;  %v1742_v57 = vrot.slane %v1740_v28, 4 }
  0xc3   :  { %v174_v0 = vpop.f32.mrf.mxu0  ;;  %v1698_v23 = vshrl.u32 %v3252_v22, 16  ;;  %v1701_v24 = vshll.u32 %v3252_v22, 16  ;;  %v3256_v22 = vld [vmem:[%s5169_s0 + $0x18] sm:$0xf] }
  0xc4   :  { %v290_v2 = vpop.f32.mrf.mxu1  ;;  %3192 = vmatmul.msk.bf16.gmra.mxu2 %vm116_vm1, %v3178_v55  ;;  %v3031_v55 = vor.u32 %v3368_v36, %v3030_v35  ;;  %v1726_v17 = vshrl.u32 %v3256_v22, 16 }
  0xc5   :  { %v291_v10 = vadd.f32 %v290_v2, %v174_v0  ;;  %v1700_v39 = vrot.slane %v1698_v23, 4  ;;  %v1703_v40 = vrot.slane %v1701_v24, 5  ;;  %v1718_v0 = vor.u32 %v1717_v49, %v1714_v47 }
  0xc6   :  { %3038 = vmatmul.msk.bf16.gmra.mxu3 %vm116_vm1, %v3027_v62  ;;  %3095 = vmatmul.msk.bf16.gmra.mxu0 %vm116_vm1, %v3084_v63  ;;  %v1270_v62 = vpack.c.b16 %v1262_v44, %v1261_v42  ;;  %v1728_v38 = vrot.slane %v1726_v17, 4  ;;  %v1745_v42 = vrot.slane %v1743_v21, 5 }
  0xc7   :  { %3136 = vmatmul.msk.bf16.gmra.mxu1 %vm116_vm1, %v1269_v1  ;;  %v646_v12 = vpop.f32.mrf.mxu2  ;;  %v1704_v63 = vor.u32 %v1703_v40, %v1700_v39  ;;  %v1721_v1 = vshll.u32 %v3255_v48, 16  ;;  %v1719_v7 = vrot.slane %v1718_v0, 4  ;;  %v3257_v40 = vld [vmem:[%s5169_s0 + $0x1c] sm:$0x1] }
  0xc8   :  { %v4124_v18 = vadd.f32 %v646_v12, %v286_v20  ;;  %v3181_v20 = vld [vmem:[%s5169_s0 + $0x70] sm:$0xf] }
  0xc9   :  { %v661_v37 = vpop.f32.mrf.mxu3  ;;  %v1723_v9 = vrot.slane %v1721_v1, 5 }
  0xca   :  { %v4127_v4 = vadd.f32 %v661_v37, %v4022_v43  ;;  %v3383_v43 = vld [vmem:[%s5169_s0 + $0x74] sm:$0xf0]  ;;  %v1729_v37 = vshll.u32 %v3256_v22, 16 }
  0xcb   :  { %v4129_v25 = vpop.f32.mrf.mxu0  ;;  %v3182_v11 = vor.u32 %v3383_v43, %v3181_v20  ;;  %v1724_v27 = vsel %vm3562_vm4, %v1719_v7, %v1723_v9  ;;  %v3214_v20 = vld [vmem:[%s5169_s0 + $0x98] sm:$0xf]  ;;  %v3385_v43 = vld [vmem:[%s5169_s0 + $0x9c] sm:$0xf0] }
  0xcc   :  { %v4131_v29 = vpop.f32.mrf.mxu1  ;;  %v1924_v36 = vunpack.c.l.b16 %v1724_v27  ;;  %v1731_v39 = vrot.slane %v1729_v37, 5  ;;  %v3215_v48 = vor.u32 %v3385_v43, %v3214_v20 }
  0xcf   :  { %v4158_v50 = vpop.f32.mrf.mxu2 }
  0xd1   :  { %v663_v53 = vpop.f32.mrf.mxu3 }
  0xd2   :  { %v4164_v54 = vadd.f32 %v663_v53, %v4060_v8  ;;  %v1705_v8 = vrot.slane %v1704_v63, 4 }
  0xd3   :  { %v179_v60 = vpop.f32.mrf.mxu0 }
  0xd4   :  { %v295_v2 = vpop.f32.mrf.mxu1  ;;  %3193 = vmatmul.msk.bf16.gmra.mxu2 %vm116_vm1, %v3182_v11  ;;  %v1710_v24 = vsel %vm3562_vm4, %v1705_v8, %v1709_v6  ;;  %v3262_v6 = vld [vmem:[%s5169_s0 + $0x30] sm:$0xf] }
  0xd5   :  { %v296_v3 = vadd.f32 %v295_v2, %v179_v60  ;;  %v1923_v35 = vunpack.c.l.b16 %v1710_v24  ;;  %v1746_v60 = vor.u32 %v1745_v42, %v1742_v57  ;;  %v1768_v37 = vshrl.u32 %v3262_v6, 16  ;;  %v3263_v57 = vld [vmem:[%s5169_s0 + $0x34] sm:$0x1] }
  0xd6   :  { %3039 = vmatmul.msk.bf16.gmra.mxu3 %vm116_vm1, %v3031_v55  ;;  %3096 = vmatmul.msk.bf16.gmra.mxu0 %vm116_vm1, %v3088_v58  ;;  %v1732_v55 = vor.u32 %v1731_v39, %v1728_v38  ;;  %v1735_v58 = vshll.u32 %v3257_v40, 16  ;;  %v1771_v24 = vshll.u32 %v3262_v6, 16  ;;  %v3261_v38 = vld [vmem:[%s5169_s0 + $0x2c] sm:$0x1] }
  0xd7   :  { %3137 = vmatmul.msk.bf16.gmra.mxu1 %vm116_vm1, %v1270_v62  ;;  %v651_v12 = vpop.f32.mrf.mxu2  ;;  %v1939_v53 = vpack.c.b16 %v1924_v36, %v1923_v35  ;;  %v1749_v62 = vshll.u32 %v3259_v45, 16  ;;  %v1747_v2 = vrot.slane %v1746_v60, 4  ;;  %v3386_v35 = vld [vmem:[%s5169_s0 + $0xac] sm:$0xf0]  ;;  %v1770_v39 = vrot.slane %v1768_v37, 4 }
  0xd8   :  { %v4176_v14 = vadd.f32 %v651_v12, %v291_v10  ;;  %v3185_v10 = vld [vmem:[%s5169_s0 + $0x80] sm:$0xf]  ;;  %v1733_v0 = vrot.slane %v1732_v55, 4  ;;  %v1737_v1 = vrot.slane %v1735_v58, 5  ;;  %v1773_v40 = vrot.slane %v1771_v24, 5 }
  0xd9   :  { %v666_v15 = vpop.f32.mrf.mxu3  ;;  %v1751_v8 = vrot.slane %v1749_v62, 5 }
  0xda   :  { %v4179_v16 = vadd.f32 %v666_v15, %v4075_v30  ;;  %v3384_v30 = vld [vmem:[%s5169_s0 + $0x84] sm:$0xf0]  ;;  %v1738_v17 = vsel %vm3562_vm4, %v1733_v0, %v1737_v1  ;;  %v1774_v58 = vor.u32 %v1773_v40, %v1770_v39  ;;  %v3265_v39 = vld [vmem:[%s5169_s0 + $0x3c] sm:$0x1]  ;;  %v3267_v40 = vld [vmem:[%s5169_s0 + $0x44] sm:$0x1] }
  0xdb   :  { %v4181_v23 = vpop.f32.mrf.mxu0  ;;  %v3186_v47 = vor.u32 %v3384_v30, %v3185_v10  ;;  %v1752_v28 = vsel %vm3562_vm4, %v1747_v2, %v1751_v8  ;;  %v1925_v30 = vunpack.c.l.b16 %v1738_v17  ;;  %v3264_v2 = vld [vmem:[%s5169_s0 + $0x38] sm:$0xf] }
  0xdc   :  { %v4187_v32 = vpop.f32.mrf.mxu1  ;;  %v1926_v36 = vunpack.c.l.b16 %v1752_v28  ;;  %v1775_v1 = vrot.slane %v1774_v58, 4  ;;  %v1791_v58 = vshll.u32 %v3265_v39, 16 }
  0xde   :  { %v1940_v55 = vpack.c.b16 %v1926_v36, %v1925_v30 }
  0xdf   :  { %v4204_v44 = vpop.f32.mrf.mxu2 }
  0xe1   :  { %v668_v49 = vpop.f32.mrf.mxu3 }
  0xe2   :  { %v4210_v11 = vadd.f32 %v668_v49, %v4112_v61  ;;  %v3260_v61 = vld [vmem:[%s5169_s0 + $0x28] sm:$0xf] }
  0xe3   :  { %v933_v59 = vpop.f32.mrf.mxu0  ;;  %v1754_v12 = vshrl.u32 %v3260_v61, 16  ;;  %v1757_v13 = vshll.u32 %v3260_v61, 16 }
  0xe4   :  { %v1307_v63 = vpop.f32.mrf.mxu1  ;;  %3194 = vmatmul.msk.bf16.gmra.mxu2 %vm116_vm1, %v3186_v47 }
  0xe5   :  { %v1756_v20 = vrot.slane %v1754_v12, 4  ;;  %v1759_v43 = vrot.slane %v1757_v13, 5  ;;  %v1782_v13 = vshrl.u32 %v3264_v2, 16 }
  0xe6   :  { %3244 = vmatmul.msk.bf16.vlgmr.msra.gmra.mxu3 %vm116_vm1, %v3215_v48  ;;  %3285 = vmatmul.msk.bf16.vlgmr.msra.gmra.mxu0 %vm116_vm1, %v1939_v53  ;;  %v1763_v48 = vshll.u32 %v3261_v38, 16 }
  0xe7   :  { %v656_v7 = vpop.f32.mrf.mxu2  ;;  %v1760_v49 = vor.u32 %v1759_v43, %v1756_v20  ;;  %v1784_v20 = vrot.slane %v1782_v13, 4 }
  0xe8   :  { %v4221_v9 = vadd.f32 %v656_v7, %v296_v3  ;;  %v3218_v3 = vld [vmem:[%s5169_s0 + $0xa8] sm:$0xf]  ;;  %v1765_v0 = vrot.slane %v1763_v48, 5 }
  0xe9   :  { %v782_v22 = vpop.f32.mrf.mxu3  ;;  %v3219_v47 = vor.u32 %v3386_v35, %v3218_v3  ;;  %v3222_v35 = vld [vmem:[%s5169_s0 + $0xb8] sm:$0xf] }
  0xea   :  { %v822_v15 = vadd.f32 %v782_v22, %v3970_v56 }
  0xeb   :  { %v935_v27 = vpop.f32.mrf.mxu0 }
  0xec   :  { %v973_v21 = vadd.f32 %v933_v59, %v822_v15  ;;  %v4228_v10 = vpop.f32.mrf.mxu1  ;;  %v1777_v59 = vshll.u32 %v3263_v57, 16  ;;  %v1785_v15 = vshll.u32 %v3264_v2, 16 }
  0xee   :  { %v1347_v56 = vadd.f32 %v1307_v63, %v973_v21  ;;  %v1761_v63 = vrot.slane %v1760_v49, 4  ;;  %v1779_v61 = vrot.slane %v1777_v59, 5  ;;  %v1787_v43 = vrot.slane %v1785_v15, 5 }
  0xef   :  { %v4242_v42 = vpop.f32.mrf.mxu2 }
  0xf0   :  { %v1766_v12 = vsel %vm3562_vm4, %v1761_v63, %v1765_v0  ;;  %v1780_v37 = vsel %vm3562_vm4, %v1775_v1, %v1779_v61  ;;  %v1793_v61 = vrot.slane %v1791_v58, 5 }
  0xf1   :  { %v784_v45 = vpop.f32.mrf.mxu3  ;;  %v1927_v3 = vunpack.c.l.b16 %v1766_v12  ;;  %v1928_v30 = vunpack.c.l.b16 %v1780_v37 }
  0xf2   :  { %v823_v53 = vadd.f32 %v784_v45, %v4005_v19  ;;  %v3266_v19 = vld [vmem:[%s5169_s0 + $0x40] sm:$0xf] }
  0xf3   :  { %v938_v60 = vpop.f32.mrf.mxu0  ;;  %v1796_v24 = vshrl.u32 %v3266_v19, 16  ;;  %v1941_v48 = vpack.c.b16 %v1928_v30, %v1927_v3 }
  0xf4   :  { %v4245_v62 = vadd.f32 %v935_v27, %v823_v53  ;;  %v1312_v8 = vpop.f32.mrf.mxu1  ;;  %v1799_v27 = vshll.u32 %v3266_v19, 16  ;;  %v1788_v53 = vor.u32 %v1787_v43, %v1784_v20  ;;  %v283_v20 = vadd.f32 %v4030_v52, %v4028_v46  ;;  %v3269_v46 = vld [vmem:[%s5169_s0 + $0x54] sm:$0x1]  ;;  %v3271_v52 = vld [vmem:[%s5169_s0 + $0x5c] sm:$0x1] }
  0xf5   :  { %v1798_v36 = vrot.slane %v1796_v24, 4 }
  0xf6   :  { %3245 = vmatmul.msk.bf16.gmra.mxu3 %vm116_vm1, %v3219_v47  ;;  %3286 = vmatmul.msk.bf16.gmra.mxu0 %vm116_vm1, %v1940_v55  ;;  %v1801_v38 = vrot.slane %v1799_v27, 5  ;;  %v1789_v1 = vrot.slane %v1788_v53, 4 }
  0xf7   :  { %v1458_v6 = vpop.f32.mrf.mxu2 }
  0xf8   :  { %v4255_v7 = vadd.f32 %v1458_v6, %v1347_v56  ;;  %v1802_v59 = vor.u32 %v1801_v38, %v1798_v36  ;;  %v3268_v6 = vld [vmem:[%s5169_s0 + $0x50] sm:$0xf]  ;;  %v1794_v15 = vsel %vm3562_vm4, %v1789_v1, %v1793_v61  ;;  %v1833_v61 = vshll.u32 %v3271_v52, 16 }
  0xf9   :  { %v787_v22 = vpop.f32.mrf.mxu3  ;;  %v1810_v27 = vshrl.u32 %v3268_v6, 16 }
  0xfa   :  { %v824_v17 = vadd.f32 %v787_v22, %v4019_v41  ;;  %v3387_v41 = vld [vmem:[%s5169_s0 + $0xbc] sm:$0xf0]  ;;  %v1803_v2 = vrot.slane %v1802_v59, 4 }
  0xfb   :  { %v940_v28 = vpop.f32.mrf.mxu0  ;;  %v3223_v49 = vor.u32 %v3387_v41, %v3222_v35  ;;  %v3388_v41 = vld [vmem:[%s5169_s0 + $0xcc] sm:$0xf0]  ;;  %v1812_v36 = vrot.slane %v1810_v27, 4 }
  0xfc   :  { %v975_v21 = vadd.f32 %v938_v60, %v824_v17  ;;  %v4276_v47 = vpop.f32.mrf.mxu1  ;;  %v1805_v60 = vshll.u32 %v3267_v40, 16 }
  0xfe   :  { %v1349_v56 = vadd.f32 %v1312_v8, %v975_v21  ;;  %v1807_v8 = vrot.slane %v1805_v60, 5 }
  0xff   :  { %v4274_v57 = vpop.f32.mrf.mxu2 }
 0x100   :  { %v1808_v17 = vsel %vm3562_vm4, %v1803_v2, %v1807_v8  ;;  %v3272_v2 = vld [vmem:[%s5169_s0 + $0x60] sm:$0xf] }
 0x101   :  { %v789_v45 = vpop.f32.mrf.mxu3  ;;  %v1930_v35 = vunpack.c.l.b16 %v1808_v17 }
 0x102   :  { %v825_v55 = vadd.f32 %v789_v45, %v4057_v5  ;;  %v3270_v5 = vld [vmem:[%s5169_s0 + $0x58] sm:$0xf]  ;;  %v676_v45 = vadd.f32 %v4103_v51, %v283_v20 }
 0x103   :  { %v943_v63 = vpop.f32.mrf.mxu0  ;;  %v1824_v21 = vshrl.u32 %v3270_v5, 16  ;;  %v1827_v3 = vshll.u32 %v3270_v5, 16  ;;  %v1835_v5 = vrot.slane %v1833_v61, 5 }
 0x104   :  { %v4279_v0 = vadd.f32 %v940_v28, %v825_v55  ;;  %v1317_v24 = vpop.f32.mrf.mxu1  ;;  %v1813_v28 = vshll.u32 %v3268_v6, 16 }
 0x105   :  { %v1826_v39 = vrot.slane %v1824_v21, 4  ;;  %v1829_v40 = vrot.slane %v1827_v3, 5 }
 0x106   :  { %3246 = vmatmul.msk.bf16.gmra.mxu3 %vm116_vm1, %v3223_v49  ;;  %3287 = vmatmul.msk.bf16.gmra.mxu0 %vm116_vm1, %v1941_v48  ;;  %v1815_v38 = vrot.slane %v1813_v28, 5 }
 0x107   :  { %v1463_v19 = vpop.f32.mrf.mxu2  ;;  %v1830_v1 = vor.u32 %v1829_v40, %v1826_v39  ;;  %v3273_v39 = vld [vmem:[%s5169_s0 + $0x64] sm:$0x1] }
 0x108   :  { %v4289_v22 = vadd.f32 %v1463_v19, %v1349_v56  ;;  %v1929_v56 = vunpack.c.l.b16 %v1794_v15  ;;  %v1816_v60 = vor.u32 %v1815_v38, %v1812_v36 }
 0x109   :  { %v792_v12 = vpop.f32.mrf.mxu3  ;;  %v1831_v6 = vrot.slane %v1830_v1, 4 }
 0x10a   :  { %v826_v13 = vadd.f32 %v792_v12, %v4066_v26  ;;  %v3226_v26 = vld [vmem:[%s5169_s0 + $0xc8] sm:$0xf]  ;;  %v1942_v58 = vpack.c.b16 %v1930_v35, %v1929_v56  ;;  %v1817_v8 = vrot.slane %v1816_v60, 4  ;;  %v3230_v56 = vld [vmem:[%s5169_s0 + $0xe0] sm:$0xf] }
 0x10b   :  { %v945_v37 = vpop.f32.mrf.mxu0  ;;  %v3227_v55 = vor.u32 %v3388_v41, %v3226_v26  ;;  %v3274_v12 = vld [vmem:[%s5169_s0 + $0x68] sm:$0xf]  ;;  %v1836_v20 = vsel %vm3562_vm4, %v1831_v6, %v1835_v5  ;;  %v3278_v6 = vld [vmem:[%s5169_s0 + $0x78] sm:$0xf] }
 0x10c   :  { %v977_v30 = vadd.f32 %v943_v63, %v826_v13  ;;  %v1819_v63 = vshll.u32 %v3269_v46, 16  ;;  %v1852_v28 = vshrl.u32 %v3274_v12, 16  ;;  %v1855_v21 = vshll.u32 %v3274_v12, 16  ;;  %v3389_v41 = vld [vmem:[%s5169_s0 + $0xe4] sm:$0xf0] }
 0x10d   :  { %v1932_v38 = vunpack.c.l.b16 %v1836_v20  ;;  %v3231_v52 = vor.u32 %v3389_v41, %v3230_v56 }
 0x10e   :  { %v1351_v43 = vadd.f32 %v1317_v24, %v977_v30  ;;  %v1821_v19 = vrot.slane %v1819_v63, 5  ;;  %v1841_v24 = vshll.u32 %v3272_v2, 16  ;;  %v1854_v40 = vrot.slane %v1852_v28, 4 }
 0x10f   :  { %v4305_v49 = vpop.f32.mrf.mxu2  ;;  %v1883_v28 = vshll.u32 %v3278_v6, 16 }
 0x110   :  { %v1822_v30 = vsel %vm3562_vm4, %v1817_v8, %v1821_v19 }
 0x111   :  { %v794_v48 = vpop.f32.mrf.mxu3  ;;  %v1931_v36 = vunpack.c.l.b16 %v1822_v30 }
 0x112   :  { %v827_v53 = vadd.f32 %v794_v48, %v676_v45  ;;  %v1857_v45 = vrot.slane %v1855_v21, 5 }
 0x113   :  { %v948_v59 = vpop.f32.mrf.mxu0 }
 0x114   :  { %v4313_v51 = vadd.f32 %v945_v37, %v827_v53  ;;  %v1838_v37 = vshrl.u32 %v3272_v2, 16  ;;  %v1847_v53 = vshll.u32 %v3273_v39, 16  ;;  %v3279_v39 = vld [vmem:[%s5169_s0 + $0x7c] sm:$0x1] }
 0x116   :  { %3247 = vmatmul.msk.bf16.gmra.mxu3 %vm116_vm1, %v3227_v55  ;;  %3288 = vmatmul.msk.bf16.gmra.mxu0 %vm116_vm1, %v1942_v58  ;;  %v1840_v35 = vrot.slane %v1838_v37, 4  ;;  %v1943_v58 = vpack.c.b16 %v1932_v38, %v1931_v36  ;;  %v1849_v2 = vrot.slane %v1847_v53, 5  ;;  %v1885_v36 = vrot.slane %v1883_v28, 5  ;;  %v3277_v38 = vld [vmem:[%s5169_s0 + $0x74] sm:$0x1] }
 0x117   :  { %v1468_v13 = vpop.f32.mrf.mxu2 }
 0x118   :  { %v4323_v15 = vadd.f32 %v1468_v13, %v1351_v43  ;;  %v288_v43 = vadd.f32 %v4083_v34, %v4077_v31  ;;  %v3275_v31 = vld [vmem:[%s5169_s0 + $0x6c] sm:$0x1] }
 0x119   :  { %v797_v17 = vpop.f32.mrf.mxu3  ;;  %v1861_v60 = vshll.u32 %v3275_v31, 16 }
 0x11a   :  { %v828_v27 = vadd.f32 %v797_v17, %v4124_v18  ;;  %v1843_v18 = vrot.slane %v1841_v24, 5  ;;  %v678_v34 = vadd.f32 %v4158_v50, %v288_v43  ;;  %v3276_v50 = vld [vmem:[%s5169_s0 + $0x70] sm:$0xf] }
 0x11b   :  { %v950_v3 = vpop.f32.mrf.mxu0  ;;  %v1863_v19 = vrot.slane %v1861_v60, 5  ;;  %v1866_v13 = vshrl.u32 %v3276_v50, 16  ;;  %v1869_v17 = vshll.u32 %v3276_v50, 16 }
 0x11c   :  { %v4330_v26 = vadd.f32 %v948_v59, %v828_v27  ;;  %v1844_v48 = vor.u32 %v1843_v18, %v1840_v35  ;;  %v1858_v59 = vor.u32 %v1857_v45, %v1854_v40  ;;  %v1880_v27 = vshrl.u32 %v3278_v6, 16  ;;  %v3234_v18 = vld [vmem:[%s5169_s0 + $0xf0] sm:$0xf] }
 0x11d   :  { %v1868_v43 = vrot.slane %v1866_v13, 4  ;;  %v1871_v56 = vrot.slane %v1869_v17, 5  ;;  %v293_v35 = vadd.f32 %v4131_v29, %v4129_v25 }
 0x11e   :  { %v1845_v61 = vrot.slane %v1844_v48, 4  ;;  %v1859_v8 = vrot.slane %v1858_v59, 4  ;;  %v1882_v41 = vrot.slane %v1880_v27, 4  ;;  %v1889_v48 = vshll.u32 %v3279_v39, 16 }
 0x11f   :  { %v680_v25 = vadd.f32 %v4204_v44, %v293_v35  ;;  %v1872_v31 = vor.u32 %v1871_v56, %v1868_v43  ;;  %v3280_v44 = vld [vmem:[%s5169_s0 + $0x80] sm:$0xf] }
 0x120   :  { %v1850_v12 = vsel %vm3562_vm4, %v1845_v61, %v1849_v2  ;;  %v1864_v24 = vsel %vm3562_vm4, %v1859_v8, %v1863_v19  ;;  %v3282_v61 = vld [vmem:[%s5169_s0 + $0x88] sm:$0xf] }
 0x121   :  { %v799_v46 = vpop.f32.mrf.mxu3  ;;  %v1933_v30 = vunpack.c.l.b16 %v1850_v12  ;;  %v1934_v20 = vunpack.c.l.b16 %v1864_v24  ;;  %v1897_v12 = vshll.u32 %v3280_v44, 16  ;;  %v1908_v13 = vshrl.u32 %v3282_v61, 16 }
 0x122   :  { %v829_v55 = vadd.f32 %v799_v46, %v678_v34  ;;  %v1875_v46 = vshll.u32 %v3277_v38, 16  ;;  %v1911_v17 = vshll.u32 %v3282_v61, 16  ;;  %v298_v24 = vadd.f32 %v4187_v32, %v4181_v23  ;;  %v3281_v23 = vld [vmem:[%s5169_s0 + $0x84] sm:$0x1]  ;;  %v3283_v32 = vld [vmem:[%s5169_s0 + $0x8c] sm:$0x1] }
 0x123   :  { %v953_v63 = vpop.f32.mrf.mxu0  ;;  %v1944_v45 = vpack.c.b16 %v1934_v20, %v1933_v30  ;;  %v1899_v20 = vrot.slane %v1897_v12, 5  ;;  %v1910_v43 = vrot.slane %v1908_v13, 4  ;;  %v3242_v61 = vld [vmem:[%s5169_s0 + $0x110] sm:$0xf]  ;;  %v3393_v12 = vld [vmem:[%s5170_s1] sm:$0xff] }
 0x124   :  { %v4347_v1 = vadd.f32 %v950_v3, %v829_v55  ;;  %v1877_v59 = vrot.slane %v1875_v46, 5  ;;  %v1913_v56 = vrot.slane %v1911_v17, 5  ;;  %v682_v35 = vadd.f32 %v4242_v42, %v298_v24 }
 0x126   :  { %3248 = vmatmul.msk.bf16.gmra.mxu3 %vm116_vm1, %v3231_v52  ;;  %3289 = vmatmul.msk.bf16.gmra.mxu0 %vm116_vm1, %v1943_v58  ;;  %v1886_v52 = vor.u32 %v1885_v36, %v1882_v41  ;;  %v1873_v58 = vrot.slane %v1872_v31, 4 }
 0x128   :  { %v1887_v60 = vrot.slane %v1886_v52, 4  ;;  %v1878_v19 = vsel %vm3562_vm4, %v1873_v58, %v1877_v59 }
 0x129   :  { %v802_v5 = vpop.f32.mrf.mxu3  ;;  %v1935_v27 = vunpack.c.l.b16 %v1878_v19 }
 0x12a   :  { %v830_v37 = vadd.f32 %v802_v5, %v4176_v14  ;;  %v3390_v14 = vld [vmem:[%s5169_s0 + $0xf4] sm:$0xf0]  ;;  %v1894_v5 = vshrl.u32 %v3280_v44, 16 }
 0x12b   :  { %v955_v21 = vpop.f32.mrf.mxu0  ;;  %v3235_v40 = vor.u32 %v3390_v14, %v3234_v18 }
 0x12c   :  { %v4362_v3 = vadd.f32 %v953_v63, %v830_v37  ;;  %v1891_v63 = vrot.slane %v1889_v48, 5  ;;  %v1896_v30 = vrot.slane %v1894_v5, 4  ;;  %v3401_v5 = vld [vmem:[%s5177_s8] sm:$0xff] }
 0x12d   :  { %2594 = vmatpush.bf16.msra.mxu2 %v3401_v5 }
 0x12e   :  { %v1892_v50 = vsel %vm3562_vm4, %v1887_v60, %v1891_v63  ;;  %v1900_v39 = vor.u32 %v1899_v20, %v1896_v30  ;;  %v3394_v30 = vld [vmem:[%s5170_s1 + $0x8] sm:$0xff] }
 0x12f   :  { %v1936_v28 = vunpack.c.l.b16 %v1892_v50 }
 0x130   :  { %v1901_v42 = vrot.slane %v1900_v39, 4  ;;  %3337 = vmatmul.msk.bf16.vlgmr.msra.gmra.mxu2 %vm2562_vm5, %v3393_v12 }
 0x131   :  { %v804_v29 = vpop.f32.mrf.mxu3  ;;  %v1945_v36 = vpack.c.b16 %v1936_v28, %v1935_v27 }
 0x132   :  { %v831_v34 = vadd.f32 %v804_v29, %v680_v25  ;;  %v1903_v25 = vshll.u32 %v3281_v23, 16  ;;  %v1914_v29 = vor.u32 %v1913_v56, %v1910_v43 }
 0x133   :  { %v958_v53 = vpop.f32.mrf.mxu0 }
 0x134   :  { %v4379_v55 = vadd.f32 %v955_v21, %v831_v34  ;;  %v3391_v21 = vld [vmem:[%s5169_s0 + $0x104] sm:$0xf0]  ;;  %v1905_v31 = vrot.slane %v1903_v25, 5  ;;  %v1915_v34 = vrot.slane %v1914_v29, 4 }
 0x136   :  { %3249 = vmatmul.msk.bf16.gmra.mxu3 %vm116_vm1, %v3235_v40  ;;  %3290 = vmatmul.msk.bf16.gmra.mxu0 %vm116_vm1, %v1944_v45  ;;  %v1917_v40 = vshll.u32 %v3283_v32, 16  ;;  %v1906_v58 = vsel %vm3562_vm4, %v1901_v42, %v1905_v31  ;;  %v1350_v42 = vadd.f32 %v4276_v47, %v4279_v0  ;;  %v3396_v47 = vld [vmem:[%s5170_s1 + $0x18] sm:$0xff] }
 0x137   :  { %v1937_v63 = vunpack.c.l.b16 %v1906_v58 }
 0x138   :  { %v1919_v46 = vrot.slane %v1917_v40, 5 }
 0x139   :  { %v807_v2 = vpop.f32.mrf.mxu3 }
 0x13a   :  { %v832_v8 = vadd.f32 %v807_v2, %v4221_v9  ;;  %v3238_v9 = vld [vmem:[%s5169_s0 + $0x100] sm:$0xf]  ;;  %v1920_v59 = vsel %vm3562_vm4, %v1915_v34, %v1919_v46  ;;  %v3392_v2 = vld [vmem:[%s5169_s0 + $0x114] sm:$0xf0]  ;;  %v1501_v46 = vadd.f32 %v4305_v49, %v1350_v42 }
 0x13b   :  { %v960_v6 = vpop.f32.mrf.mxu0  ;;  %v3239_v41 = vor.u32 %v3391_v21, %v3238_v9  ;;  %v1938_v44 = vunpack.c.l.b16 %v1920_v59  ;;  %v3243_v19 = vor.u32 %v3392_v2, %v3242_v61 }
 0x13c   :  { %v4394_v37 = vadd.f32 %v958_v53, %v832_v8 }
 0x13d   :  { %v1946_v50 = vpack.c.b16 %v1938_v44, %v1937_v63 }
 0x140   :  { %3338 = vmatmul.msk.bf16.gmra.mxu2 %vm2562_vm5, %v3394_v30 }
 0x141   :  { %v809_v18 = vpop.f32.mrf.mxu3 }
 0x142   :  { %v833_v14 = vadd.f32 %v809_v18, %v682_v35  ;;  %v1348_v35 = vadd.f32 %v4228_v10, %v4245_v62  ;;  %v1470_v18 = vpop.f32.mrf.mxu2  ;;  %v3395_v10 = vld [vmem:[%s5170_s1 + $0x10] sm:$0xff] }
 0x143   :  { %v963_v38 = vpop.f32.mrf.mxu0 }
 0x144   :  { %v4411_v45 = vadd.f32 %v960_v6, %v833_v14 }
 0x146   :  { %3250 = vmatmul.msk.bf16.gmra.mxu3 %vm116_vm1, %v3239_v41  ;;  %3291 = vmatmul.msk.bf16.gmra.mxu0 %vm116_vm1, %v1945_v36 }
 0x149   :  { %v812_v52 = vpop.f32.mrf.mxu3 }
 0x14a   :  { %v834_v48 = vadd.f32 %v812_v52, %v4127_v4  ;;  %v1473_v40 = vpop.f32.mrf.mxu2 }
 0x14b   :  { %v965_v53 = vpop.f32.mrf.mxu0 }
 0x14c   :  { %v4420_v60 = vadd.f32 %v963_v38, %v834_v48  ;;  %v1319_v38 = vpop.f32.mrf.mxu1 }
 0x150   :  { %3339 = vmatmul.msk.bf16.gmra.mxu2 %vm2562_vm5, %v3395_v10 }
 0x151   :  { %v814_v4 = vpop.f32.mrf.mxu3 }
 0x152   :  { %v835_v8 = vadd.f32 %v814_v4, %v4164_v54  ;;  %v1475_v63 = vpop.f32.mrf.mxu2 }
 0x153   :  { %v968_v6 = vpop.f32.mrf.mxu0 }
 0x154   :  { %v4429_v33 = vadd.f32 %v965_v53, %v835_v8  ;;  %v1322_v52 = vpop.f32.mrf.mxu1  ;;  %v1352_v8 = vadd.f32 %v1319_v38, %v4313_v51  ;;  %v3397_v51 = vld [vmem:[%s5170_s1 + $0x20] sm:$0xff] }
 0x156   :  { %3251 = vmatmul.msk.bf16.gmra.mxu3 %vm116_vm1, %v3243_v19  ;;  %3292 = vmatmul.msk.bf16.gmra.mxu0 %vm116_vm1, %v1946_v50 }
 0x159   :  { %v817_v54 = vpop.f32.mrf.mxu3 }
 0x15a   :  { %v836_v13 = vadd.f32 %v817_v54, %v4179_v16  ;;  %v1478_v5 = vpop.f32.mrf.mxu2 }
 0x15b   :  { %v970_v17 = vpop.f32.mrf.mxu0 }
 0x15c   :  { %v4441_v24 = vadd.f32 %v968_v6, %v836_v13  ;;  %v1324_v49 = vpop.f32.mrf.mxu1  ;;  %v1503_v6 = vadd.f32 %v1470_v18, %v1352_v8 }
 0x160   :  { %3340 = vmatmul.msk.bf16.gmra.mxu2 %vm2562_vm5, %v3396_v47 }
 0x161   :  { %v819_v9 = vpop.f32.mrf.mxu3 }
 0x162   :  { %v837_v27 = vadd.f32 %v819_v9, %v4210_v11  ;;  %v1499_v11 = vadd.f32 %v4274_v57, %v1348_v35  ;;  %v1353_v9 = vadd.f32 %v1322_v52, %v4330_v26 }
 0x163   :  { %v1983_v28 = vpop.f32.mrf.mxu0 }
 0x164   :  { %v4444_v21 = vadd.f32 %v970_v17, %v837_v27  ;;  %v1504_v30 = vadd.f32 %v1473_v40, %v1353_v9  ;;  %v2245_v40 = vld [vmem:[%s5174_s5] sm:$0xf] }
 0x169   :  { %v1609_v20 = vpop.f32.mrf.mxu3 }
 0x16a   :  { %v1649_v43 = vadd.f32 %v1609_v20, %v4255_v7 }
 0x16b   :  { %v1985_v16 = vpop.f32.mrf.mxu0 }
 0x16c   :  { %v4451_v56 = vadd.f32 %v1983_v28, %v1649_v43 }
 0x16e   :  { %v2041_v36 = vsel %vm116_vm1, %v4451_v56, 0.0 }
 0x170   :  { %3341 = vmatmul.msk.bf16.gmra.mxu2 %vm2562_vm5, %v3397_v51 }
 0x171   :  { %v1611_v23 = vpop.f32.mrf.mxu3 }
 0x172   :  { %v1650_v32 = vadd.f32 %v1611_v23, %v1499_v11  ;;  %v1354_v23 = vadd.f32 %v1324_v49, %v4347_v1  ;;  %v3398_v1 = vld [vmem:[%s5170_s1 + $0x28] sm:$0xff] }
 0x173   :  { %v1988_v14 = vpop.f32.mrf.mxu0 }
 0x174   :  { %v4456_v41 = vadd.f32 %v1985_v16, %v1650_v32  ;;  %v1480_v16 = vpop.f32.mrf.mxu2 }
 0x176   :  { %v2042_v7 = vsel %vm116_vm1, %v4456_v41, 0.0 }
 0x177   :  { %v2043_v39 = vadd.f32 %v2042_v7, %v2041_v36 }
 0x179   :  { %v1614_v62 = vpop.f32.mrf.mxu3 }
 0x17a   :  { %v1651_v57 = vadd.f32 %v1614_v62, %v4289_v22 }
 0x17b   :  { %v1990_v25 = vpop.f32.mrf.mxu0 }
 0x17c   :  { %v4467_v29 = vadd.f32 %v1988_v14, %v1651_v57  ;;  %v1505_v14 = vadd.f32 %v1475_v63, %v1354_v23  ;;  %v1483_v10 = vpop.f32.mrf.mxu2 }
 0x17e   :  { %v2044_v31 = vsel %vm116_vm1, %v4467_v29, 0.0 }
 0x17f   :  { %v2045_v34 = vadd.f32 %v2044_v31, %v2043_v39  ;;  %v2271_v31 = vsel %vm141_vm0, %v2245_v40, 0 }
 0x180   :  { %2280 = vmatpush.bf16.msra.mxu1 %v2271_v31  ;;  %3342 = vmatmul.msk.bf16.gmra.mxu2 %vm2562_vm5, %v3398_v1 }
 0x181   :  { %v1616_v48 = vpop.f32.mrf.mxu3 }
 0x182   :  { %v1652_v53 = vadd.f32 %v1616_v48, %v1501_v46 }
 0x183   :  { %v1993_v58 = vpop.f32.mrf.mxu0 }
 0x184   :  { %v4474_v22 = vadd.f32 %v1990_v25, %v1652_v53 }
 0x186   :  { %v2046_v59 = vsel %vm116_vm1, %v4474_v22, 0.0 }
 0x187   :  { %v2047_v44 = vadd.f32 %v2046_v59, %v2045_v34  ;;  %v1485_v59 = vpop.f32.mrf.mxu2 }
 0x189   :  { %v1619_v0 = vpop.f32.mrf.mxu3 }
 0x18a   :  { %v1653_v61 = vadd.f32 %v1619_v0, %v4323_v15  ;;  %v1327_v15 = vpop.f32.mrf.mxu1 }
 0x18b   :  { %v1995_v2 = vpop.f32.mrf.mxu0  ;;  %v1355_v62 = vadd.f32 %v1327_v15, %v4362_v3 }
 0x18c   :  { %v4483_v4 = vadd.f32 %v1993_v58, %v1653_v61 }
 0x18d   :  { %v1506_v42 = vadd.f32 %v1478_v5, %v1355_v62 }
 0x18e   :  { %v2048_v19 = vsel %vm116_vm1, %v4483_v4, 0.0 }
 0x18f   :  { %v2049_v50 = vadd.f32 %v2048_v19, %v2047_v44  ;;  %v1488_v5 = vpop.f32.mrf.mxu2 }
 0x191   :  { %v1621_v12 = vpop.f32.mrf.mxu3 }
 0x192   :  { %v1654_v54 = vadd.f32 %v1621_v12, %v1503_v6  ;;  %v1329_v32 = vpop.f32.mrf.mxu1 }
 0x193   :  { %v1998_v13 = vpop.f32.mrf.mxu0  ;;  %v1356_v53 = vadd.f32 %v1329_v32, %v4379_v55  ;;  %v3399_v55 = vld [vmem:[%s5170_s1 + $0x30] sm:$0xff] }
 0x194   :  { %v4488_v17 = vadd.f32 %v1995_v2, %v1654_v54  ;;  %3343 = vmatmul.msk.bf16.gmra.mxu2 %vm2562_vm5, %v3399_v55 }
 0x195   :  { %v1507_v44 = vadd.f32 %v1480_v16, %v1356_v53 }
 0x196   :  { %v2050_v27 = vsel %vm116_vm1, %v4488_v17, 0.0 }
 0x197   :  { %v2051_v28 = vadd.f32 %v2050_v27, %v2049_v50 }
 0x199   :  { %v1624_v20 = vpop.f32.mrf.mxu3 }
 0x19a   :  { %v1655_v43 = vadd.f32 %v1624_v20, %v1504_v30  ;;  %v1332_v34 = vpop.f32.mrf.mxu1 }
 0x19b   :  { %v2000_v35 = vpop.f32.mrf.mxu0  ;;  %v1357_v8 = vadd.f32 %v1332_v34, %v4394_v37 }
 0x19c   :  { %v4497_v11 = vadd.f32 %v1998_v13, %v1655_v43  ;;  %v1490_v43 = vpop.f32.mrf.mxu2 }
 0x19d   :  { %v1508_v6 = vadd.f32 %v1483_v10, %v1357_v8 }
 0x19e   :  { %v2052_v26 = vsel %vm116_vm1, %v4497_v11, 0.0 }
 0x19f   :  { %v2053_v18 = vadd.f32 %v2052_v26, %v2051_v28 }
 0x1a1   :  { %v1626_v36 = vpop.f32.mrf.mxu3 }
 0x1a2   :  { %v1656_v7 = vadd.f32 %v1626_v36, %v1505_v14  ;;  %v1334_v61 = vpop.f32.mrf.mxu1 }
 0x1a3   :  { %v2003_v38 = vpop.f32.mrf.mxu0  ;;  %v1358_v37 = vadd.f32 %v1334_v61, %v4411_v45 }
 0x1a4   :  { %v4502_v39 = vadd.f32 %v2000_v35, %v1656_v7  ;;  %v3400_v7 = vld [vmem:[%s5170_s1 + $0x38] sm:$0xff]  ;;  %v1493_v10 = vpop.f32.mrf.mxu2 }
 0x1a5   :  { %v1509_v51 = vadd.f32 %v1485_v59, %v1358_v37  ;;  %3344 = vmatmul.msk.bf16.gmra.mxu2 %vm2562_vm5, %v3400_v7 }
 0x1a6   :  { %v2054_v57 = vsel %vm116_vm1, %v4502_v39, 0.0 }
 0x1a7   :  { %v2055_v25 = vadd.f32 %v2054_v57, %v2053_v18 }
 0x1a9   :  { %v1629_v46 = vpop.f32.mrf.mxu3 }
 0x1aa   :  { %v1657_v52 = vadd.f32 %v1629_v46, %v1506_v42  ;;  %v1337_v9 = vpop.f32.mrf.mxu1 }
 0x1ab   :  { %v2005_v3 = vpop.f32.mrf.mxu0  ;;  %v1359_v23 = vadd.f32 %v1337_v9, %v4420_v60 }
 0x1ac   :  { %v4515_v48 = vadd.f32 %v2003_v38, %v1657_v52 }
 0x1ad   :  { %v1510_v14 = vadd.f32 %v1488_v5, %v1359_v23 }
 0x1ae   :  { %v2056_v58 = vsel %vm116_vm1, %v4515_v48, 0.0 }
 0x1af   :  { %v2057_v63 = vadd.f32 %v2056_v58, %v2055_v25 }
 0x1b1   :  { %v1631_v47 = vpop.f32.mrf.mxu3 }
 0x1b2   :  { %v1658_v0 = vadd.f32 %v1631_v47, %v1507_v44  ;;  %v1339_v32 = vpop.f32.mrf.mxu1 }
 0x1b3   :  { %v2008_v49 = vpop.f32.mrf.mxu0  ;;  %v1360_v62 = vadd.f32 %v1339_v32, %v4429_v33  ;;  %v3449_v33 = vmov 128.0  }
 0x1b4   :  { %v4520_v2 = vadd.f32 %v2005_v3, %v1658_v0  ;;  %v1495_v3 = vpop.f32.mrf.mxu2  ;;  %3415 = vrcp.f32 %v3449_v33 }
 0x1b5   :  { %v1511_v1 = vadd.f32 %v1490_v43, %v1360_v62 }
 0x1b6   :  { %v2058_v19 = vsel %vm116_vm1, %v4520_v2, 0.0 }
 0x1b7   :  { %v2059_v50 = vadd.f32 %v2058_v19, %v2057_v63 }
 0x1b9   :  { %v1634_v12 = vpop.f32.mrf.mxu3 }
 0x1ba   :  { %v1659_v54 = vadd.f32 %v1634_v12, %v1508_v6  ;;  %v1342_v40 = vpop.f32.mrf.mxu1  ;;  %v3416_v8 = vpop.eup %3415 }
 0x1bb   :  { %v2010_v13 = vpop.f32.mrf.mxu0  ;;  %v1361_v46 = vadd.f32 %v1342_v40, %v4441_v24  ;;  %v2079_v5 = vmul.f32 128.0, %v3416_v8  ;;  %vm2083_vm6 = vweird.f32 %v3416_v8 }
 0x1bc   :  { %v4529_v15 = vadd.f32 %v2008_v49, %v1659_v54 }
 0x1bd   :  { %v1512_v58 = vadd.f32 %v1493_v10, %v1361_v46  ;;  %v2080_v9 = vsub.f32 1.0, %v2079_v5 }
 0x1be   :  { %v2060_v27 = vsel %vm116_vm1, %v4529_v15, 0.0 }
 0x1bf   :  { %v2061_v28 = vadd.f32 %v2060_v27, %v2059_v50  ;;  %v4552_v50 = vpop.f32.mrf.mxu2 }
 0x1c1   :  { %v1636_v30 = vpop.f32.mrf.mxu3 }
 0x1c2   :  { %v1660_v20 = vadd.f32 %v1636_v30, %v1509_v51  ;;  %v1344_v47 = vpop.f32.mrf.mxu1 }
 0x1c3   :  { %v2013_v35 = vpop.f32.mrf.mxu0  ;;  %v1362_v61 = vadd.f32 %v1344_v47, %v4444_v21  ;;  %v2081_v21 = vmul.f32 %v3416_v8, %v2080_v9 }
 0x1c4   :  { %v4534_v16 = vadd.f32 %v2010_v13, %v1660_v20 }
 0x1c5   :  { %v1513_v24 = vadd.f32 %v1495_v3, %v1362_v61  ;;  %v2082_v20 = vadd.f32 %v3416_v8, %v2081_v21 }
 0x1c6   :  { %v2062_v26 = vsel %vm116_vm1, %v4534_v16, 0.0 }
 0x1c7   :  { %v2063_v18 = vadd.f32 %v2062_v26, %v2061_v28  ;;  %v4555_v27 = vpop.f32.mrf.mxu2  ;;  %v4559_v26 = vsel %vm2083_vm6, %v3416_v8, %v2082_v20 }
 0x1c9   :  { %v1639_v45 = vpop.f32.mrf.mxu3 }
 0x1ca   :  { %v1661_v36 = vadd.f32 %v1639_v45, %v1510_v14 }
 0x1cb   :  { %v2015_v25 = vpop.f32.mrf.mxu0 }
 0x1cc   :  { %v4542_v38 = vadd.f32 %v2013_v35, %v1661_v36 }
 0x1ce   :  { %v2064_v60 = vsel %vm116_vm1, %v4542_v38, 0.0 }
 0x1cf   :  { %v2065_v57 = vadd.f32 %v2064_v60, %v2063_v18  ;;  %v4557_v35 = vpop.f32.mrf.mxu2 }
 0x1d1   :  { %v1641_v42 = vpop.f32.mrf.mxu3 }
 0x1d2   :  { %v1662_v31 = vadd.f32 %v1641_v42, %v1511_v1 }
 0x1d3   :  { %v2018_v59 = vpop.f32.mrf.mxu0 }
 0x1d4   :  { %v2036_v34 = vadd.f32 %v2015_v25, %v1662_v31 }
 0x1d6   :  { %v2066_v52 = vsel %vm116_vm1, %v2036_v34, 0.0 }
 0x1d7   :  { %v2067_v53 = vadd.f32 %v2066_v52, %v2065_v57  ;;  %v4574_v10 = vpop.f32.mrf.mxu2 }
 0x1d9   :  { %v1644_v63 = vpop.f32.mrf.mxu3 }
 0x1da   :  { %v1663_v44 = vadd.f32 %v1644_v63, %v1512_v58 }
 0x1db   :  { %v2020_v12 = vpop.f32.mrf.mxu0 }
 0x1dc   :  { %v2037_v0 = vadd.f32 %v2018_v59, %v1663_v44 }
 0x1de   :  { %v2068_v49 = vsel %vm116_vm1, %v2037_v0, 0.0 }
 0x1df   :  { %v2069_v19 = vadd.f32 %v2068_v49, %v2067_v53  ;;  %v4619_v40 = vpop.f32.mrf.mxu2 }
 0x1e1   :  { %v1646_v55 = vpop.f32.mrf.mxu3 }
 0x1e2   :  { %v1664_v6 = vadd.f32 %v1646_v55, %v1513_v24 }
 0x1e4   :  { %v2038_v54 = vadd.f32 %v2020_v12, %v1664_v6 }
 0x1e6   :  { %v2070_v13 = vsel %vm116_vm1, %v2038_v54, 0.0 }
 0x1e7   :  { %v2071_v37 = vadd.f32 %v2070_v13, %v2069_v19  ;;  %v4633_v47 = vpop.f32.mrf.mxu2 }
 0x1e9   :  { %v2072_v28 = vrot.slane %v2071_v37, 4 }
 0x1eb   :  { %v2073_v51 = vadd.f32 %v2072_v28, %v2071_v37 }
 0x1ed   :  { %v2074_v30 = vrot.slane %v2073_v51, 2 }
 0x1ef   :  { %v2075_v43 = vadd.f32 %v2074_v30, %v2073_v51  ;;  %v4647_v9 = vpop.f32.mrf.mxu2 }
 0x1f1   :  { %v2076_v23 = vrot.slane %v2075_v43, 1 }
 0x1f3   :  { %v2077_v32 = vadd.f32 %v2076_v23, %v2075_v43 }
 0x1f5   :  { %v2085_v18 = vmul.f32 %v4559_v26, %v2077_v32 }
 0x1f7   :  { %v4563_v14 = vsub.f32 %v4451_v56, %v2085_v18  ;;  %v4566_v45 = vsub.f32 %v4456_v41, %v2085_v18  ;;  %v4569_v36 = vsub.f32 %v4467_v29, %v2085_v18  ;;  %v4572_v7 = vsub.f32 %v4474_v22, %v2085_v18 }
 0x1f8   :  { %v4577_v62 = vsub.f32 %v4483_v4, %v2085_v18  ;;  %v4580_v60 = vsub.f32 %v4488_v17, %v2085_v18  ;;  %v4583_v56 = vsub.f32 %v4497_v11, %v2085_v18  ;;  %v4586_v41 = vsub.f32 %v4502_v39, %v2085_v18 }
 0x1f9   :  { %v4589_v29 = vsub.f32 %v4515_v48, %v2085_v18  ;;  %v4592_v22 = vsub.f32 %v4520_v2, %v2085_v18  ;;  %v4595_v57 = vsub.f32 %v4529_v15, %v2085_v18  ;;  %v4598_v4 = vsub.f32 %v4534_v16, %v2085_v18 }
 0x1fa   :  { %v4601_v17 = vsub.f32 %v4542_v38, %v2085_v18  ;;  %v4603_v11 = vsub.f32 %v2036_v34, %v2085_v18  ;;  %v4605_v25 = vsub.f32 %v2037_v0, %v2085_v18  ;;  %v4607_v39 = vsub.f32 %v2038_v54, %v2085_v18 }
 0x1fb   :  { %v2102_v48 = vmul.f32 %v4563_v14, %v4563_v14  ;;  %v2103_v2 = vmul.f32 %v4566_v45, %v4566_v45  ;;  %v2104_v15 = vmul.f32 %v4569_v36, %v4569_v36  ;;  %v2105_v16 = vmul.f32 %v4572_v7, %v4572_v7 }
 0x1fc   :  { %v2106_v31 = vmul.f32 %v4577_v62, %v4577_v62  ;;  %v2107_v52 = vmul.f32 %v4580_v60, %v4580_v60  ;;  %v2108_v58 = vmul.f32 %v4583_v56, %v4583_v56  ;;  %v2109_v33 = vmul.f32 %v4586_v41, %v4586_v41 }
 0x1fd   :  { %v2118_v38 = vsel %vm116_vm1, %v2102_v48, 0.0  ;;  %v2119_v1 = vsel %vm116_vm1, %v2103_v2, 0.0  ;;  %v2121_v34 = vsel %vm116_vm1, %v2104_v15, 0.0  ;;  %v2123_v3 = vsel %vm116_vm1, %v2105_v16, 0.0  ;;  %v4661_v15 = vpop.f32.mrf.mxu2 }
 0x1fe   :  { %v2120_v42 = vadd.f32 %v2119_v1, %v2118_v38  ;;  %v2125_v59 = vsel %vm116_vm1, %v2106_v31, 0.0  ;;  %v2127_v44 = vsel %vm116_vm1, %v2107_v52, 0.0  ;;  %v2110_v61 = vmul.f32 %v4589_v29, %v4589_v29 }
 0x1ff   :  { %v2129_v49 = vsel %vm116_vm1, %v2108_v58, 0.0  ;;  %v2111_v19 = vmul.f32 %v4592_v22, %v4592_v22  ;;  %v2131_v24 = vsel %vm116_vm1, %v2109_v33, 0.0  ;;  %v2112_v6 = vmul.f32 %v4595_v57, %v4595_v57 }
 0x200   :  { %v2122_v46 = vadd.f32 %v2121_v34, %v2120_v42  ;;  %v2133_v5 = vsel %vm116_vm1, %v2110_v61, 0.0  ;;  %v2113_v54 = vmul.f32 %v4598_v4, %v4598_v4  ;;  %v2114_v28 = vmul.f32 %v4601_v17, %v4601_v17 }
 0x201   :  { %v2135_v13 = vsel %vm116_vm1, %v2111_v19, 0.0  ;;  %v2137_v21 = vsel %vm116_vm1, %v2112_v6, 0.0  ;;  %v2115_v30 = vmul.f32 %v4603_v11, %v4603_v11  ;;  %v2116_v23 = vmul.f32 %v4605_v25, %v4605_v25 }
 0x202   :  { %v2124_v53 = vadd.f32 %v2123_v3, %v2122_v46  ;;  %v2139_v20 = vsel %vm116_vm1, %v2113_v54, 0.0  ;;  %v2141_v32 = vsel %vm116_vm1, %v2114_v28, 0.0  ;;  %v2117_v48 = vmul.f32 %v4607_v39, %v4607_v39 }
 0x203   :  { %v2143_v2 = vsel %vm116_vm1, %v2115_v30, 0.0  ;;  %v2145_v38 = vsel %vm116_vm1, %v2116_v23, 0.0  ;;  %v2639_v58 = vsel %vm2324_vm7, %v4555_v27, 0.0 }
 0x204   :  { %v2126_v63 = vadd.f32 %v2125_v59, %v2124_v53  ;;  %v2147_v42 = vsel %vm116_vm1, %v2117_v48, 0.0  ;;  %v2638_v53 = vsel %vm2324_vm7, %v4552_v50, 0.0  ;;  %v2641_v59 = vsel %vm2324_vm7, %v4557_v35, 0.0 }
 0x205   :  { %v4665_v46 = vpop.f32.mrf.mxu2  ;;  %v2640_v33 = vadd.f32 %v2639_v58, %v2638_v53 }
 0x206   :  { %v2128_v0 = vadd.f32 %v2127_v44, %v2126_v63  ;;  %v2643_v44 = vsel %vm2324_vm7, %v4574_v10, 0.0  ;;  %v2653_v23 = vsel %vm2324_vm7, %v4665_v46, 0.0 }
 0x207   :  { %v2642_v61 = vadd.f32 %v2641_v59, %v2640_v33  ;;  %v4714_v59 = vld [vmem:[%s5173_s4] ss:$0 sm:$0xff] }
 0x208   :  { %v2130_v8 = vadd.f32 %v2129_v49, %v2128_v0  ;;  %v2645_v49 = vsel %vm2324_vm7, %v4619_v40, 0.0 }
 0x20a   :  { %v2132_v55 = vadd.f32 %v2131_v24, %v2130_v8  ;;  %v2644_v24 = vadd.f32 %v2643_v44, %v2642_v61 }
 0x20c   :  { %v2134_v12 = vadd.f32 %v2133_v5, %v2132_v55  ;;  %v2646_v6 = vadd.f32 %v2645_v49, %v2644_v24  ;;  %v2647_v5 = vsel %vm2324_vm7, %v4633_v47, 0.0 }
 0x20d   :  { %v4677_v8 = vpop.f32.mrf.mxu2 }
 0x20e   :  { %v2136_v37 = vadd.f32 %v2135_v13, %v2134_v12  ;;  %v2648_v54 = vadd.f32 %v2647_v5, %v2646_v6  ;;  %v2649_v13 = vsel %vm2324_vm7, %v4647_v9, 0.0 }
 0x210   :  { %v2138_v51 = vadd.f32 %v2137_v21, %v2136_v37  ;;  %v2650_v28 = vadd.f32 %v2649_v13, %v2648_v54  ;;  %v2651_v21 = vsel %vm2324_vm7, %v4661_v15, 0.0 }
 0x212   :  { %v2140_v43 = vadd.f32 %v2139_v20, %v2138_v51  ;;  %v2652_v20 = vadd.f32 %v2651_v21, %v2650_v28 }
 0x214   :  { %v2142_v18 = vadd.f32 %v2141_v32, %v2140_v43  ;;  %v2654_v48 = vadd.f32 %v2653_v23, %v2652_v20 }
 0x215   :  { %v4684_v37 = vpop.f32.mrf.mxu2 }
 0x216   :  { %v2144_v16 = vadd.f32 %v2143_v2, %v2142_v18 }
 0x218   :  { %v2146_v1 = vadd.f32 %v2145_v38, %v2144_v16  ;;  %v2655_v16 = vsel %vm2324_vm7, %v4677_v8, 0.0 }
 0x21a   :  { %v2148_v31 = vadd.f32 %v2147_v42, %v2146_v1  ;;  %v4697_v1 = vld [vmem:[%s5172_s3] ss:$0 sm:$0xff]  ;;  %v2656_v42 = vadd.f32 %v2655_v16, %v2654_v48 }
 0x21c   :  { %v2149_v34 = vrot.slane %v2148_v31, 4 }
 0x21d   :  { %v4690_v32 = vpop.f32.mrf.mxu2 }
 0x21e   :  { %v2150_v52 = vadd.f32 %v2149_v34, %v2148_v31  ;;  %v2657_v34 = vsel %vm2324_vm7, %v4684_v37, 0.0 }
 0x220   :  { %v2151_v3 = vrot.slane %v2150_v52, 2 }
 0x222   :  { %v2152_v63 = vadd.f32 %v2151_v3, %v2150_v52 }
 0x224   :  { %v2153_v0 = vrot.slane %v2152_v63, 1 }
 0x225   :  { %v4703_v52 = vpop.f32.mrf.mxu2 }
 0x226   :  { %v2154_v19 = vadd.f32 %v2153_v0, %v2152_v63  ;;  %v2658_v0 = vadd.f32 %v2657_v34, %v2656_v42  ;;  %v2661_v5 = vsel %vm2324_vm7, %v4703_v52, 0.0 }
 0x228   :  { %v2155_v55 = vmul.f32 %v2154_v19, %v4559_v26 }
 0x22a   :  { %v2156_v12 = vadd.f32 1e-05, %v2155_v55 }
 0x22c   :  { %3417 = vrsqrt.f32 %v2156_v12  ;;  %vm2163_vm9 = vweird.f32 %v2156_v12 }
 0x232   :  { %v3418_v51 = vpop.eup %3417 }
 0x233   :  { %v2158_v30 = vmul.f32 %v3418_v51, %v2156_v12  ;;  %vm2164_vm8 = vweird.f32 %v3418_v51  ;;  %v4730_v12 = vpop.f32.mrf.mxu2 }
 0x234   :  { %vm2165_vm10 = vmor %vm2163_vm9, %vm2164_vm8  ;;  %v2663_v48 = vsel %vm2324_vm7, %v4730_v12, 0.0 }
 0x235   :  { %v2159_v43 = vmul.f32 %v3418_v51, %v2158_v30 }
 0x237   :  { %v2160_v18 = vmul.f32 0.5, %v2159_v43 }
 0x239   :  { %v2161_v2 = vsub.f32 1.5, %v2160_v18 }
 0x23b   :  { %v2162_v38 = vmul.f32 %v3418_v51, %v2161_v2  ;;  %v4761_v34 = vpop.f32.mrf.mxu2 }
 0x23d   :  { %v4699_v31 = vsel %vm2165_vm10, %v3418_v51, %v2162_v38 }
 0x23e   :  { %v2182_v3 = vmul.f32 %v4699_v31, %v4607_v39  ;;  %v2167_v53 = vmul.f32 %v4699_v31, %v4563_v14  ;;  %v2168_v58 = vmul.f32 %v4699_v31, %v4566_v45  ;;  %v2659_v39 = vsel %vm2324_vm7, %v4690_v32, 0.0 }
 0x23f   :  { %v2169_v14 = vmul.f32 %v4699_v31, %v4569_v36  ;;  %v2170_v49 = vmul.f32 %v4699_v31, %v4572_v7  ;;  %v2660_v55 = vadd.f32 %v2659_v39, %v2658_v0  ;;  %v2175_v36 = vmul.f32 %v4699_v31, %v4589_v29 }
 0x240   :  { %v2201_v63 = vmul.f32 %v4697_v1, %v2182_v3  ;;  %v2186_v33 = vmul.f32 %v4697_v1, %v2167_v53  ;;  %v2187_v44 = vmul.f32 %v4697_v1, %v2168_v58  ;;  %v2176_v7 = vmul.f32 %v4699_v31, %v4592_v22 }
 0x241   :  { %v2188_v6 = vmul.f32 %v4697_v1, %v2169_v14  ;;  %v2189_v13 = vmul.f32 %v4697_v1, %v2170_v49  ;;  %v2662_v28 = vadd.f32 %v2661_v5, %v2660_v55  ;;  %v2194_v21 = vmul.f32 %v4697_v1, %v2175_v36 }
 0x242   :  { %v2205_v45 = vadd.f32 %v4714_v59, %v2186_v33  ;;  %v2206_v61 = vadd.f32 %v4714_v59, %v2187_v44  ;;  %v2177_v51 = vmul.f32 %v4699_v31, %v4595_v57  ;;  %v2178_v20 = vmul.f32 %v4699_v31, %v4598_v4 }
 0x243   :  { %v2207_v30 = vadd.f32 %v4714_v59, %v2188_v6  ;;  %v2179_v29 = vmul.f32 %v4699_v31, %v4601_v17  ;;  %v2180_v43 = vmul.f32 %v4699_v31, %v4603_v11  ;;  %v2195_v23 = vmul.f32 %v4697_v1, %v2176_v7 }
 0x244   :  { %v2221_v19 = vmax.f32 %v2205_v45, 0.0  ;;  %v2222_v24 = vmax.f32 %v2206_v61, 0.0  ;;  %v2213_v22 = vadd.f32 %v4714_v59, %v2194_v21  ;;  %v2196_v18 = vmul.f32 %v4697_v1, %v2177_v51 }
 0x245   :  { %v2181_v57 = vmul.f32 %v4699_v31, %v4605_v25  ;;  %v2197_v4 = vmul.f32 %v4697_v1, %v2178_v20  ;;  %v2198_v2 = vmul.f32 %v4697_v1, %v2179_v29  ;;  %v2199_v17 = vmul.f32 %v4697_v1, %v2180_v43 }
 0x246   :  { %v2237_v54 = vpack.c.bf16 %v2222_v24, %v2221_v19  ;;  %v2214_v11 = vadd.f32 %v4714_v59, %v2195_v23  ;;  %v2229_v16 = vmax.f32 %v2213_v22, 0.0  ;;  %v2215_v38 = vadd.f32 %v4714_v59, %v2196_v18 }
 0x247   :  { %v2200_v42 = vmul.f32 %v4697_v1, %v2181_v57  ;;  %v2216_v25 = vadd.f32 %v4714_v59, %v2197_v4  ;;  %v2217_v3 = vadd.f32 %v4714_v59, %v2198_v2  ;;  %v2218_v53 = vadd.f32 %v4714_v59, %v2199_v17 }
 0x248   :  { %3293 = vmatmul.msk.bf16.vlgmr.msra.gmra.mxu1 %vm116_vm1, %v2237_v54  ;;  %v2220_v58 = vadd.f32 %v4714_v59, %v2201_v63  ;;  %v2208_v33 = vadd.f32 %v4714_v59, %v2189_v13  ;;  %v2230_v44 = vmax.f32 %v2214_v11, 0.0  ;;  %v2231_v0 = vmax.f32 %v2215_v38, 0.0 }
 0x249   :  { %v2219_v39 = vadd.f32 %v4714_v59, %v2200_v42  ;;  %v2664_v14 = vadd.f32 %v2663_v48, %v2662_v28  ;;  %v2232_v45 = vmax.f32 %v2216_v25, 0.0  ;;  %v2233_v61 = vmax.f32 %v2217_v3, 0.0  ;;  %v4779_v28 = vpop.f32.mrf.mxu2 }
 0x24a   :  { %v2234_v49 = vmax.f32 %v2218_v53, 0.0  ;;  %v2665_v19 = vsel %vm2324_vm7, %v4761_v34, 0.0  ;;  %v4771_v24 = vpack.c.bf16 %v2230_v44, %v2229_v16  ;;  %v2236_v6 = vmax.f32 %v2220_v58, 0.0 }
 0x24b   :  { %v2235_v55 = vmax.f32 %v2219_v39, 0.0  ;;  %v4773_v5 = vpack.c.bf16 %v2232_v45, %v2231_v0  ;;  %v2223_v54 = vmax.f32 %v2207_v30, 0.0  ;;  %v2224_v36 = vmax.f32 %v2208_v33, 0.0 }
 0x24c   :  { %v4775_v63 = vpack.c.bf16 %v2234_v49, %v2233_v61  ;;  %v2666_v7 = vadd.f32 %v2665_v19, %v2664_v14  ;;  %v2171_v51 = vmul.f32 %v4699_v31, %v4577_v62  ;;  %v2172_v20 = vmul.f32 %v4699_v31, %v4580_v60 }
 0x24d   :  { %v4777_v13 = vpack.c.bf16 %v2236_v6, %v2235_v55  ;;  %v2238_v21 = vpack.c.bf16 %v2224_v36, %v2223_v54  ;;  %v2667_v29 = vsel %vm2324_vm7, %v4779_v28, 0.0  ;;  %v2173_v42 = vmul.f32 %v4699_v31, %v4583_v56 }
 0x24e   :  { %v2668_v43 = vadd.f32 %v2667_v29, %v2666_v7  ;;  %v2190_v23 = vmul.f32 %v4697_v1, %v2171_v51  ;;  %v2191_v22 = vmul.f32 %v4697_v1, %v2172_v20  ;;  %v2174_v25 = vmul.f32 %v4699_v31, %v4586_v41 }
 0x24f   :  { %v2192_v44 = vmul.f32 %v4697_v1, %v2173_v42 }
 0x250   :  { %v2669_v30 = vrot.slane %v2668_v43, 4  ;;  %v2209_v48 = vadd.f32 %v4714_v59, %v2190_v23  ;;  %v2210_v62 = vadd.f32 %v4714_v59, %v2191_v22  ;;  %v2193_v56 = vmul.f32 %v4697_v1, %v2174_v25 }
 0x252   :  { %v2670_v18 = vadd.f32 %v2669_v30, %v2668_v43  ;;  %v2225_v60 = vmax.f32 %v2209_v48, 0.0  ;;  %v2226_v17 = vmax.f32 %v2210_v62, 0.0  ;;  %v2212_v0 = vadd.f32 %v4714_v59, %v2193_v56 }
 0x254   :  { %v2671_v57 = vrot.slane %v2670_v18, 2  ;;  %v2239_v38 = vpack.c.bf16 %v2226_v17, %v2225_v60  ;;  %v2228_v6 = vmax.f32 %v2212_v0, 0.0 }
 0x256   :  { %v2672_v4 = vadd.f32 %v2671_v57, %v2670_v18 }
 0x258   :  { %3294 = vmatmul.msk.bf16.gmra.mxu1 %vm116_vm1, %v2238_v21  ;;  %v2673_v2 = vrot.slane %v2672_v4, 1 }
 0x25a   :  { %v2674_v11 = vadd.f32 %v2673_v2, %v2672_v4 }
 0x25c   :  { %v2675_v16 = vmul.f32 %v2674_v11, %v4559_v26 }
 0x25e   :  { %v4798_v3 = vsub.f32 %v4552_v50, %v2675_v16  ;;  %v4801_v53 = vsub.f32 %v4555_v27, %v2675_v16  ;;  %v4804_v58 = vsub.f32 %v4557_v35, %v2675_v16  ;;  %v4808_v33 = vsub.f32 %v4574_v10, %v2675_v16 }
 0x25f   :  { %v4813_v41 = vsub.f32 %v4619_v40, %v2675_v16  ;;  %v4822_v31 = vsub.f32 %v4633_v47, %v2675_v16  ;;  %v4827_v1 = vsub.f32 %v4647_v9, %v2675_v16  ;;  %v2211_v40 = vadd.f32 %v4714_v59, %v2192_v44 }
 0x260   :  { %v2692_v50 = vmul.f32 %v4798_v3, %v4798_v3  ;;  %v2693_v27 = vmul.f32 %v4801_v53, %v4801_v53  ;;  %v2694_v35 = vmul.f32 %v4804_v58, %v4804_v58  ;;  %v2695_v10 = vmul.f32 %v4808_v33, %v4808_v33 }
 0x261   :  { %v2696_v39 = vmul.f32 %v4813_v41, %v4813_v41  ;;  %v4837_v49 = vsub.f32 %v4661_v15, %v2675_v16  ;;  %v2697_v9 = vmul.f32 %v4822_v31, %v4822_v31  ;;  %v2227_v59 = vmax.f32 %v2211_v40, 0.0 }
 0x262   :  { %v2708_v14 = vsel %vm2324_vm7, %v2692_v50, 0.0  ;;  %v2709_v45 = vsel %vm2324_vm7, %v2693_v27, 0.0  ;;  %v2711_v47 = vsel %vm2324_vm7, %v2694_v35, 0.0  ;;  %v2713_v19 = vsel %vm2324_vm7, %v2695_v10, 0.0 }
 0x263   :  { %v2710_v61 = vadd.f32 %v2709_v45, %v2708_v14  ;;  %v4843_v54 = vsub.f32 %v4665_v46, %v2675_v16  ;;  %v2698_v36 = vmul.f32 %v4827_v1, %v4827_v1  ;;  %v2715_v7 = vsel %vm2324_vm7, %v2696_v39, 0.0 }
 0x264   :  { %v4849_v15 = vsub.f32 %v4677_v8, %v2675_v16  ;;  %v2699_v51 = vmul.f32 %v4837_v49, %v4837_v49  ;;  %v2717_v20 = vsel %vm2324_vm7, %v2697_v9, 0.0  ;;  %v2240_v43 = vpack.c.bf16 %v2228_v6, %v2227_v59 }
 0x265   :  { %v2712_v55 = vadd.f32 %v2711_v47, %v2710_v61  ;;  %v2686_v30 = vsub.f32 %v4684_v37, %v2675_v16  ;;  %v2700_v46 = vmul.f32 %v4843_v54, %v4843_v54  ;;  %v2719_v23 = vsel %vm2324_vm7, %v2698_v36, 0.0 }
 0x266   :  { %v2687_v8 = vsub.f32 %v4690_v32, %v2675_v16  ;;  %v2701_v18 = vmul.f32 %v4849_v15, %v4849_v15  ;;  %v2721_v57 = vsel %vm2324_vm7, %v2699_v51, 0.0  ;;  %v4864_v62 = vsub.f32 %v4703_v52, %v2675_v16 }
 0x267   :  { %v2714_v21 = vadd.f32 %v2713_v19, %v2712_v55  ;;  %v2702_v37 = vmul.f32 %v2686_v30, %v2686_v30  ;;  %v2723_v4 = vsel %vm2324_vm7, %v2700_v46, 0.0  ;;  %v4868_v60 = vsub.f32 %v4730_v12, %v2675_v16 }
 0x268   :  { %3295 = vmatmul.msk.bf16.gmra.mxu1 %vm116_vm1, %v2239_v38  ;;  %v2703_v17 = vmul.f32 %v2687_v8, %v2687_v8  ;;  %v2725_v11 = vsel %vm2324_vm7, %v2701_v18, 0.0  ;;  %v4872_v38 = vsub.f32 %v4761_v34, %v2675_v16  ;;  %v2704_v42 = vmul.f32 %v4864_v62, %v4864_v62 }
 0x269   :  { %v2716_v29 = vadd.f32 %v2715_v7, %v2714_v21  ;;  %v2727_v52 = vsel %vm2324_vm7, %v2702_v37, 0.0  ;;  %v4878_v44 = vsub.f32 %v4779_v28, %v2675_v16  ;;  %v2705_v12 = vmul.f32 %v4868_v60, %v4868_v60 }
 0x26a   :  { %v2729_v56 = vsel %vm2324_vm7, %v2703_v17, 0.0  ;;  %v2706_v27 = vmul.f32 %v4872_v38, %v4872_v38  ;;  %v2731_v34 = vsel %vm2324_vm7, %v2704_v42, 0.0 }
 0x26b   :  { %v2718_v22 = vadd.f32 %v2717_v20, %v2716_v29  ;;  %v2707_v10 = vmul.f32 %v4878_v44, %v4878_v44  ;;  %v2733_v40 = vsel %vm2324_vm7, %v2705_v12, 0.0 }
 0x26c   :  { %v2735_v28 = vsel %vm2324_vm7, %v2706_v27, 0.0 }
 0x26d   :  { %v2720_v48 = vadd.f32 %v2719_v23, %v2718_v22  ;;  %v2737_v39 = vsel %vm2324_vm7, %v2707_v10, 0.0 }
 0x26f   :  { %v2722_v2 = vadd.f32 %v2721_v57, %v2720_v48 }
 0x271   :  { %v2724_v32 = vadd.f32 %v2723_v4, %v2722_v2 }
 0x273   :  { %v2726_v25 = vadd.f32 %v2725_v11, %v2724_v32 }
 0x275   :  { %v2728_v50 = vadd.f32 %v2727_v52, %v2726_v25 }
 0x277   :  { %v2730_v35 = vadd.f32 %v2729_v56, %v2728_v50 }
 0x278   :  { %3296 = vmatmul.msk.bf16.gmra.mxu1 %vm116_vm1, %v2240_v43 }
 0x279   :  { %v2732_v0 = vadd.f32 %v2731_v34, %v2730_v35 }
 0x27b   :  { %v2734_v16 = vadd.f32 %v2733_v40, %v2732_v0 }
 0x27d   :  { %v2736_v14 = vadd.f32 %v2735_v28, %v2734_v16 }
 0x27f   :  { %v2738_v45 = vadd.f32 %v2737_v39, %v2736_v14 }
 0x281   :  { %v2739_v47 = vrot.slane %v2738_v45, 4 }
 0x283   :  { %v2740_v61 = vadd.f32 %v2739_v47, %v2738_v45 }
 0x285   :  { %v2741_v9 = vrot.slane %v2740_v61, 2 }
 0x287   :  { %v2742_v19 = vadd.f32 %v2741_v9, %v2740_v61 }
 0x288   :  { %3297 = vmatmul.msk.bf16.gmra.mxu1 %vm116_vm1, %v4771_v24 }
 0x289   :  { %v2743_v55 = vrot.slane %v2742_v19, 1 }
 0x28b   :  { %v2744_v59 = vadd.f32 %v2743_v55, %v2742_v19 }
 0x28d   :  { %v2745_v6 = vmul.f32 %v2744_v59, %v4559_v26 }
 0x28f   :  { %v2746_v36 = vadd.f32 1e-05, %v2745_v6 }
 0x291   :  { %3419 = vrsqrt.f32 %v2746_v36  ;;  %vm2753_vm11 = vweird.f32 %v2746_v36 }
 0x297   :  { %v3420_v7 = vpop.eup %3419 }
 0x298   :  { %3298 = vmatmul.msk.bf16.gmra.mxu1 %vm116_vm1, %v4773_v5  ;;  %v2748_v21 = vmul.f32 %v3420_v7, %v2746_v36  ;;  %vm2754_vm12 = vweird.f32 %v3420_v7 }
 0x299   :  { %vm2755_vm13 = vmor %vm2753_vm11, %vm2754_vm12 }
 0x29a   :  { %v2749_v24 = vmul.f32 %v3420_v7, %v2748_v21 }
 0x29c   :  { %v2750_v51 = vmul.f32 0.5, %v2749_v24 }
 0x29e   :  { %v2751_v20 = vsub.f32 1.5, %v2750_v51 }
 0x2a0   :  { %v2752_v29 = vmul.f32 %v3420_v7, %v2751_v20 }
 0x2a2   :  { %v4898_v43 = vsel %vm2755_vm13, %v3420_v7, %v2752_v29 }
 0x2a3   :  { %v4902_v5 = vmul.f32 %v4898_v43, %v4822_v31  ;;  %v4906_v46 = vmul.f32 %v4898_v43, %v4827_v1  ;;  %v4909_v23 = vmul.f32 %v4898_v43, %v2686_v30 }
 0x2a8   :  { %3299 = vmatmul.msk.bf16.gmra.mxu1 %vm116_vm1, %v4775_v63  ;;  %v4912_v63 = vmul.f32 %v4898_v43, %v2687_v8 }
 0x2b8   :  { %3300 = vmatmul.msk.bf16.gmra.mxu1 %vm116_vm1, %v4777_v13 }
 0x2c5   :  { %v2282_v22 = vpop.f32.mrf.mxu1 }
 0x2c6   :  { %v2325_v13 = vsel %vm2324_vm7, %v2282_v22, 0.0 }
 0x2cd   :  { %v2284_v18 = vpop.f32.mrf.mxu1 }
 0x2ce   :  { %v2326_v11 = vsel %vm2324_vm7, %v2284_v18, 0.0 }
 0x2cf   :  { %v2327_v42 = vadd.f32 %v2326_v11, %v2325_v13 }
 0x2d5   :  { %v2287_v57 = vpop.f32.mrf.mxu1 }
 0x2d6   :  { %v2328_v32 = vsel %vm2324_vm7, %v2287_v57, 0.0 }
 0x2d7   :  { %v2329_v25 = vadd.f32 %v2328_v32, %v2327_v42 }
 0x2dd   :  { %v2289_v48 = vpop.f32.mrf.mxu1 }
 0x2de   :  { %v2330_v52 = vsel %vm2324_vm7, %v2289_v48, 0.0 }
 0x2df   :  { %v2331_v50 = vadd.f32 %v2330_v52, %v2329_v25 }
 0x2e5   :  { %v2292_v37 = vpop.f32.mrf.mxu1 }
 0x2e6   :  { %v2332_v56 = vsel %vm2324_vm7, %v2292_v37, 0.0 }
 0x2e7   :  { %v2333_v34 = vadd.f32 %v2332_v56, %v2331_v50 }
 0x2ed   :  { %v2294_v31 = vpop.f32.mrf.mxu1 }
 0x2ee   :  { %v2334_v27 = vsel %vm2324_vm7, %v2294_v31, 0.0 }
 0x2ef   :  { %v2335_v10 = vadd.f32 %v2334_v27, %v2333_v34 }
 0x2f5   :  { %v2297_v4 = vpop.f32.mrf.mxu1 }
 0x2f6   :  { %v2336_v35 = vsel %vm2324_vm7, %v2297_v4, 0.0 }
 0x2f7   :  { %v2337_v0 = vadd.f32 %v2336_v35, %v2335_v10 }
 0x2fd   :  { %v4916_v2 = vpop.f32.mrf.mxu1 }
 0x2fe   :  { %v2338_v40 = vsel %vm2324_vm7, %v4916_v2, 0.0 }
 0x2ff   :  { %v2339_v39 = vadd.f32 %v2338_v40, %v2337_v0 }
 0x305   :  { %v4918_v1 = vpop.f32.mrf.mxu1 }
 0x306   :  { %v2340_v16 = vsel %vm2324_vm7, %v4918_v1, 0.0 }
 0x307   :  { %v2341_v45 = vadd.f32 %v2340_v16, %v2339_v39 }
 0x30d   :  { %v4920_v17 = vpop.f32.mrf.mxu1 }
 0x30e   :  { %v2342_v14 = vsel %vm2324_vm7, %v4920_v17, 0.0 }
 0x30f   :  { %v2343_v61 = vadd.f32 %v2342_v14, %v2341_v45 }
 0x315   :  { %v4922_v30 = vpop.f32.mrf.mxu1 }
 0x316   :  { %v2344_v47 = vsel %vm2324_vm7, %v4922_v30, 0.0 }
 0x317   :  { %v2345_v19 = vadd.f32 %v2344_v47, %v2343_v61 }
 0x31d   :  { %v4924_v8 = vpop.f32.mrf.mxu1 }
 0x31e   :  { %v2346_v9 = vsel %vm2324_vm7, %v4924_v8, 0.0 }
 0x31f   :  { %v2347_v6 = vadd.f32 %v2346_v9, %v2345_v19 }
 0x325   :  { %v4930_v12 = vpop.f32.mrf.mxu1 }
 0x326   :  { %v2348_v59 = vsel %vm2324_vm7, %v4930_v12, 0.0 }
 0x327   :  { %v2349_v7 = vadd.f32 %v2348_v59, %v2347_v6 }
 0x32d   :  { %v4937_v28 = vpop.f32.mrf.mxu1 }
 0x32e   :  { %v2350_v36 = vsel %vm2324_vm7, %v4937_v28, 0.0 }
 0x32f   :  { %v2351_v24 = vadd.f32 %v2350_v36, %v2349_v7 }
 0x335   :  { %v4947_v55 = vpop.f32.mrf.mxu1 }
 0x336   :  { %v2352_v21 = vsel %vm2324_vm7, %v4947_v55, 0.0 }
 0x337   :  { %v2353_v51 = vadd.f32 %v2352_v21, %v2351_v24 }
 0x33d   :  { %v2319_v20 = vpop.f32.mrf.mxu1 }
 0x33e   :  { %v2354_v29 = vsel %vm2324_vm7, %v2319_v20, 0.0 }
 0x33f   :  { %v2355_v11 = vadd.f32 %v2354_v29, %v2353_v51 }
 0x341   :  { %v2356_v13 = vrot.slane %v2355_v11, 4 }
 0x343   :  { %v2357_v32 = vadd.f32 %v2356_v13, %v2355_v11 }
 0x345   :  { %v2358_v42 = vrot.slane %v2357_v32, 2 }
 0x347   :  { %v2359_v52 = vadd.f32 %v2358_v42, %v2357_v32 }
 0x349   :  { %v2360_v25 = vrot.slane %v2359_v52, 1 }
 0x34b   :  { %v2361_v56 = vadd.f32 %v2360_v25, %v2359_v52 }
 0x34d   :  { %v2362_v50 = vmul.f32 %v2361_v56, %v4559_v26 }
 0x34f   :  { %v4957_v27 = vsub.f32 %v2282_v22, %v2362_v50  ;;  %v4959_v34 = vsub.f32 %v2284_v18, %v2362_v50  ;;  %v4961_v35 = vsub.f32 %v2287_v57, %v2362_v50  ;;  %v4963_v10 = vsub.f32 %v2289_v48, %v2362_v50 }
 0x350   :  { %v4969_v16 = vsub.f32 %v2292_v37, %v2362_v50  ;;  %v4973_v14 = vsub.f32 %v2294_v31, %v2362_v50  ;;  %v4979_v45 = vsub.f32 %v2297_v4, %v2362_v50  ;;  %v4985_v9 = vsub.f32 %v4916_v2, %v2362_v50 }
 0x351   :  { %v2379_v40 = vmul.f32 %v4957_v27, %v4957_v27  ;;  %v2380_v0 = vmul.f32 %v4959_v34, %v4959_v34  ;;  %v2381_v39 = vmul.f32 %v4961_v35, %v4961_v35  ;;  %v2382_v22 = vmul.f32 %v4963_v10, %v4963_v10 }
 0x352   :  { %v2383_v47 = vmul.f32 %v4969_v16, %v4969_v16  ;;  %v2384_v31 = vmul.f32 %v4973_v14, %v4973_v14  ;;  %v4991_v6 = vsub.f32 %v4918_v1, %v2362_v50  ;;  %v2385_v4 = vmul.f32 %v4979_v45, %v4979_v45 }
 0x353   :  { %v2395_v18 = vsel %vm2324_vm7, %v2379_v40, 0.0  ;;  %v2396_v57 = vsel %vm2324_vm7, %v2380_v0, 0.0  ;;  %v2398_v37 = vsel %vm2324_vm7, %v2381_v39, 0.0  ;;  %v2400_v19 = vsel %vm2324_vm7, %v2382_v22, 0.0 }
 0x354   :  { %v2397_v48 = vadd.f32 %v2396_v57, %v2395_v18  ;;  %v2402_v36 = vsel %vm2324_vm7, %v2383_v47, 0.0  ;;  %v4997_v21 = vsub.f32 %v4920_v17, %v2362_v50  ;;  %v2386_v2 = vmul.f32 %v4985_v9, %v4985_v9 }
 0x355   :  { %v2404_v24 = vsel %vm2324_vm7, %v2384_v31, 0.0  ;;  %v5003_v29 = vsub.f32 %v4922_v30, %v2362_v50  ;;  %v2387_v1 = vmul.f32 %v4991_v6, %v4991_v6  ;;  %v2406_v11 = vsel %vm2324_vm7, %v2385_v4, 0.0 }
 0x356   :  { %v2399_v61 = vadd.f32 %v2398_v37, %v2397_v48  ;;  %v5009_v32 = vsub.f32 %v4924_v8, %v2362_v50  ;;  %v2388_v17 = vmul.f32 %v4997_v21, %v4997_v21  ;;  %v2408_v42 = vsel %vm2324_vm7, %v2386_v2, 0.0 }
 0x357   :  { %v5015_v25 = vsub.f32 %v4930_v12, %v2362_v50  ;;  %v2389_v30 = vmul.f32 %v5003_v29, %v5003_v29  ;;  %v2410_v56 = vsel %vm2324_vm7, %v2387_v1, 0.0  ;;  %v5021_v0 = vsub.f32 %v4937_v28, %v2362_v50 }
 0x358   :  { %v2401_v59 = vadd.f32 %v2400_v19, %v2399_v61  ;;  %v2390_v8 = vmul.f32 %v5009_v32, %v5009_v32  ;;  %v2412_v39 = vsel %vm2324_vm7, %v2388_v17, 0.0  ;;  %v5027_v18 = vsub.f32 %v4947_v55, %v2362_v50 }
 0x359   :  { %v2391_v12 = vmul.f32 %v5015_v25, %v5015_v25  ;;  %v2414_v57 = vsel %vm2324_vm7, %v2389_v30, 0.0  ;;  %v5032_v47 = vsub.f32 %v2319_v20, %v2362_v50  ;;  %v2392_v28 = vmul.f32 %v5021_v0, %v5021_v0 }
 0x35a   :  { %v2403_v7 = vadd.f32 %v2402_v36, %v2401_v59  ;;  %v2416_v37 = vsel %vm2324_vm7, %v2390_v8, 0.0  ;;  %v2393_v31 = vmul.f32 %v5027_v18, %v5027_v18  ;;  %v2757_v30 = vmul.f32 %v4898_v43, %v4798_v3  ;;  %v3411_v8 = vld [vmem:[%s5178_s9] ss:$0 sm:$0xff] }
 0x35b   :  { %v2418_v55 = vsel %vm2324_vm7, %v2391_v12, 0.0  ;;  %v2394_v59 = vmul.f32 %v5032_v47, %v5032_v47  ;;  %v2420_v4 = vsel %vm2324_vm7, %v2392_v28, 0.0  ;;  %v2764_v3 = vmul.f32 %v4898_v43, %v4837_v49 }
 0x35c   :  { %v2405_v51 = vadd.f32 %v2404_v24, %v2403_v7  ;;  %v2422_v20 = vsel %vm2324_vm7, %v2393_v31, 0.0  ;;  %v2769_v12 = vmul.f32 %v4898_v43, %v4864_v62  ;;  %v2776_v49 = vmul.f32 %v3411_v8, %v2757_v30 }
 0x35d   :  { %v2424_v7 = vsel %vm2324_vm7, %v2394_v59, 0.0  ;;  %v2781_v62 = vmul.f32 %v3411_v8, %v4902_v5  ;;  %v2786_v59 = vmul.f32 %v3411_v8, %v4909_v23 }
 0x35e   :  { %v2407_v13 = vadd.f32 %v2406_v11, %v2405_v51 }
 0x360   :  { %v2409_v52 = vadd.f32 %v2408_v42, %v2407_v13 }
 0x362   :  { %v2411_v40 = vadd.f32 %v2410_v56, %v2409_v52  ;;  %v2758_v56 = vmul.f32 %v4898_v43, %v4801_v53  ;;  %v2765_v53 = vmul.f32 %v4898_v43, %v4843_v54  ;;  %v3412_v54 = vld [vmem:[%s5179_s10] ss:$0 sm:$0xff] }
 0x363   :  { %v5090_v23 = vadd.f32 %v3412_v54, %v2781_v62 }
 0x364   :  { %v2413_v22 = vadd.f32 %v2412_v39, %v2411_v40  ;;  %v2759_v40 = vmul.f32 %v4898_v43, %v4804_v58  ;;  %v2760_v39 = vmul.f32 %v4898_v43, %v4808_v33  ;;  %v2766_v58 = vmul.f32 %v4898_v43, %v4849_v15 }
 0x365   :  { %v2771_v33 = vmul.f32 %v4898_v43, %v4872_v38  ;;  %v2777_v28 = vmul.f32 %v3411_v8, %v2758_v56  ;;  %v2784_v38 = vmul.f32 %v3411_v8, %v2765_v53 }
 0x366   :  { %v2415_v48 = vadd.f32 %v2414_v57, %v2413_v22  ;;  %v2770_v57 = vmul.f32 %v4898_v43, %v4868_v60  ;;  %v2779_v15 = vmul.f32 %v3411_v8, %v2760_v39  ;;  %v2782_v60 = vmul.f32 %v3411_v8, %v4906_v46 }
 0x368   :  { %v2417_v61 = vadd.f32 %v2416_v37, %v2415_v48  ;;  %v2772_v48 = vmul.f32 %v4898_v43, %v4878_v44  ;;  %v2778_v37 = vmul.f32 %v3411_v8, %v2759_v40  ;;  %v2787_v44 = vmul.f32 %v3411_v8, %v4912_v63 }
 0x369   :  { %v5086_v46 = vadd.f32 %v3412_v54, %v2779_v15  ;;  %v5092_v63 = vadd.f32 %v3412_v54, %v2782_v60 }
 0x36a   :  { %v2419_v19 = vadd.f32 %v2418_v55, %v2417_v61  ;;  %v2783_v55 = vmul.f32 %v3411_v8, %v2764_v3  ;;  %v5084_v5 = vadd.f32 %v3412_v54, %v2778_v37  ;;  %v5102_v30 = vadd.f32 %v3412_v54, %v2787_v44 }
 0x36c   :  { %v2421_v36 = vadd.f32 %v2420_v4, %v2419_v19  ;;  %v2785_v19 = vmul.f32 %v3411_v8, %v2766_v58 }
 0x36e   :  { %v2423_v50 = vadd.f32 %v2422_v20, %v2421_v36  ;;  %v2789_v36 = vmul.f32 %v3411_v8, %v2770_v57  ;;  %v2790_v20 = vmul.f32 %v3411_v8, %v2771_v33 }
 0x370   :  { %v2425_v2 = vadd.f32 %v2424_v7, %v2423_v50  ;;  %v2791_v50 = vmul.f32 %v3411_v8, %v2772_v48  ;;  %v5080_v7 = vadd.f32 %v3412_v54, %v2776_v49  ;;  %v5106_v40 = vadd.f32 %v3412_v54, %v2789_v36 }
 0x372   :  { %v2426_v24 = vrot.slane %v2425_v2, 4  ;;  %v5110_v39 = vadd.f32 %v3412_v54, %v2791_v50 }
 0x374   :  { %v2427_v51 = vadd.f32 %v2426_v24, %v2425_v2  ;;  %v5082_v2 = vadd.f32 %v3412_v54, %v2777_v28 }
 0x376   :  { %v2428_v1 = vrot.slane %v2427_v51, 2 }
 0x378   :  { %v2429_v11 = vadd.f32 %v2428_v1, %v2427_v51  ;;  %v5094_v1 = vadd.f32 %v3412_v54, %v2783_v55 }
 0x37a   :  { %v2430_v13 = vrot.slane %v2429_v11, 1 }
 0x37c   :  { %v2431_v17 = vadd.f32 %v2430_v13, %v2429_v11  ;;  %v5096_v11 = vadd.f32 %v3412_v54, %v2784_v38 }
 0x37e   :  { %v2432_v42 = vmul.f32 %v2431_v17, %v4559_v26  ;;  %v2761_v26 = vmul.f32 %v4898_v43, %v4813_v41  ;;  %v2788_v43 = vmul.f32 %v3411_v8, %v2769_v12  ;;  %v5098_v17 = vadd.f32 %v3412_v54, %v2785_v19  ;;  %v3413_v12 = vld [vmem:[%s5175_s6] ss:$0 sm:$0xff] }
 0x380   :  { %v2433_v52 = vadd.f32 1e-05, %v2432_v42  ;;  %v2780_v61 = vmul.f32 %v3411_v8, %v2761_v26  ;;  %v5100_v42 = vadd.f32 %v3412_v54, %v2786_v59  ;;  %v5104_v56 = vadd.f32 %v3412_v54, %v2788_v43 }
 0x381   :  { %v5108_v8 = vadd.f32 %v3412_v54, %v2790_v20 }
 0x382   :  { %3421 = vrsqrt.f32 %v2433_v52  ;;  %v5088_v51 = vadd.f32 %v3412_v54, %v2780_v61  ;;  %vm2440_vm15 = vweird.f32 %v2433_v52 }
 0x388   :  { %v3422_v22 = vpop.eup %3421 }
 0x389   :  { %v2435_v41 = vmul.f32 %v3422_v22, %v2433_v52  ;;  %vm2441_vm14 = vweird.f32 %v3422_v22 }
 0x38a   :  { %vm2442_vm0 = vmor %vm2440_vm15, %vm2441_vm14 }
 0x38b   :  { %v2436_v31 = vmul.f32 %v3422_v22, %v2435_v41 }
 0x38d   :  { %v2437_v4 = vmul.f32 0.5, %v2436_v31 }
 0x38f   :  { %v2438_v24 = vsub.f32 1.5, %v2437_v4 }
 0x391   :  { %v2439_v13 = vmul.f32 %v3422_v22, %v2438_v24 }
 0x393   :  { %v2443_v26 = vsel %vm2442_vm0, %v3422_v22, %v2439_v13 }
 0x394   :  { %v2444_v3 = vmul.f32 %v2443_v26, %v4957_v27  ;;  %v2445_v52 = vmul.f32 %v2443_v26, %v4959_v34  ;;  %v2446_v53 = vmul.f32 %v2443_v26, %v4961_v35  ;;  %v2447_v58 = vmul.f32 %v2443_v26, %v4963_v10 }
 0x395   :  { %v2448_v57 = vmul.f32 %v2443_v26, %v4969_v16  ;;  %v2449_v33 = vmul.f32 %v2443_v26, %v4973_v14  ;;  %v2450_v41 = vmul.f32 %v2443_v26, %v4979_v45  ;;  %v2451_v22 = vmul.f32 %v2443_v26, %v4985_v9 }
 0x396   :  { %v2452_v27 = vmul.f32 %v2443_v26, %v4991_v6  ;;  %v2453_v34 = vmul.f32 %v2443_v26, %v4997_v21  ;;  %v2454_v35 = vmul.f32 %v2443_v26, %v5003_v29  ;;  %v2455_v10 = vmul.f32 %v2443_v26, %v5009_v32  ;;  %v3414_v6 = vld [vmem:[%s5176_s7] ss:$0 sm:$0xff]  ;;  %s3450_s7 = smov [#allocation2]  }
 0x397   :  { %v2456_v48 = vmul.f32 %v2443_v26, %v5015_v25  ;;  %v2457_v49 = vmul.f32 %v2443_v26, %v5021_v0  ;;  %v2458_v16 = vmul.f32 %v2443_v26, %v5027_v18  ;;  %v2459_v14 = vmul.f32 %v2443_v26, %v5032_v47  ;;  %s2863_s28 = sshll.u32 %s3450_s7, 4  ;;  %s2864_s28 = int_to_ptr.vmem [resolvable:$true] %s2863_s28 }
 0x398   :  { %v2463_v28 = vmul.f32 %v3413_v12, %v2444_v3  ;;  %v2464_v45 = vmul.f32 %v3413_v12, %v2445_v52  ;;  %v2465_v37 = vmul.f32 %v3413_v12, %v2446_v53  ;;  %v2466_v9 = vmul.f32 %v3413_v12, %v2447_v58 }
 0x399   :  { %v2467_v21 = vmul.f32 %v3413_v12, %v2448_v57  ;;  %v2468_v29 = vmul.f32 %v3413_v12, %v2449_v33  ;;  %v2469_v54 = vmul.f32 %v3413_v12, %v2450_v41  ;;  %v2470_v32 = vmul.f32 %v3413_v12, %v2451_v22 }
 0x39a   :  { %v2471_v15 = vmul.f32 %v3413_v12, %v2452_v27  ;;  %v2472_v25 = vmul.f32 %v3413_v12, %v2453_v34  ;;  %v2473_v61 = vmul.f32 %v3413_v12, %v2454_v35  ;;  %v2474_v0 = vmul.f32 %v3413_v12, %v2455_v10 }
 0x39b   :  { %v2475_v62 = vmul.f32 %v3413_v12, %v2456_v48  ;;  %v2476_v18 = vmul.f32 %v3413_v12, %v2457_v49  ;;  %v2477_v31 = vmul.f32 %v3413_v12, %v2458_v16  ;;  %v2478_v47 = vmul.f32 %v3413_v12, %v2459_v14 }
 0x39c   :  { %v2482_v60 = vadd.f32 %v3414_v6, %v2463_v28  ;;  %v2483_v55 = vadd.f32 %v3414_v6, %v2464_v45  ;;  %v2484_v38 = vadd.f32 %v3414_v6, %v2465_v37  ;;  %v2485_v19 = vadd.f32 %v3414_v6, %v2466_v9 }
 0x39d   :  { %v2486_v59 = vadd.f32 %v3414_v6, %v2467_v21  ;;  %v2487_v44 = vadd.f32 %v3414_v6, %v2468_v29  ;;  %v2488_v43 = vadd.f32 %v3414_v6, %v2469_v54  ;;  %v2489_v4 = vadd.f32 %v3414_v6, %v2470_v32 }
 0x39e   :  { %v2490_v36 = vadd.f32 %v3414_v6, %v2471_v15  ;;  %v2491_v20 = vadd.f32 %v3414_v6, %v2472_v25  ;;  %v2492_v50 = vadd.f32 %v3414_v6, %v2473_v61  ;;  %v2493_v24 = vadd.f32 %v3414_v6, %v2474_v0 }
 0x39f   :  { %v2494_v13 = vadd.f32 %v3414_v6, %v2475_v62  ;;  %v2495_v26 = vadd.f32 %v3414_v6, %v2476_v18  ;;  %v2496_v3 = vadd.f32 %v3414_v6, %v2477_v31  ;;  %v2497_v52 = vadd.f32 %v3414_v6, %v2478_v47 }
 0x3a0   :  { %v2811_v53 = vadd.f32 %v5080_v7, %v2482_v60  ;;  %v2812_v58 = vadd.f32 %v5082_v2, %v2483_v55  ;;  %v2813_v12 = vadd.f32 %v5084_v5, %v2484_v38  ;;  %v2814_v57 = vadd.f32 %v5086_v46, %v2485_v19 }
 0x3a1   :  { %v2815_v33 = vadd.f32 %v5088_v51, %v2486_v59  ;;  %v2816_v41 = vadd.f32 %v5090_v23, %v2487_v44  ;;  %v2817_v22 = vadd.f32 %v5092_v63, %v2488_v43  ;;  %v2818_v27 = vadd.f32 %v5094_v1, %v2489_v4 }
 0x3a2   :  { %v2819_v34 = vadd.f32 %v5096_v11, %v2490_v36  ;;  %v2820_v35 = vadd.f32 %v5098_v17, %v2491_v20  ;;  %v2821_v7 = vadd.f32 %v5100_v42, %v2492_v50  ;;  %v2822_v2 = vadd.f32 %v5102_v30, %v2493_v24 }
 0x3a3   :  { %v2823_v5 = vadd.f32 %v5104_v56, %v2494_v13  ;;  %v2824_v46 = vadd.f32 %v5106_v40, %v2495_v26  ;;  %v2825_v51 = vadd.f32 %v5108_v8, %v2496_v3  ;;  %v2826_v23 = vadd.f32 %v5110_v39, %v2497_v52 }
 0x3a4   :  { %v2827_v10 = vmax.f32 %v2811_v53, 0.0  ;;  %v2828_v63 = vmax.f32 %v2812_v58, 0.0  ;;  %v2829_v48 = vmax.f32 %v2813_v12, 0.0  ;;  %v2830_v1 = vmax.f32 %v2814_v57, 0.0 }
 0x3a5   :  { %v2831_v49 = vmax.f32 %v2815_v33, 0.0  ;;  %v2832_v11 = vmax.f32 %v2816_v41, 0.0  ;;  %v2833_v17 = vmax.f32 %v2817_v22, 0.0  ;;  %v2834_v42 = vmax.f32 %v2818_v27, 0.0 }
 0x3a6   :  { %2843 = vst.msk [vmem:[#allocation2] sm:$0xff] %vm2324_vm7, %v2827_v10  ;;  %v2835_v30 = vmax.f32 %v2819_v34, 0.0  ;;  %v2836_v56 = vmax.f32 %v2820_v35, 0.0  ;;  %v2837_v40 = vmax.f32 %v2821_v7, 0.0  ;;  %v2838_v8 = vmax.f32 %v2822_v2, 0.0 }
 0x3a7   :  { %2844 = vst.msk [vmem:[#allocation2 + $0x8] sm:$0xff] %vm2324_vm7, %v2828_v63  ;;  %v2839_v39 = vmax.f32 %v2823_v5, 0.0  ;;  %v2840_v16 = vmax.f32 %v2824_v46, 0.0  ;;  %v2841_v14 = vmax.f32 %v2825_v51, 0.0  ;;  %v2842_v28 = vmax.f32 %v2826_v23, 0.0 }
 0x3a8   :  { %2845 = vst.msk [vmem:[#allocation2 + $0x10] sm:$0xff] %vm2324_vm7, %v2829_v48 }
 0x3a9   :  { %2846 = vst.msk [vmem:[#allocation2 + $0x18] sm:$0xff] %vm2324_vm7, %v2830_v1 }
 0x3aa   :  { %2847 = vst.msk [vmem:[#allocation2 + $0x20] sm:$0xff] %vm2324_vm7, %v2831_v49 }
 0x3ab   :  { %2848 = vst.msk [vmem:[#allocation2 + $0x28] sm:$0xff] %vm2324_vm7, %v2832_v11 }
 0x3ac   :  { %2849 = vst.msk [vmem:[#allocation2 + $0x30] sm:$0xff] %vm2324_vm7, %v2833_v17 }
 0x3ad   :  { %2850 = vst.msk [vmem:[#allocation2 + $0x38] sm:$0xff] %vm2324_vm7, %v2834_v42 }
 0x3ae   :  { %2851 = vst.msk [vmem:[#allocation2 + $0x40] sm:$0xff] %vm2324_vm7, %v2835_v30 }
 0x3af   :  { %2852 = vst.msk [vmem:[#allocation2 + $0x48] sm:$0xff] %vm2324_vm7, %v2836_v56 }
 0x3b0   :  { %2853 = vst.msk [vmem:[#allocation2 + $0x50] sm:$0xff] %vm2324_vm7, %v2837_v40 }
 0x3b1   :  { %2854 = vst.msk [vmem:[#allocation2 + $0x58] sm:$0xff] %vm2324_vm7, %v2838_v8 }
 0x3b2   :  { %2855 = vst.msk [vmem:[#allocation2 + $0x60] sm:$0xff] %vm2324_vm7, %v2839_v39 }
 0x3b3   :  { %2856 = vst.msk [vmem:[#allocation2 + $0x68] sm:$0xff] %vm2324_vm7, %v2840_v16 }
 0x3b4   :  { %2857 = vst.msk [vmem:[#allocation2 + $0x70] sm:$0xff] %vm2324_vm7, %v2841_v14 }
 0x3b5   :  { %2858 = vst.msk [vmem:[#allocation2 + $0x78] sm:$0xff] %vm2324_vm7, %v2842_v28 }
 0x3b6   :  { %2871 = dma.vmem_to_hbm [thread:$0]  %s2864_s28, 2048, %s2866_s29, [#allocation3], %s3451_s30, %s3451_s30, %s3452_s12  }
 0x3b7   :  { %3447 = dma.done.wait [#allocation3], 2048  }
 0x3b8   :  { %3448 = vsyncadd [#allocation3], 4294965248 }
 0x3b9   :  { %2876 = vsyncpa [#allocation3], 1 }

</bundles_post_ra>
